<compile_context>
chip_gen: v5e
topology: v5e:2x2
jax: 0.10.0
libtpu: 0.0.40
codegen_flags: <defaults>
</compile_context>

<pallas_src>
import functools

import jax
import jax.numpy as jnp
from jax import lax
from jax.experimental import pallas as pl
from jax.experimental.pallas import tpu as pltpu


_NEG_SLOPE = 0.01  # PyTorch nn.LeakyReLU default


def _leaky_relu(x):
    return jnp.where(x >= 0, x, _NEG_SLOPE * x)


def _point_sim_kernel(vpt_ref, vpr_ref, ep_ref,
                      w1_ref, b1_ref, w2_ref, b2_ref, w3_ref, b3_ref,
                      ep_out_ref, nsim_out_ref, *, metric, tm, c2):
    # vpt_ref: (1, D, N)   node features channels-first (all column nodes, N in lanes)
    # vpr_ref: (1, TM, D)  this tile's row nodes (aligned DMA'd block)
    # ep_ref / outputs: (1, TM, N)
    vc = vpt_ref[0]                                   # (D, N)
    vr = vpr_ref[0]                                   # (TM, D)
    n = vc.shape[1]

    # Pairwise similarity for the whole tile, channels on sublanes, N in lanes.
    diff = vr[:, :, None] - vc[None, :, :]            # (TM, D, N)
    if metric == 'l2':
        sim = diff * diff
    else:                                             # 'l1'
        sim = jnp.abs(diff)

    # ---- point_sim_transform: 1x1-conv MLP (BN folded), batched over TM rows ----
    # w1 carries one extra row of -1s so node_similarity (-sum_d sim) comes out of
    # the same MXU pass as the first conv.
    w1 = w1_ref[...]                                  # (C1P, D), C1P = pad(2C+1, 8)
    w1_b = jnp.broadcast_to(w1, (tm,) + w1.shape)     # (TM, C1P, D), hoisted once
    h1_full = jnp.einsum('rcd,rdn->rcn', w1_b, sim,
                         preferred_element_type=jnp.float32)      # (TM, C1P, N)

    nsim = h1_full[:, c2, :]                          # (TM, N) == -sum_d sim
    h1 = _leaky_relu(h1_full[:, :c2, :] + b1_ref[...][None])      # (TM, 2C, N)

    w2 = w2_ref[...]                                  # (C, 2C)
    w2_b = jnp.broadcast_to(w2, (tm,) + w2.shape)     # (TM, C, 2C)
    h2 = jnp.einsum('rce,ren->rcn', w2_b, h1,
                    preferred_element_type=jnp.float32)           # (TM, C, N)
    h2 = _leaky_relu(h2 + b2_ref[...][None])

    # Width-1 conv as a single block-wide multiply + channel reduce.
    logits = jnp.sum(h2 * w3_ref[...][None], axis=1) + b3_ref[0, 0]   # (TM, N)
    ep_pred = jax.nn.sigmoid(logits)                                  # (TM, N)

    # ---- edge normalization on the whole (TM, N) block ----
    row_base = pl.program_id(1) * tm
    row_ids = lax.broadcasted_iota(jnp.int32, (tm, n), 0) + row_base
    col_ids = lax.broadcasted_iota(jnp.int32, (tm, n), 1)
    diag = (row_ids == col_ids).astype(jnp.float32)   # built once per tile
    not_diag = 1.0 - diag

    ep_blk = ep_ref[0]                                # (TM, N)
    ep_m = ep_blk * not_diag
    ep_sum = jnp.sum(ep_m, axis=-1, keepdims=True)    # (TM, 1)
    x = ep_pred * ep_m
    l1 = jnp.maximum(jnp.sum(jnp.abs(x), axis=-1, keepdims=True), 1e-12)
    out = (x / l1) * ep_sum
    out = out + diag + 1e-6
    out = out / jnp.sum(out, axis=-1, keepdims=True)

    # One full, unmasked (TM, N) store per output.
    ep_out_ref[0] = out
    nsim_out_ref[0] = nsim


def _pick_tm(n, bytes_per_point, budget_bytes=16 * 1024 * 1024, cap=256):
    """Largest multiple-of-8 divisor of N (<= cap) whose tile fits the VMEM budget."""
    if n <= 8:
        return n
    max_pts = max(budget_bytes // bytes_per_point, 8)
    best = None
    for tm in range(8, min(n, cap) + 1, 8):
        if n % tm == 0 and tm * n <= max_pts:
            best = tm
    if best is not None:
        return best
    for tm in range(8, n + 1, 8):      # fall back to smallest multiple-of-8 divisor
        if n % tm == 0:
            return tm
    return n


def point_similarity_pre(vp, ep, params, distance_metric='l2'):
    """vp: (B,N,D) f32, ep: (B,N,N) f32 -> (ep_ij (B,N,N), node_sim_l2 (B,N,N))."""
    B, N, D = vp.shape
    w1, s1, b1, w2, s2, b2, w3, b3 = params
    c2 = w1.shape[1]                                   # 2 * base_c
    c1 = w2.shape[1]                                   # base_c

    # Fold BatchNorm (eval mode) scales into the conv weights; keep the biases.
    # Kernel weights are channels-first: (out_channels, in_channels).
    w1k = (w1 * s1).T.astype(jnp.float32)              # (2C, D)
    c1p = ((c2 + 1 + 7) // 8) * 8                      # pad out-channels of layer 1
    w1_ext = jnp.concatenate(
        [w1k,
         -jnp.ones((1, D), jnp.float32),               # node-similarity row
         jnp.zeros((c1p - c2 - 1, D), jnp.float32)], axis=0)      # (C1P, D)
    b1k = b1.reshape(c2, 1).astype(jnp.float32)        # (2C, 1)
    w2k = (w2 * s2).T.astype(jnp.float32)              # (C, 2C)
    b2k = b2.reshape(c1, 1).astype(jnp.float32)        # (C, 1)
    w3k = w3.astype(jnp.float32)                       # (C, 1)
    b3k = b3.reshape(1, 1).astype(jnp.float32)         # (1, 1) SMEM scalar

    vp = vp.astype(jnp.float32)
    vp_t = jnp.swapaxes(vp, 1, 2)                      # (B, D, N): N in lanes

    # ~Peak live f32 per (row, col) point inside the kernel (sim + h1 + h2 + misc).
    bytes_per_point = 4 * (D + c1p + c2 + c1 + 8)
    tm = _pick_tm(N, bytes_per_point)
    grid = (B, N // tm)

    kernel = functools.partial(_point_sim_kernel, metric=distance_metric,
                               tm=tm, c2=c2)

    def wspec(arr):
        nd = arr.ndim
        return pl.BlockSpec(arr.shape, lambda b, m, _nd=nd: (0,) * _nd)

    grid_spec = pltpu.PrefetchScalarGridSpec(
        num_scalar_prefetch=0,
        grid=grid,
        in_specs=[
            pl.BlockSpec((1, D, N), lambda b, m: (b, 0, 0)),    # all column nodes
            pl.BlockSpec((1, tm, D), lambda b, m: (b, m, 0)),   # row-tile nodes
            pl.BlockSpec((1, tm, N), lambda b, m: (b, m, 0)),   # ep row block
            wspec(w1_ext), wspec(b1k), wspec(w2k), wspec(b2k), wspec(w3k),
            pl.BlockSpec(memory_space=pltpu.MemorySpace.SMEM),  # b3 scalar
        ],
        out_specs=[
            pl.BlockSpec((1, tm, N), lambda b, m: (b, m, 0)),   # ep_ij
            pl.BlockSpec((1, tm, N), lambda b, m: (b, m, 0)),   # node_similarity_l2
        ],
    )

    # VMEM budget: compute intermediates + double-buffered in/out blocks + weights.
    step_bytes = (tm * N * bytes_per_point
                  + 2 * 4 * (D * N + tm * D + 3 * tm * N)
                  + 4 * (c1p * D + c2 + c1 * c2 + 2 * c1))
    vmem_limit = int(min(64 * 1024 * 1024, max(16 * 1024 * 1024, 2 * step_bytes)))

    cost = pl.CostEstimate(
        flops=int(2 * B * N * N * (c1p * D + c1 * c2 + c1) + 30 * B * N * N),
        transcendentals=int(B * N * N),
        bytes_accessed=int(4 * (3 * B * N * N + 2 * B * N * D)),
    )

    return pl.pallas_call(
        kernel,
        grid_spec=grid_spec,
        out_shape=(jax.ShapeDtypeStruct((B, N, N), jnp.float32),
                   jax.ShapeDtypeStruct((B, N, N), jnp.float32)),
        compiler_params=pltpu.CompilerParams(
            dimension_semantics=("parallel", "parallel"),
            vmem_limit_bytes=vmem_limit),
        cost_estimate=cost,
    )(vp_t, vp, ep, w1_ext, b1k, w2k, b2k, w3k, b3k)


def init_params(key, in_c, base_c):
    """Deterministic synthetic parameters. BN folded into scale/bias (eval mode)."""
    c2, c1 = base_c * 2, base_c
    ks = jax.random.split(key, 12)
    eps = 1e-5

    def fold_bn(kg, kb, km, kv, c):
        gamma = jax.random.uniform(kg, (1, c), minval=0.5, maxval=1.5)
        beta = 0.1 * jax.random.normal(kb, (1, c))
        mean = 0.1 * jax.random.normal(km, (1, c))
        var = jax.random.uniform(kv, (1, c), minval=0.5, maxval=1.5)
        scale = gamma / jnp.sqrt(var + eps)
        bias = beta - mean * scale
        return scale.astype(jnp.float32), bias.astype(jnp.float32)

    w1 = (0.2 * jax.random.normal(ks[0], (in_c, c2))).astype(jnp.float32)
    s1, b1 = fold_bn(ks[1], ks[2], ks[3], ks[4], c2)
    w2 = (0.2 * jax.random.normal(ks[5], (c2, c1))).astype(jnp.float32)
    s2, b2 = fold_bn(ks[6], ks[7], ks[8], ks[9], c1)
    w3 = (0.2 * jax.random.normal(ks[10], (c1, 1))).astype(jnp.float32)
    b3 = (0.1 * jax.random.normal(ks[11], (1, 1))).astype(jnp.float32)
    return (w1, s1, b1, w2, s2, b2, w3, b3)


def reference(vp, ep, params, distance_metric='l2'):
    """Pure-JAX replica of the PyTorch forward (BN folded, eval mode)."""
    w1, s1, b1, w2, s2, b2, w3, b3 = params
    B, N, D = vp.shape
    diff = vp[:, :, None, :] - vp[:, None, :, :]            # (B,N,N,D)
    sim = diff ** 2 if distance_metric == 'l2' else jnp.abs(diff)
    h = _leaky_relu(jnp.einsum('bijd,dc->bijc', sim, w1) * s1[0] + b1[0])
    h = _leaky_relu(jnp.einsum('bijc,ce->bije', h, w2) * s2[0] + b2[0])
    logits = jnp.einsum('bijc,co->bijo', h, w3)[..., 0] + b3[0, 0]
    ep_ij = jax.nn.sigmoid(logits)                          # (B,N,N)

    eye = jnp.eye(N, dtype=jnp.float32)
    ep_masked = ep * (1.0 - eye)[None]
    ep_sum = jnp.sum(ep_masked, -1, keepdims=True)
    x = ep_ij * ep_masked
    l1 = jnp.maximum(jnp.sum(jnp.abs(x), -1, keepdims=True), 1e-12)
    out = (x / l1) * ep_sum
    out = out + eye[None] + 1e-6
    out = out / jnp.sum(out, -1, keepdims=True)
    node_sim = -jnp.sum(sim, -1)
    return out, node_sim


if __name__ == "__main__":
    B, N, in_c, base_c = 2, 16, 8, 16

    key = jax.random.PRNGKey(0)
    k_vp, k_ep, k_p = jax.random.split(key, 3)
    vp = jax.random.normal(k_vp, (B, N, in_c), dtype=jnp.float32)
    ep = jax.random.uniform(k_ep, (B, N, N), dtype=jnp.float32)
    params = init_params(k_p, in_c, base_c)

    ep_ij, node_sim = point_similarity_pre(vp, ep, params, 'l2')
    jax.block_until_ready((ep_ij, node_sim))

    ep_ref, ns_ref = reference(vp, ep, params, 'l2')
    assert jnp.allclose(ep_ij, ep_ref, rtol=1e-5, atol=1e-5), "ep_ij mismatch"
    assert jnp.allclose(node_sim, ns_ref, rtol=1e-5, atol=1e-5), "node_sim mismatch"

    print("KERNEL_OK")
</pallas_src>

<mosaic_0001>
module attributes {stable_mosaic.version = 11 : i64} {
  func.func @_point_sim_kernel(%arg0: i32, %arg1: i32, %arg2: memref<1x8x16xf32, #tpu.memory_space<vmem>>, %arg3: memref<1x16x8xf32, #tpu.memory_space<vmem>>, %arg4: memref<1x16x16xf32, #tpu.memory_space<vmem>>, %arg5: memref<40x8xf32, #tpu.memory_space<vmem>>, %arg6: memref<32x1xf32, #tpu.memory_space<vmem>>, %arg7: memref<16x32xf32, #tpu.memory_space<vmem>>, %arg8: memref<16x1xf32, #tpu.memory_space<vmem>>, %arg9: memref<16x1xf32, #tpu.memory_space<vmem>>, %arg10: memref<1x1xf32, #tpu.memory_space<smem>>, %arg11: memref<1x16x16xf32, #tpu.memory_space<vmem>>, %arg12: memref<1x16x16xf32, #tpu.memory_space<vmem>>) attributes {dimension_semantics = [#tpu.dimension_semantics<parallel>, #tpu.dimension_semantics<parallel>], iteration_bounds = array<i64: 2, 1>, scalar_prefetch = 0 : i64, scratch_operands = 0 : i64, tpu.core_type = #tpu.core_type<tc>, window_params = [{transform_indices = @transform_0, window_bounds = array<i64: 1, 8, 16>}, {transform_indices = @transform_1, window_bounds = array<i64: 1, 16, 8>}, {transform_indices = @transform_2, window_bounds = array<i64: 1, 16, 16>}, {pipeline_mode = #tpu.pipeline_mode<synchronous>, transform_indices = @transform_3, window_bounds = array<i64: 40, 8>}, {pipeline_mode = #tpu.pipeline_mode<synchronous>, transform_indices = @transform_4, window_bounds = array<i64: 32, 1>}, {pipeline_mode = #tpu.pipeline_mode<synchronous>, transform_indices = @transform_5, window_bounds = array<i64: 16, 32>}, {pipeline_mode = #tpu.pipeline_mode<synchronous>, transform_indices = @transform_6, window_bounds = array<i64: 16, 1>}, {pipeline_mode = #tpu.pipeline_mode<synchronous>, transform_indices = @transform_7, window_bounds = array<i64: 16, 1>}, {transform_indices = @transform_8, window_bounds = array<i64: 1, 1>}, {transform_indices = @transform_9, window_bounds = array<i64: 1, 16, 16>}, {transform_indices = @transform_10, window_bounds = array<i64: 1, 16, 16>}]} {
    %c0 = arith.constant 0 : index
    %c0_0 = arith.constant 0 : index
    %c0_1 = arith.constant 0 : index
    %0 = vector.load %arg2[%c0, %c0_0, %c0_1] : memref<1x8x16xf32, #tpu.memory_space<vmem>>, vector<1x8x16xf32>
    %1 = vector.shape_cast %0 : vector<1x8x16xf32> to vector<8x16xf32>
    %c0_2 = arith.constant 0 : index
    %c0_3 = arith.constant 0 : index
    %c0_4 = arith.constant 0 : index
    %2 = vector.load %arg3[%c0_2, %c0_3, %c0_4] : memref<1x16x8xf32, #tpu.memory_space<vmem>>, vector<1x16x8xf32>
    %3 = vector.shape_cast %2 : vector<1x16x8xf32> to vector<16x8xf32>
    %4 = vector.shape_cast %3 : vector<16x8xf32> to vector<16x8x1xf32>
    %5 = vector.shape_cast %1 : vector<8x16xf32> to vector<1x8x16xf32>
    %6 = vector.broadcast %4 : vector<16x8x1xf32> to vector<16x8x16xf32>
    %7 = vector.broadcast %5 : vector<1x8x16xf32> to vector<16x8x16xf32>
    %8 = arith.subf %6, %7 : vector<16x8x16xf32>
    %9 = arith.mulf %8, %8 : vector<16x8x16xf32>
    %c0_5 = arith.constant 0 : index
    %c0_6 = arith.constant 0 : index
    %10 = vector.load %arg5[%c0_5, %c0_6] : memref<40x8xf32, #tpu.memory_space<vmem>>, vector<40x8xf32>
    %11 = vector.shape_cast %10 : vector<40x8xf32> to vector<1x40x8xf32>
    %12 = vector.broadcast %11 : vector<1x40x8xf32> to vector<16x40x8xf32>
    "tpu.trace_start"() <{level = 10 : i32, message = "rcd,rdn->rcn"}> : () -> ()
    %cst = arith.constant dense<0.000000e+00> : vector<16x40x16xf32>
    %13 = tpu.matmul %12, %9, %cst {dimension_numbers = #tpu.dot_dimension_numbers<[2], [1], [1], [2], [0, 0, 0, 1, 1, 2], [0], [0]>} : vector<16x40x8xf32>, vector<16x8x16xf32>, vector<16x40x16xf32> -> vector<16x40x16xf32>
    "tpu.trace_stop"() : () -> ()
    %14 = vector.extract_strided_slice %13 {offsets = [0, 32, 0], sizes = [16, 1, 16], strides = [1, 1, 1]} : vector<16x40x16xf32> to vector<16x1x16xf32>
    %15 = vector.shape_cast %14 : vector<16x1x16xf32> to vector<16x16xf32>
    %16 = vector.extract_strided_slice %13 {offsets = [0, 0, 0], sizes = [16, 32, 16], strides = [1, 1, 1]} : vector<16x40x16xf32> to vector<16x32x16xf32>
    %c0_7 = arith.constant 0 : index
    %c0_8 = arith.constant 0 : index
    %17 = vector.load %arg6[%c0_7, %c0_8] : memref<32x1xf32, #tpu.memory_space<vmem>>, vector<32x1xf32>
    %18 = vector.shape_cast %17 : vector<32x1xf32> to vector<1x32x1xf32>
    %19 = vector.broadcast %18 : vector<1x32x1xf32> to vector<16x32x16xf32>
    %20 = arith.addf %16, %19 : vector<16x32x16xf32>
    %cst_9 = arith.constant 0.000000e+00 : f32
    %21 = vector.broadcast %cst_9 : f32 to vector<16x32x16xf32>
    %22 = arith.cmpf oge, %20, %21 : vector<16x32x16xf32>
    %cst_10 = arith.constant 0.00999999977 : f32
    %23 = vector.broadcast %cst_10 : f32 to vector<16x32x16xf32>
    %24 = arith.mulf %23, %20 : vector<16x32x16xf32>
    %25 = arith.select %22, %20, %24 : vector<16x32x16xi1>, vector<16x32x16xf32>
    %c0_11 = arith.constant 0 : index
    %c0_12 = arith.constant 0 : index
    %26 = vector.load %arg7[%c0_11, %c0_12] : memref<16x32xf32, #tpu.memory_space<vmem>>, vector<16x32xf32>
    %27 = vector.shape_cast %26 : vector<16x32xf32> to vector<1x16x32xf32>
    %28 = vector.broadcast %27 : vector<1x16x32xf32> to vector<16x16x32xf32>
    "tpu.trace_start"() <{level = 10 : i32, message = "rce,ren->rcn"}> : () -> ()
    %cst_13 = arith.constant dense<0.000000e+00> : vector<16x16x16xf32>
    %29 = tpu.matmul %28, %25, %cst_13 {dimension_numbers = #tpu.dot_dimension_numbers<[2], [1], [1], [2], [0, 0, 0, 1, 1, 2], [0], [0]>} : vector<16x16x32xf32>, vector<16x32x16xf32>, vector<16x16x16xf32> -> vector<16x16x16xf32>
    "tpu.trace_stop"() : () -> ()
    %c0_14 = arith.constant 0 : index
    %c0_15 = arith.constant 0 : index
    %30 = vector.load %arg8[%c0_14, %c0_15] : memref<16x1xf32, #tpu.memory_space<vmem>>, vector<16x1xf32>
    %31 = vector.shape_cast %30 : vector<16x1xf32> to vector<1x16x1xf32>
    %32 = vector.broadcast %31 : vector<1x16x1xf32> to vector<16x16x16xf32>
    %33 = arith.addf %29, %32 : vector<16x16x16xf32>
    %cst_16 = arith.constant 0.000000e+00 : f32
    %34 = vector.broadcast %cst_16 : f32 to vector<16x16x16xf32>
    %35 = arith.cmpf oge, %33, %34 : vector<16x16x16xf32>
    %cst_17 = arith.constant 0.00999999977 : f32
    %36 = vector.broadcast %cst_17 : f32 to vector<16x16x16xf32>
    %37 = arith.mulf %36, %33 : vector<16x16x16xf32>
    %38 = arith.select %35, %33, %37 : vector<16x16x16xi1>, vector<16x16x16xf32>
    %c0_18 = arith.constant 0 : index
    %c0_19 = arith.constant 0 : index
    %39 = vector.load %arg9[%c0_18, %c0_19] : memref<16x1xf32, #tpu.memory_space<vmem>>, vector<16x1xf32>
    %40 = vector.shape_cast %39 : vector<16x1xf32> to vector<1x16x1xf32>
    %41 = vector.broadcast %40 : vector<1x16x1xf32> to vector<16x16x16xf32>
    %42 = arith.mulf %38, %41 : vector<16x16x16xf32>
    %cst_20 = arith.constant dense<0.000000e+00> : vector<16x16xf32>
    %43 = vector.multi_reduction <add>, %42, %cst_20 [1] : vector<16x16x16xf32> to vector<16x16xf32>
    %c0_21 = arith.constant 0 : index
    %c0_22 = arith.constant 0 : index
    %44 = memref.load %arg10[%c0_21, %c0_22] : memref<1x1xf32, #tpu.memory_space<smem>>
    %45 = vector.broadcast %44 : f32 to vector<16x16xf32>
    %46 = arith.addf %43, %45 : vector<16x16xf32>
    %47 = arith.negf %46 : vector<16x16xf32>
    %48 = math.exp %47 : vector<16x16xf32>
    %cst_23 = arith.constant 1.000000e+00 : f32
    %49 = vector.broadcast %cst_23 : f32 to vector<16x16xf32>
    %50 = arith.addf %49, %48 : vector<16x16xf32>
    %51 = arith.divf %49, %50 : vector<16x16xf32>
    %c16_i32 = arith.constant 16 : i32
    %52 = arith.muli %arg1, %c16_i32 : i32
    %53 = tpu.iota {dimensions = array<i32: 0>} : vector<16x16xi32>
    %54 = vector.broadcast %52 : i32 to vector<16x16xi32>
    %55 = arith.addi %53, %54 : vector<16x16xi32>
    %56 = tpu.iota {dimensions = array<i32: 1>} : vector<16x16xi32>
    %57 = arith.cmpi eq, %55, %56 : vector<16x16xi32>
    %58 = arith.extui %57 : vector<16x16xi1> to vector<16x16xi32>
    %59 = arith.sitofp %58 : vector<16x16xi32> to vector<16x16xf32>
    %cst_24 = arith.constant 1.000000e+00 : f32
    %60 = vector.broadcast %cst_24 : f32 to vector<16x16xf32>
    %61 = arith.subf %60, %59 : vector<16x16xf32>
    %c0_25 = arith.constant 0 : index
    %c0_26 = arith.constant 0 : index
    %c0_27 = arith.constant 0 : index
    %62 = vector.load %arg4[%c0_25, %c0_26, %c0_27] : memref<1x16x16xf32, #tpu.memory_space<vmem>>, vector<1x16x16xf32>
    %63 = vector.shape_cast %62 : vector<1x16x16xf32> to vector<16x16xf32>
    %64 = arith.mulf %63, %61 : vector<16x16xf32>
    %cst_28 = arith.constant dense<0.000000e+00> : vector<16xf32>
    %65 = vector.multi_reduction <add>, %64, %cst_28 [1] : vector<16x16xf32> to vector<16xf32>
    %66 = vector.shape_cast %65 : vector<16xf32> to vector<16x1xf32>
    %67 = arith.mulf %51, %64 : vector<16x16xf32>
    %68 = math.absf %67 : vector<16x16xf32>
    %cst_29 = arith.constant dense<0.000000e+00> : vector<16xf32>
    %69 = vector.multi_reduction <add>, %68, %cst_29 [1] : vector<16x16xf32> to vector<16xf32>
    %70 = vector.shape_cast %69 : vector<16xf32> to vector<16x1xf32>
    %cst_30 = arith.constant 9.99999996E-13 : f32
    %71 = vector.broadcast %cst_30 : f32 to vector<16x1xf32>
    %72 = arith.maximumf %70, %71 : vector<16x1xf32>
    %73 = vector.broadcast %72 : vector<16x1xf32> to vector<16x16xf32>
    %74 = arith.divf %67, %73 : vector<16x16xf32>
    %75 = vector.broadcast %66 : vector<16x1xf32> to vector<16x16xf32>
    %76 = arith.mulf %74, %75 : vector<16x16xf32>
    %77 = arith.addf %76, %59 : vector<16x16xf32>
    %cst_31 = arith.constant 9.99999997E-7 : f32
    %78 = vector.broadcast %cst_31 : f32 to vector<16x16xf32>
    %79 = arith.addf %77, %78 : vector<16x16xf32>
    %cst_32 = arith.constant dense<0.000000e+00> : vector<16xf32>
    %80 = vector.multi_reduction <add>, %79, %cst_32 [1] : vector<16x16xf32> to vector<16xf32>
    %81 = vector.shape_cast %80 : vector<16xf32> to vector<16x1xf32>
    %82 = vector.broadcast %81 : vector<16x1xf32> to vector<16x16xf32>
    %83 = arith.divf %79, %82 : vector<16x16xf32>
    %c0_33 = arith.constant 0 : index
    %c0_34 = arith.constant 0 : index
    %c0_35 = arith.constant 0 : index
    %84 = vector.load %arg11[%c0_33, %c0_34, %c0_35] : memref<1x16x16xf32, #tpu.memory_space<vmem>>, vector<1x16x16xf32>
    %85 = vector.shape_cast %84 : vector<1x16x16xf32> to vector<16x16xf32>
    %86 = vector.shape_cast %83 : vector<16x16xf32> to vector<1x16x16xf32>
    tpu.vector_store %arg11[%c0_33, %c0_34, %c0_35], %86 {strides = array<i32>} : memref<1x16x16xf32, #tpu.memory_space<vmem>>, vector<1x16x16xf32>,
    %c0_36 = arith.constant 0 : index
    %c0_37 = arith.constant 0 : index
    %c0_38 = arith.constant 0 : index
    %87 = vector.load %arg12[%c0_36, %c0_37, %c0_38] : memref<1x16x16xf32, #tpu.memory_space<vmem>>, vector<1x16x16xf32>
    %88 = vector.shape_cast %87 : vector<1x16x16xf32> to vector<16x16xf32>
    %89 = vector.shape_cast %15 : vector<16x16xf32> to vector<1x16x16xf32>
    tpu.vector_store %arg12[%c0_36, %c0_37, %c0_38], %89 {strides = array<i32>} : memref<1x16x16xf32, #tpu.memory_space<vmem>>, vector<1x16x16xf32>,
    return
  }
  func.func @transform_0(%arg0: i32, %arg1: i32) -> (i32, i32, i32) {
    %c0_i32 = arith.constant 0 : i32
    %c0_i32_0 = arith.constant 0 : i32
    %c0_i32_1 = arith.constant 0 : i32
    return %arg0, %c0_i32, %c0_i32_0 : i32, i32, i32
  }
  func.func @transform_1(%arg0: i32, %arg1: i32) -> (i32, i32, i32) {
    %c0_i32 = arith.constant 0 : i32
    %c0_i32_0 = arith.constant 0 : i32
    return %arg0, %arg1, %c0_i32 : i32, i32, i32
  }
  func.func @transform_2(%arg0: i32, %arg1: i32) -> (i32, i32, i32) {
    %c0_i32 = arith.constant 0 : i32
    %c0_i32_0 = arith.constant 0 : i32
    return %arg0, %arg1, %c0_i32 : i32, i32, i32
  }
  func.func @transform_3(%arg0: i32, %arg1: i32) -> (i32, i32) {
    %c0_i32 = arith.constant 0 : i32
    %c0_i32_0 = arith.constant 0 : i32
    %c0_i32_1 = arith.constant 0 : i32
    return %c0_i32, %c0_i32_0 : i32, i32
  }
  func.func @transform_4(%arg0: i32, %arg1: i32) -> (i32, i32) {
    %c0_i32 = arith.constant 0 : i32
    %c0_i32_0 = arith.constant 0 : i32
    %c0_i32_1 = arith.constant 0 : i32
    return %c0_i32, %c0_i32_0 : i32, i32
  }
  func.func @transform_5(%arg0: i32, %arg1: i32) -> (i32, i32) {
    %c0_i32 = arith.constant 0 : i32
    %c0_i32_0 = arith.constant 0 : i32
    %c0_i32_1 = arith.constant 0 : i32
    return %c0_i32, %c0_i32_0 : i32, i32
  }
  func.func @transform_6(%arg0: i32, %arg1: i32) -> (i32, i32) {
    %c0_i32 = arith.constant 0 : i32
    %c0_i32_0 = arith.constant 0 : i32
    %c0_i32_1 = arith.constant 0 : i32
    return %c0_i32, %c0_i32_0 : i32, i32
  }
  func.func @transform_7(%arg0: i32, %arg1: i32) -> (i32, i32) {
    %c0_i32 = arith.constant 0 : i32
    %c0_i32_0 = arith.constant 0 : i32
    %c0_i32_1 = arith.constant 0 : i32
    return %c0_i32, %c0_i32_0 : i32, i32
  }
  func.func @transform_8(%arg0: i32, %arg1: i32) -> (i32, i32) {
    %c0_i32 = arith.constant 0 : i32
    %c0_i32_0 = arith.constant 0 : i32
    %c0_i32_1 = arith.constant 0 : i32
    return %c0_i32, %c0_i32_0 : i32, i32
  }
  func.func @transform_9(%arg0: i32, %arg1: i32) -> (i32, i32, i32) {
    %c0_i32 = arith.constant 0 : i32
    %c0_i32_0 = arith.constant 0 : i32
    return %arg0, %arg1, %c0_i32 : i32, i32, i32
  }
  func.func @transform_10(%arg0: i32, %arg1: i32) -> (i32, i32, i32) {
    %c0_i32 = arith.constant 0 : i32
    %c0_i32_0 = arith.constant 0 : i32
    return %arg0, %arg1, %c0_i32 : i32, i32, i32
  }
}

</mosaic_0001>

<bundles_post_ra>
// kernel: tpu_custom_call.1
= control target key start
LH: loop header
LB: loop body
LE: loop exit
PB: predicated region body
PF: predicated region fallthrough
CT: control target
= control target key end

     0   :  { %s5981_s0 = inlined_call_operand.vmem [shape: f32[2,8,16], index: 0, kind: input, shape index: {}]   ;;  %s5982_s1 = inlined_call_operand.vmem [shape: f32[2,16,8], index: 1, kind: input, shape index: {}]   ;;  %s5983_s2 = inlined_call_operand.vmem [shape: f32[2,16,16], index: 2, kind: input, shape index: {}]   ;;  %s5984_s3 = inlined_call_operand.vmem [shape: f32[40,8], index: 3, kind: input, shape index: {}]   ;;  %s5985_s4 = inlined_call_operand.vmem [shape: f32[32,1], index: 4, kind: input, shape index: {}]   ;;  %s5986_s5 = inlined_call_operand.vmem [shape: f32[16,32], index: 5, kind: input, shape index: {}]   ;;  %s5987_s6 = inlined_call_operand.vmem [shape: f32[16,1], index: 6, kind: input, shape index: {}]   ;;  %s5988_s7 = inlined_call_operand.vmem [shape: f32[16,1], index: 7, kind: input, shape index: {}]   ;;  %s5989_s8 = inlined_call_operand.<no memory space> [shape: f32[1,1], index: 8, kind: input, shape index: {}]   ;;  %s5990_s9 = inlined_call_operand.hbm [shape: f32[2,16,16], index: 9, kind: output, shape index: {0}]   ;;  %s5991_s10 = inlined_call_operand.hbm [shape: f32[2,16,16], index: 10, kind: output, shape index: {1}]  }
   0x1   :  { %6000 = sst [smem:[#allocation9_spill]] %s5981_s0 }
   0x2   :  { %6001 = sst [smem:[#allocation10_spill]] %s5982_s1 }
   0x3   :  { %16 = sst [smem:[#allocation2]] %s5989_s8 }
   0x4   :  { %17 = vsyncpa [#allocation4], 0 }
   0x5   :  { %19 = vsyncpa [#allocation4 + $0x1], 0 }
   0x6   :  { %20 = vsyncpa [#allocation6], 0 }
   0x7   :  { %22 = vsyncpa [#allocation6 + $0x1], 0  ;;  %s4082_s15 = smov 0   ;;  %s4084_s16 = smov 0  }
   0x8   :  { %s4086_s17 = smov 0   ;;  %s4088_s18 = smov 0  }
   0x9   :  { %s4090_s19 = smov 0   ;;  %s4092_s20 = smov 0  }
   0xa LB: > { %s3556_s8 = sadd.s32 4294967295, %s4018_s20   ;;  %s3557_s21 = sadd.s32 4294967294, %s4018_s20   ;;  %s4018_s20 = sphi %s4092_s20, %s28_s20   ;;  %s4014_s19 = sphi %s4090_s19, %s6135_s19   ;;  %s4010_s18 = sphi %s4088_s18, %s6134_s18   ;;  %s4006_s17 = sphi %s4086_s17, %s6133_s17   ;;  %s4002_s16 = sphi %s4084_s16, %s6132_s16   ;;  %s3998_s15 = sphi %s4082_s15, %s6131_s15  }
   0xb   : > { %s40_s22 = sadd.s32 1, %s4014_s19  ;;  %s257_s23 = sadd.s32 1, %s4006_s17 }
   0xc   : > { %p42_p0 = scmp.ge.s32.totalorder %s40_s22, 2  ;;  %p267_p1 = scmp.ne.s32.totalorder %s4006_s17, %s4002_s16 }
   0xd   : > { %p268_p2 = scmp.eq.s32.totalorder %s3556_s8, 1  ;;  %p273_p3 = scmp.ne.s32.totalorder %s4002_s16, %s3998_s15 }
   0xe   : > { %s6137_s22 = smov (%p42_p0, %s40_s22), 0  ;;  %p274_p5 = scmp.eq.s32.totalorder %s3557_s21, 1 }
   0xf   : > { %p4122_p4 = por %p268_p2, %p267_p1  ;;  %s252_s25 = ssub.s32 %s4014_s19, %s6137_s22 }
  0x10   : > { %p3560_p6 = scmp.ge.s32.totalorder %s4018_s20, 1  ;;  %p255_p7 = scmp.eq.s32.totalorder %s252_s25, 0 }
  0x11   : > { %p4129_p8 = por %p274_p5, %p273_p3  ;;  %p371_p9 = scmp.lt.s32.totalorder %s4018_s20, 3 }
  0x12   : > { %s4135_s27 = scalar_select %p255_p7, %s4006_s17, %s257_s23  }
  0x13   : > { %p372_p10 = pnand %p3560_p6, %p371_p9 }
  0x14   : > { %p431_p11 = scmp.lt.s32.totalorder (!%p372_p10), %s4010_s18, 1  ;;  %s6004_s1 = sld [smem:[#allocation10_spill]] (!%p372_p10) }
  0x15   : > { %375 = sbr.rel (%p372_p10) target bundleno = 986 (0x3da), region = 56  ;;  %s6005_s0 = sld [smem:[#allocation9_spill]] (!%p372_p10) }
  0x16   : > { %s4500_s11 = sand.u32 (!%p372_p10), 1, %s4002_s16   ;;  %s2091_s14 = sld [smem:[#allocation2]] (!%p372_p10) }
  0x1a   : > { %v461_v0 = vlaneseq  ;;  %s4143_s28 = scalar_select %p431_p11, %s4010_s18, 1  ;;  %v4020_v5 = vmov 0.0   ;;  %v1140_v25 = vld [vmem:[%s5985_s4 + $0x18] sm:$0xff]  ;;  %v4021_v26 = vmov 0   ;;  %v1137_v28 = vld [vmem:[%s5985_s4] sm:$0xff]  ;;  %vm609_vm2 = vcmask 64512  }
  0x1b   : > { %v4180_v40 = vld [vmem:[%s5984_s3] sm:$0xff]  ;;  %v1138_v41 = vld [vmem:[%s5985_s4 + $0x8] sm:$0xff]  ;;  %v4211_v60 = vld [vmem:[%s5984_s3 + $0x10] sm:$0xff]  ;;  %vm1431_vm7 = vcmask 261120  }
  0x1c   : > { %v4138_v1 = vshrl.u32 %v461_v0, 7  ;;  %v4140_v2 = vand.u32 127, %v461_v0  ;;  %s3706_s29 = sshll.u32 %s4143_s28, 4  ;;  %s3563_s8 = sshll.u32 %s4143_s28, 3  ;;  %v4195_v50 = vld [vmem:[%s5984_s3 + $0x8] sm:$0xff] }
  0x1d   : > { %s443_s12 = scalar_lea.vmem %s6004_s1, %s3706_s29  ;;  %s434_s25 = scalar_lea.vmem %s6005_s0, %s3563_s8 }
  0x1e   : > { %3775 = vset.pattern.permute.xlu1 %v4138_v1  ;;  %v2416_v3 = vadd.s32 8, %v4138_v1  ;;  %3774 = vset.pattern.permute.xlu0 %v4138_v1  ;;  %v458_v4 = vld [vmem:[%s443_s12] sm:$0xff]  ;;  %v459_v13 = vld [vmem:[%s443_s12 + $0x8] sm:$0xff]  ;;  %s5999_s12 = sshll.u32 %s4500_s11, 4  ;;  %s4701_s23 = scalar_lea.vmem %s5983_s2, %s3706_s29 }
  0x1f   : > { %3776 = vset.pattern.permute.xlu2 %v4138_v1  ;;  %v474_v7 = vperm.slane %v458_v4, 2  ;;  %v460_v8 = vperm.slane %v458_v4, 0  ;;  %v502_v9 = vperm.slane %v458_v4, 6  ;;  %v481_v10 = vperm.slane %v458_v4, 3  ;;  %v4171_v29 = vld [vmem:[%s434_s25] sm:$0xff]  ;;  %s4517_s13 = scalar_lea.vmem [#allocation5], %s5999_s12 }
  0x20   : > { %vm2423_vm1 = vcmp.eq.s32.totalorder %v2416_v3, %v4140_v2  ;;  %v467_v11 = vperm.slane %v458_v4, 1  ;;  %v509_v12 = vperm.slane %v458_v4, 7  ;;  %v488_v14 = vperm.slane %v458_v4, 4  ;;  %s3408_s28 = sshll.u32 %s4517_s13, 4  ;;  %s5998_s29 = sshll.u32 %s4010_s18, 4  ;;  %s3409_s28 = int_to_ptr.vmem [resolvable:$true] %s3408_s28 }
  0x21   : > { %v4159_v6 = vsel %vm2423_vm1, 1.0, %v4020_v5  ;;  %v495_v15 = vperm.slane %v458_v4, 5  ;;  %v530_v16 = vperm.slane %v459_v13, 2  ;;  %v537_v17 = vperm.slane %v459_v13, 3 }
  0x22   : > { %v516_v18 = vperm.slane %v459_v13, 0  ;;  %v523_v19 = vperm.slane %v459_v13, 1  ;;  %v558_v20 = vperm.slane %v459_v13, 6  ;;  %v565_v21 = vperm.slane %v459_v13, 7 }
  0x23   : > { %v544_v22 = vperm.slane %v459_v13, 4  ;;  %v551_v23 = vperm.slane %v459_v13, 5 }
  0x26   : > { %479 = vperm.xlu0 %3774, %v474_v7   ;;  %465 = vperm.xlu1 %3775, %v460_v8   ;;  %v4226_v8 = vld [vmem:[%s5984_s3 + $0x18] sm:$0xff] }
  0x27   : > { %507 = vperm.xlu2 %3776, %v502_v9   ;;  %v1139_v9 = vld [vmem:[%s5985_s4 + $0x10] sm:$0xff] }
  0x2e   : > { %486 = vperm.xlu0 %3774, %v481_v10   ;;  %472 = vperm.xlu1 %3775, %v467_v11   ;;  %v4242_v10 = vld [vmem:[%s5984_s3 + $0x20] sm:$0xff] }
  0x2f   : > { %514 = vperm.xlu2 %3776, %v509_v12  }
  0x36   : > { %493 = vperm.xlu0 %3774, %v488_v14   ;;  %500 = vperm.xlu1 %3775, %v495_v15  }
  0x37   : > { %535 = vperm.xlu2 %3776, %v530_v16  }
  0x3e   : > { %542 = vperm.xlu0 %3774, %v537_v17   ;;  %521 = vperm.xlu1 %3775, %v516_v18  }
  0x3f   : > { %528 = vperm.xlu2 %3776, %v523_v19  }
  0x46   : > { %563 = vperm.xlu0 %3774, %v558_v20   ;;  %570 = vperm.xlu1 %3775, %v565_v21  }
  0x47   : > { %549 = vperm.xlu2 %3776, %v544_v22  }
  0x4e   : > { %556 = vperm.xlu0 %3774, %v551_v23   ;;  %3777 = vset.pattern.permute.xlu1 %v4021_v26  ;;  %v1420_v23 = vld [vmem:[%s5987_s6 + $0x8] sm:$0xff] }
  0x4f   : > { %1158 = vperm.xlu1 %3777, %v1140_v25   ;;  %3778 = vset.pattern.permute.xlu2 %v4021_v26  ;;  %v1419_v25 = vld [vmem:[%s5987_s6] sm:$0xff] }
  0x50   : > { %1153 = vperm.xlu2 %3778, %v1139_v9  }
  0x56   : > { %3779 = vset.pattern.permute.xlu0 %v4021_v26  ;;  %v1902_v26 = vld [vmem:[%s5988_s7] sm:$0xff] }
  0x57   : > { %1143 = vperm.xlu1 %3777, %v1137_v28   ;;  %1148 = vperm.xlu0 %3779, %v1138_v41  }
  0x58   : > { %1423 = vperm.xlu2 %3778, %v1419_v25  }
  0x5f   : > { %1428 = vperm.xlu1 %3777, %v1420_v23  }
  0x60   : > { %1906 = vperm.xlu2 %3778, %v1902_v26  }
  0x81   : > { %v508_v24 = vpop.permute.xlu2 %507 }
  0x82   : > { %v578_v30 = vsub.f32 %v508_v24, %v4171_v29  ;;  %v1903_v24 = vld [vmem:[%s5988_s7 + $0x8] sm:$0xff] }
  0x83   : > { %1911 = vperm.xlu0 %3779, %v1903_v24  }
  0x84   : > { %v594_v37 = vmul.f32 %v578_v30, %v578_v30 }
  0x89   : > { %v515_v27 = vpop.permute.xlu2 %514 }
  0x8a   : > { %v579_v43 = vsub.f32 %v515_v27, %v4171_v29 }
  0x8c   : > { %v595_v51 = vmul.f32 %v579_v43, %v579_v43 }
  0x91   : > { %v536_v31 = vpop.permute.xlu2 %535 }
  0x92   : > { %v582_v32 = vsub.f32 %v536_v31, %v4171_v29 }
  0x94   : > { %v598_v42 = vmul.f32 %v582_v32, %v582_v32 }
  0x98   : > { %v480_v33 = vpop.permute.xlu0 %479  ;;  %v466_v34 = vpop.permute.xlu1 %465 }
  0x99   : > { %v572_v35 = vsub.f32 %v466_v34, %v4171_v29  ;;  %v574_v36 = vsub.f32 %v480_v33, %v4171_v29  ;;  %v529_v52 = vpop.permute.xlu2 %528 }
  0x9a   : > { %v581_v53 = vsub.f32 %v529_v52, %v4171_v29 }
  0x9b   : > { %v588_v38 = vmul.f32 %v572_v35, %v572_v35  ;;  %v590_v39 = vmul.f32 %v574_v36, %v574_v36 }
  0x9c   : > { %v597_v61 = vmul.f32 %v581_v53, %v581_v53 }
  0x9d   : > { %640 = vmatpush.msra.mxu0 %v588_v38  ;;  %704 = vmatpush.msra.mxu2 %v590_v39 }
  0x9e   : > { %3568 = vmatmul.msk.f32.vlgmr.msra.gmra.mxu0 %vm609_vm2, %v4180_v40  ;;  %3578 = vmatmul.msk.f32.vlgmr.msra.gmra.mxu2 %vm609_vm2, %v4180_v40 }
  0x9f   : > { %832 = vmatpush.msrb.mxu2 %v594_v37 }
  0xa0   : > { %v487_v44 = vpop.permute.xlu0 %486  ;;  %v473_v45 = vpop.permute.xlu1 %472 }
  0xa1   : > { %960 = vmatpush.msra.mxu2 %v598_v42  ;;  %v573_v46 = vsub.f32 %v473_v45, %v4171_v29  ;;  %v575_v47 = vsub.f32 %v487_v44, %v4171_v29  ;;  %v550_v11 = vpop.permute.xlu2 %549 }
  0xa2   : > { %v584_v13 = vsub.f32 %v550_v11, %v4171_v29 }
  0xa3   : > { %v589_v48 = vmul.f32 %v573_v46, %v573_v46  ;;  %v591_v49 = vmul.f32 %v575_v47, %v575_v47 }
  0xa4   : > { %v600_v15 = vmul.f32 %v584_v13, %v584_v13 }
  0xa5   : > { %672 = vmatpush.msra.mxu1 %v589_v48  ;;  %736 = vmatpush.msra.mxu3 %v591_v49 }
  0xa6   : > { %3569 = vmatmul.msk.f32.gmra.mxu0 %vm609_vm2, %v4195_v50  ;;  %3573 = vmatmul.msk.f32.vlgmr.msra.gmra.mxu1 %vm609_vm2, %v4180_v40 }
  0xa7   : > { %3579 = vmatmul.msk.f32.gmra.mxu2 %vm609_vm2, %v4195_v50  ;;  %3583 = vmatmul.msk.f32.vlgmr.msra.gmra.mxu3 %vm609_vm2, %v4180_v40 }
  0xa8   : > { %864 = vmatpush.msrb.mxu3 %v595_v51  ;;  %v494_v54 = vpop.permute.xlu0 %493  ;;  %v501_v55 = vpop.permute.xlu1 %500 }
  0xa9   : > { %v576_v56 = vsub.f32 %v494_v54, %v4171_v29  ;;  %v577_v57 = vsub.f32 %v501_v55, %v4171_v29 }
  0xaa   : > { %v4376_v36 = vpop.permute.xlu2 %1153 }
  0xab   : > { %v592_v58 = vmul.f32 %v576_v56, %v576_v56  ;;  %v593_v59 = vmul.f32 %v577_v57, %v577_v57 }
  0xad   : > { %768 = vmatpush.msrb.mxu0 %v592_v58  ;;  %800 = vmatpush.msrb.mxu1 %v593_v59 }
  0xae   : > { %3570 = vmatmul.msk.f32.gmra.mxu0 %vm609_vm2, %v4211_v60  ;;  %3574 = vmatmul.msk.f32.gmra.mxu1 %vm609_vm2, %v4195_v50 }
  0xaf   : > { %3580 = vmatmul.msk.f32.gmra.mxu2 %vm609_vm2, %v4211_v60  ;;  %3584 = vmatmul.msk.f32.gmra.mxu3 %vm609_vm2, %v4195_v50 }
  0xb0   : > { %928 = vmatpush.msra.mxu1 %v597_v61  ;;  %v543_v62 = vpop.permute.xlu0 %542  ;;  %v522_v63 = vpop.permute.xlu1 %521 }
  0xb1   : > { %v583_v0 = vsub.f32 %v543_v62, %v4171_v29  ;;  %v580_v3 = vsub.f32 %v522_v63, %v4171_v29 }
  0xb3   : > { %v599_v4 = vmul.f32 %v583_v0, %v583_v0  ;;  %v596_v7 = vmul.f32 %v580_v3, %v580_v3 }
  0xb5   : > { %896 = vmatpush.msra.mxu0 %v596_v7  ;;  %992 = vmatpush.msra.mxu3 %v599_v4  ;;  %v4416_v7 = vld [vmem:[%s5986_s5] sm:$0xff] }
  0xb6   : > { %3571 = vmatmul.msk.f32.gmra.mxu0 %vm609_vm2, %v4226_v8  ;;  %3575 = vmatmul.msk.f32.gmra.mxu1 %vm609_vm2, %v4211_v60 }
  0xb7   : > { %3581 = vmatmul.msk.f32.gmra.mxu2 %vm609_vm2, %v4226_v8  ;;  %3585 = vmatmul.msk.f32.gmra.mxu3 %vm609_vm2, %v4211_v60 }
  0xb8   : > { %v564_v12 = vpop.permute.xlu0 %563  ;;  %v571_v17 = vpop.permute.xlu1 %570 }
  0xb9   : > { %v586_v14 = vsub.f32 %v564_v12, %v4171_v29  ;;  %v587_v19 = vsub.f32 %v571_v17, %v4171_v29 }
  0xbb   : > { %v602_v16 = vmul.f32 %v586_v14, %v586_v14  ;;  %v603_v21 = vmul.f32 %v587_v19, %v587_v19 }
  0xbe   : > { %3572 = vmatmul.msk.f32.gmra.mxu0 %vm609_vm2, %v4242_v10  ;;  %3576 = vmatmul.msk.f32.gmra.mxu1 %vm609_vm2, %v4226_v8 }
  0xbf   : > { %3582 = vmatmul.msk.f32.gmra.mxu2 %vm609_vm2, %v4242_v10  ;;  %3586 = vmatmul.msk.f32.gmra.mxu3 %vm609_vm2, %v4226_v8 }
  0xc0   : > { %v557_v18 = vpop.permute.xlu0 %556 }
  0xc1   : > { %v585_v20 = vsub.f32 %v557_v18, %v4171_v29  ;;  %v4368_v31 = vpop.permute.xlu1 %1158 }
  0xc3   : > { %v601_v22 = vmul.f32 %v585_v20, %v585_v20 }
  0xc6   : > { %3577 = vmatmul.msk.f32.gmra.mxu1 %vm609_vm2, %v4242_v10  ;;  %3588 = vmatmul.msk.f32.vlgmr.msrb.gmra.mxu0 %vm609_vm2, %v4180_v40 }
  0xc7   : > { %3587 = vmatmul.msk.f32.gmra.mxu3 %vm609_vm2, %v4242_v10  ;;  %3598 = vmatmul.msk.f32.vlgmr.msrb.gmra.mxu2 %vm609_vm2, %v4180_v40 }
  0xc8   : > { %1024 = vmatpush.msrb.mxu0 %v600_v15  ;;  %1088 = vmatpush.msrb.mxu2 %v602_v16 }
  0xc9   : > { %v4387_v38 = vpop.permute.xlu1 %1143  ;;  %v4389_v39 = vpop.permute.xlu0 %1148 }
  0xce   : > { %3589 = vmatmul.msk.f32.gmra.mxu0 %vm609_vm2, %v4195_v50  ;;  %3593 = vmatmul.msk.f32.vlgmr.msrb.gmra.mxu1 %vm609_vm2, %v4180_v40 }
  0xcf   : > { %3599 = vmatmul.msk.f32.gmra.mxu2 %vm609_vm2, %v4195_v50  ;;  %3603 = vmatmul.msk.f32.vlgmr.msrb.gmra.mxu3 %vm609_vm2, %v4180_v40 }
  0xd0   : > { %1056 = vmatpush.msrb.mxu1 %v601_v22  ;;  %1120 = vmatpush.msrb.mxu3 %v603_v21 }
  0xd6   : > { %3590 = vmatmul.msk.f32.gmra.mxu0 %vm609_vm2, %v4211_v60  ;;  %3594 = vmatmul.msk.f32.gmra.mxu1 %vm609_vm2, %v4195_v50 }
  0xd7   : > { %3600 = vmatmul.msk.f32.gmra.mxu2 %vm609_vm2, %v4211_v60  ;;  %3604 = vmatmul.msk.f32.gmra.mxu3 %vm609_vm2, %v4195_v50 }
  0xde   : > { %3591 = vmatmul.msk.f32.gmra.mxu0 %vm609_vm2, %v4226_v8  ;;  %3595 = vmatmul.msk.f32.gmra.mxu1 %vm609_vm2, %v4211_v60 }
  0xdf   : > { %3601 = vmatmul.msk.f32.gmra.mxu2 %vm609_vm2, %v4226_v8  ;;  %3605 = vmatmul.msk.f32.gmra.mxu3 %vm609_vm2, %v4211_v60 }
  0xe6   : > { %3592 = vmatmul.msk.f32.gmra.mxu0 %vm609_vm2, %v4242_v10  ;;  %3596 = vmatmul.msk.f32.gmra.mxu1 %vm609_vm2, %v4226_v8 }
  0xe7   : > { %3602 = vmatmul.msk.f32.gmra.mxu2 %vm609_vm2, %v4242_v10  ;;  %3606 = vmatmul.msk.f32.gmra.mxu3 %vm609_vm2, %v4226_v8 }
  0xee   : > { %3597 = vmatmul.msk.f32.gmra.mxu1 %vm609_vm2, %v4242_v10  ;;  %3608 = vmatmul.msk.f32.vlgmr.msra.gmra.mxu0 %vm609_vm2, %v4180_v40 }
  0xef   : > { %3607 = vmatmul.msk.f32.gmra.mxu3 %vm609_vm2, %v4242_v10  ;;  %3618 = vmatmul.msk.f32.vlgmr.msra.gmra.mxu2 %vm609_vm2, %v4180_v40 }
  0xf6   : > { %3609 = vmatmul.msk.f32.gmra.mxu0 %vm609_vm2, %v4195_v50  ;;  %3613 = vmatmul.msk.f32.vlgmr.msra.gmra.mxu1 %vm609_vm2, %v4180_v40 }
  0xf7   : > { %3619 = vmatmul.msk.f32.gmra.mxu2 %vm609_vm2, %v4195_v50  ;;  %3623 = vmatmul.msk.f32.vlgmr.msra.gmra.mxu3 %vm609_vm2, %v4180_v40 }
  0xfe   : > { %3610 = vmatmul.msk.f32.gmra.mxu0 %vm609_vm2, %v4211_v60  ;;  %3614 = vmatmul.msk.f32.gmra.mxu1 %vm609_vm2, %v4195_v50 }
  0xff   : > { %3620 = vmatmul.msk.f32.gmra.mxu2 %vm609_vm2, %v4211_v60  ;;  %3624 = vmatmul.msk.f32.gmra.mxu3 %vm609_vm2, %v4195_v50 }
 0x106   : > { %3611 = vmatmul.msk.f32.gmra.mxu0 %vm609_vm2, %v4226_v8  ;;  %3615 = vmatmul.msk.f32.gmra.mxu1 %vm609_vm2, %v4211_v60 }
 0x107   : > { %3621 = vmatmul.msk.f32.gmra.mxu2 %vm609_vm2, %v4226_v8  ;;  %3625 = vmatmul.msk.f32.gmra.mxu3 %vm609_vm2, %v4211_v60 }
 0x10e   : > { %3612 = vmatmul.msk.f32.gmra.mxu0 %vm609_vm2, %v4242_v10  ;;  %3616 = vmatmul.msk.f32.gmra.mxu1 %vm609_vm2, %v4226_v8 }
 0x10f   : > { %3622 = vmatmul.msk.f32.gmra.mxu2 %vm609_vm2, %v4242_v10  ;;  %3626 = vmatmul.msk.f32.gmra.mxu3 %vm609_vm2, %v4226_v8 }
 0x116   : > { %3617 = vmatmul.msk.f32.gmra.mxu1 %vm609_vm2, %v4242_v10  ;;  %3628 = vmatmul.msk.f32.vlgmr.msrb.gmra.mxu0 %vm609_vm2, %v4180_v40 }
 0x117   : > { %3627 = vmatmul.msk.f32.gmra.mxu3 %vm609_vm2, %v4242_v10  ;;  %3638 = vmatmul.msk.f32.vlgmr.msrb.gmra.mxu2 %vm609_vm2, %v4180_v40 }
 0x11b   : > { %v642_v27 = vpop.f32.mrf.mxu0 }
 0x11c   : > { %v1161_v44 = vadd.f32 %v4387_v38, %v642_v27 }
 0x11e   : > { %3629 = vmatmul.msk.f32.gmra.mxu0 %vm609_vm2, %v4195_v50  ;;  %3633 = vmatmul.msk.f32.vlgmr.msrb.gmra.mxu1 %vm609_vm2, %v4180_v40  ;;  %v1289_v49 = vmul.f32 0.01, %v1161_v44  ;;  %vm1225_vm5 = vcmp.ge.f32.partialorder %v1161_v44, 0.0 }
 0x11f   : > { %3639 = vmatmul.msk.f32.gmra.mxu2 %vm609_vm2, %v4195_v50  ;;  %3643 = vmatmul.msk.f32.vlgmr.msrb.gmra.mxu3 %vm609_vm2, %v4180_v40 }
 0x121   : > { %v706_v28 = vpop.f32.mrf.mxu2 }
 0x122   : > { %v1169_v3 = vadd.f32 %v4387_v38, %v706_v28 }
 0x123   : > { %v645_v29 = vpop.f32.mrf.mxu0  ;;  %v674_v30 = vpop.f32.mrf.mxu1 }
 0x124   : > { %v1162_v47 = vadd.f32 %v4389_v39, %v645_v29  ;;  %v1165_v9 = vadd.f32 %v4387_v38, %v674_v30  ;;  %v1297_v17 = vmul.f32 0.01, %v1169_v3  ;;  %vm1233_vm14 = vcmp.ge.f32.partialorder %v1169_v3, 0.0 }
 0x126   : > { %3630 = vmatmul.msk.f32.gmra.mxu0 %vm609_vm2, %v4211_v60  ;;  %3634 = vmatmul.msk.f32.gmra.mxu1 %vm609_vm2, %v4195_v50  ;;  %v1290_v52 = vmul.f32 0.01, %v1162_v47  ;;  %vm1226_vm6 = vcmp.ge.f32.partialorder %v1162_v47, 0.0  ;;  %v1293_v22 = vmul.f32 0.01, %v1165_v9  ;;  %vm1229_vm15 = vcmp.ge.f32.partialorder %v1165_v9, 0.0 }
 0x127   : > { %3640 = vmatmul.msk.f32.gmra.mxu2 %vm609_vm2, %v4211_v60  ;;  %3644 = vmatmul.msk.f32.gmra.mxu3 %vm609_vm2, %v4195_v50  ;;  %v1361_v29 = vsel %vm1233_vm14, %v1169_v3, %v1297_v17  ;;  %vm5996_vm14 = vcmask 1044484  }
 0x128   : > { %v1354_v63 = vsel %vm1226_vm6, %v1162_v47, %v1290_v52 }
 0x12a   : > { %v709_v32 = vpop.f32.mrf.mxu2  ;;  %v4374_v33 = vpop.f32.mrf.mxu3 }
 0x12b   : > { %v648_v34 = vpop.f32.mrf.mxu0  ;;  %v677_v35 = vpop.f32.mrf.mxu1  ;;  %v1170_v61 = vadd.f32 %v4389_v39, %v709_v32  ;;  %v1173_v30 = vadd.f32 %v4387_v38, %v4374_v33 }
 0x12c   : > { %v1163_v37 = vadd.f32 %v4376_v36, %v648_v34  ;;  %v1166_v0 = vadd.f32 %v4389_v39, %v677_v35  ;;  %v4440_v34 = vld [vmem:[%s5986_s5 + $0x8] sm:$0xff] }
 0x12d   : > { %v1298_v14 = vmul.f32 0.01, %v1170_v61  ;;  %vm1234_vm12 = vcmp.ge.f32.partialorder %v1170_v61, 0.0 }
 0x12e   : > { %3631 = vmatmul.msk.f32.gmra.mxu0 %vm609_vm2, %v4226_v8  ;;  %3635 = vmatmul.msk.f32.gmra.mxu1 %vm609_vm2, %v4211_v60  ;;  %v1291_v46 = vmul.f32 0.01, %v1163_v37  ;;  %vm1227_vm3 = vcmp.ge.f32.partialorder %v1163_v37, 0.0  ;;  %v1294_v16 = vmul.f32 0.01, %v1166_v0  ;;  %vm1230_vm13 = vcmp.ge.f32.partialorder %v1166_v0, 0.0 }
 0x12f   : > { %3641 = vmatmul.msk.f32.gmra.mxu2 %vm609_vm2, %v4226_v8  ;;  %3645 = vmatmul.msk.f32.gmra.mxu3 %vm609_vm2, %v4211_v60  ;;  %v1353_v60 = vsel %vm1225_vm5, %v1161_v44, %v1289_v49  ;;  %v1362_v27 = vsel %vm1234_vm12, %v1170_v61, %v1298_v14  ;;  %vm5997_vm12 = vcmask 1043459  }
 0x130   : > { %v1355_v51 = vsel %vm1227_vm3, %v1163_v37, %v1291_v46  ;;  %v1358_v28 = vsel %vm1230_vm13, %v1166_v0, %v1294_v16  ;;  %v1357_v37 = vsel %vm1229_vm15, %v1165_v9, %v1293_v22 }
 0x132   : > { %v712_v40 = vpop.f32.mrf.mxu2  ;;  %v4391_v41 = vpop.f32.mrf.mxu3 }
 0x133   : > { %v651_v42 = vpop.f32.mrf.mxu0  ;;  %v680_v43 = vpop.f32.mrf.mxu1  ;;  %v1171_v53 = vadd.f32 %v4376_v36, %v712_v40  ;;  %v1174_v23 = vadd.f32 %v4389_v39, %v4391_v41 }
 0x134   : > { %v1164_v45 = vadd.f32 %v4368_v31, %v651_v42  ;;  %v1167_v56 = vadd.f32 %v4376_v36, %v680_v43  ;;  %v1301_v42 = vmul.f32 0.01, %v1173_v30 }
 0x135   : > { %vm1235_vm10 = vcmp.ge.f32.partialorder %v1171_v53, 0.0  ;;  %v1302_v41 = vmul.f32 0.01, %v1174_v23  ;;  %vm1238_vm3 = vcmp.ge.f32.partialorder %v1174_v23, 0.0 }
 0x136   : > { %v1292_v48 = vmul.f32 0.01, %v1164_v45  ;;  %3632 = vmatmul.msk.f32.gmra.mxu0 %vm609_vm2, %v4242_v10  ;;  %3636 = vmatmul.msk.f32.gmra.mxu1 %vm609_vm2, %v4226_v8  ;;  %vm1228_vm4 = vcmp.ge.f32.partialorder %v1164_v45, 0.0  ;;  %v1295_v12 = vmul.f32 0.01, %v1167_v56  ;;  %vm1231_vm11 = vcmp.ge.f32.partialorder %v1167_v56, 0.0 }
 0x137   : > { %3646 = vmatmul.msk.f32.gmra.mxu3 %vm609_vm2, %v4226_v8  ;;  %3642 = vmatmul.msk.f32.gmra.mxu2 %vm609_vm2, %v4242_v10  ;;  %v1299_v8 = vmul.f32 0.01, %v1171_v53  ;;  %v1366_v47 = vsel %vm1238_vm3, %v1174_v23, %v1302_v41 }
 0x138   : > { %v1356_v50 = vsel %vm1228_vm4, %v1164_v45, %v1292_v48  ;;  %v1359_v21 = vsel %vm1231_vm11, %v1167_v56, %v1295_v12  ;;  %vm1237_vm4 = vcmp.ge.f32.partialorder %v1173_v30, 0.0  ;;  %vm2524_vm11 = vcmask 1042434  }
 0x139   : > { %1450 = vmatpush.msra.mxu0 %v1356_v50  ;;  %v1363_v19 = vsel %vm1235_vm10, %v1171_v53, %v1299_v8  ;;  %v1365_v48 = vsel %vm1237_vm4, %v1173_v30, %v1301_v42  ;;  %vm2521_vm10 = vcmask 1041409  }
 0x13a   : > { %v715_v54 = vpop.f32.mrf.mxu2  ;;  %v744_v55 = vpop.f32.mrf.mxu3 }
 0x13b   : > { %v1172_v57 = vadd.f32 %v4368_v31, %v715_v54  ;;  %v4407_v58 = vpop.f32.mrf.mxu0  ;;  %v683_v59 = vpop.f32.mrf.mxu1  ;;  %1451 = vmatpush.msra.mxu0 %v1355_v51  ;;  %v1175_v18 = vadd.f32 %v4376_v36, %v744_v55 }
 0x13c   : > { %v1168_v62 = vadd.f32 %v4368_v31, %v683_v59 }
 0x13d   : > { %v1300_v4 = vmul.f32 0.01, %v1172_v57  ;;  %1452 = vmatpush.msra.mxu0 %v1354_v63  ;;  %vm1236_vm8 = vcmp.ge.f32.partialorder %v1172_v57, 0.0  ;;  %v1303_v35 = vmul.f32 0.01, %v1175_v18 }
 0x13e   : > { %v1296_v11 = vmul.f32 0.01, %v1168_v62  ;;  %3637 = vmatmul.msk.f32.gmra.mxu1 %vm609_vm2, %v4242_v10  ;;  %vm1232_vm9 = vcmp.ge.f32.partialorder %v1168_v62, 0.0 }
 0x13f   : > { %3647 = vmatmul.msk.f32.gmra.mxu3 %vm609_vm2, %v4242_v10  ;;  %1453 = vmatpush.msra.mxu0 %v1353_v60  ;;  %v1364_v13 = vsel %vm1236_vm8, %v1172_v57, %v1300_v4  ;;  %vm1239_vm2 = vcmp.ge.f32.partialorder %v1175_v18, 0.0 }
 0x140   : > { %1496 = vmatpush.msra.mxu2 %v1364_v13  ;;  %3648 = vmatmul.msk.f32.vlgmr.msra.gmra.mxu0 %vm1431_vm7, %v4416_v7  ;;  %v1360_v15 = vsel %vm1232_vm9, %v1168_v62, %v1296_v11  ;;  %v1367_v33 = vsel %vm1239_vm2, %v1175_v18, %v1303_v35 }
 0x141   : > { %1473 = vmatpush.msra.mxu1 %v1360_v15 }
 0x142   : > { %v4426_v20 = vpop.f32.mrf.mxu2  ;;  %v747_v10 = vpop.f32.mrf.mxu3  ;;  %1497 = vmatpush.msra.mxu2 %v1363_v19 }
 0x143   : > { %v1176_v24 = vadd.f32 %v4368_v31, %v747_v10  ;;  %v4432_v25 = vpop.f32.mrf.mxu1  ;;  %v770_v26 = vpop.f32.mrf.mxu0  ;;  %1474 = vmatpush.msra.mxu1 %v1359_v21  ;;  %v3339_v11 = vrot.slane %v4426_v20, 6 }
 0x144   : > { %1498 = vmatpush.msra.mxu2 %v1362_v27  ;;  %v1177_v56 = vadd.f32 %v4387_v38, %v770_v26  ;;  %v3337_v15 = vrot.slane %v4432_v25, 7 }
 0x145   : > { %v1304_v32 = vmul.f32 0.01, %v1176_v24  ;;  %1475 = vmatpush.msra.mxu1 %v1358_v28  ;;  %vm1240_vm1 = vcmp.ge.f32.partialorder %v1176_v24, 0.0 }
 0x146   : > { %1499 = vmatpush.msra.mxu2 %v1361_v29  ;;  %v1305_v0 = vmul.f32 0.01, %v1177_v56  ;;  %vm1241_vm8 = vcmp.ge.f32.partialorder %v1177_v56, 0.0  ;;  %v3338_v29 = vsel %vm2521_vm10, %v3337_v15, %v4407_v58 }
 0x147   : > { %3652 = vmatmul.msk.f32.vlgmr.msra.gmra.mxu2 %vm1431_vm7, %v4416_v7  ;;  %1476 = vmatpush.msra.mxu1 %v1357_v37  ;;  %v1368_v40 = vsel %vm1240_vm1, %v1176_v24, %v1304_v32  ;;  %v3340_v58 = vsel %vm2524_vm11, %v3339_v11, %v3338_v29 }
 0x148   : > { %1519 = vmatpush.msra.mxu3 %v1368_v40  ;;  %3649 = vmatmul.msk.f32.gmra.mxu0 %vm1431_vm7, %v4440_v34  ;;  %v1369_v10 = vsel %vm1241_vm8, %v1177_v56, %v1305_v0 }
 0x149   : > { %3650 = vmatmul.msk.f32.vlgmr.msra.gmra.mxu1 %vm1431_vm7, %v4416_v7 }
 0x14a   : > { %v4448_v43 = vpop.f32.mrf.mxu3  ;;  %v834_v44 = vpop.f32.mrf.mxu2  ;;  %1520 = vmatpush.msra.mxu3 %v1367_v33 }
 0x14b   : > { %v773_v45 = vpop.f32.mrf.mxu0  ;;  %v802_v46 = vpop.f32.mrf.mxu1  ;;  %v1185_v20 = vadd.f32 %v4387_v38, %v834_v44  ;;  %v3341_v42 = vrot.slane %v4448_v43, 5 }
 0x14c   : > { %1521 = vmatpush.msra.mxu3 %v1366_v47  ;;  %v1178_v60 = vadd.f32 %v4389_v39, %v773_v45  ;;  %v1181_v24 = vadd.f32 %v4387_v38, %v802_v46 }
 0x14d   : > { %v1313_v35 = vmul.f32 0.01, %v1185_v20 }
 0x14e   : > { %1522 = vmatpush.msra.mxu3 %v1365_v48  ;;  %v1306_v3 = vmul.f32 0.01, %v1178_v60  ;;  %vm1242_vm9 = vcmp.ge.f32.partialorder %v1178_v60, 0.0  ;;  %v1309_v44 = vmul.f32 0.01, %v1181_v24 }
 0x14f   : > { %3653 = vmatmul.msk.f32.gmra.mxu2 %vm1431_vm7, %v4440_v34  ;;  %3654 = vmatmul.msk.f32.vlgmr.msra.gmra.mxu3 %vm1431_vm7, %v4416_v7 }
 0x150   : > { %v1370_v23 = vsel %vm1242_vm9, %v1178_v60, %v1306_v3  ;;  %vm5995_vm9 = vcmask 1045509  }
 0x151   : > { %3651 = vmatmul.msk.f32.gmra.mxu1 %vm1431_vm7, %v4440_v34 }
 0x152   : > { %v837_v49 = vpop.f32.mrf.mxu2  ;;  %v4456_v50 = vpop.f32.mrf.mxu3 }
 0x153   : > { %v776_v51 = vpop.f32.mrf.mxu0  ;;  %v805_v52 = vpop.f32.mrf.mxu1  ;;  %v1186_v16 = vadd.f32 %v4389_v39, %v837_v49  ;;  %v1189_v43 = vadd.f32 %v4387_v38, %v4456_v50  ;;  %v3342_v50 = vsel %vm5997_vm12, %v3341_v42, %v3340_v58 }
 0x154   : > { %v1179_v53 = vadd.f32 %v4376_v36, %v776_v51  ;;  %v1182_v21 = vadd.f32 %v4389_v39, %v805_v52 }
 0x155   : > { %v1314_v30 = vmul.f32 0.01, %v1186_v16  ;;  %vm1250_vm3 = vcmp.ge.f32.partialorder %v1186_v16, 0.0 }
 0x156   : > { %v1307_v61 = vmul.f32 0.01, %v1179_v53  ;;  %vm1243_vm5 = vcmp.ge.f32.partialorder %v1179_v53, 0.0  ;;  %v1310_v37 = vmul.f32 0.01, %v1182_v21  ;;  %vm1246_vm4 = vcmp.ge.f32.partialorder %v1182_v21, 0.0 }
 0x157   : > { %3655 = vmatmul.msk.f32.gmra.mxu3 %vm1431_vm7, %v4440_v34 }
 0x158   : > { %v1371_v8 = vsel %vm1243_vm5, %v1179_v53, %v1307_v61  ;;  %vm1249_vm5 = vcmp.ge.f32.partialorder %v1185_v20, 0.0  ;;  %v1378_v53 = vsel %vm1250_vm3, %v1186_v16, %v1314_v30  ;;  %v1374_v56 = vsel %vm1246_vm4, %v1182_v21, %v1310_v37 }
 0x159   : > { %vm1253_vm3 = vcmp.ge.f32.partialorder %v1189_v43, 0.0  ;;  %vm5992_vm4 = vcmask 130048  }
 0x15a   : > { %v840_v54 = vpop.f32.mrf.mxu2  ;;  %v4461_v55 = vpop.f32.mrf.mxu3 }
 0x15b   : > { %v779_v57 = vpop.f32.mrf.mxu0  ;;  %v808_v59 = vpop.f32.mrf.mxu1  ;;  %v1187_v9 = vadd.f32 %v4376_v36, %v840_v54  ;;  %v1190_v48 = vadd.f32 %v4389_v39, %v4461_v55 }
 0x15c   : > { %v1180_v62 = vadd.f32 %v4368_v31, %v779_v57  ;;  %v1183_v12 = vadd.f32 %v4376_v36, %v808_v59  ;;  %v1377_v57 = vsel %vm1249_vm5, %v1185_v20, %v1313_v35 }
 0x15d   : > { %v1315_v25 = vmul.f32 0.01, %v1187_v9  ;;  %vm1251_vm1 = vcmp.ge.f32.partialorder %v1187_v9, 0.0 }
 0x15e   : > { %vm1244_vm6 = vcmp.ge.f32.partialorder %v1180_v62, 0.0  ;;  %v1308_v63 = vmul.f32 0.01, %v1180_v62  ;;  %v1311_v27 = vmul.f32 0.01, %v1183_v12  ;;  %vm1247_vm2 = vcmp.ge.f32.partialorder %v1183_v12, 0.0 }
 0x15f   : > { %v1379_v33 = vsel %vm1251_vm1, %v1187_v9, %v1315_v25  ;;  %vm5994_vm1 = vcmask 1046534  }
 0x160   : > { %v1372_v4 = vsel %vm1244_vm6, %v1180_v62, %v1308_v63  ;;  %v1375_v47 = vsel %vm1247_vm2, %v1183_v12, %v1311_v27  ;;  %vm1245_vm6 = vcmp.ge.f32.partialorder %v1181_v24, 0.0  ;;  %v1318_v62 = vmul.f32 0.01, %v1190_v48 }
 0x161   : > { %1542 = vmatpush.msrb.mxu0 %v1372_v4  ;;  %v1373_v61 = vsel %vm1245_vm6, %v1181_v24, %v1309_v44  ;;  %v1317_v4 = vmul.f32 0.01, %v1189_v43  ;;  %vm5993_vm2 = vcmask 1047559  }
 0x162   : > { %v843_v13 = vpop.f32.mrf.mxu2  ;;  %v872_v14 = vpop.f32.mrf.mxu3 }
 0x163   : > { %v1188_v17 = vadd.f32 %v4368_v31, %v843_v13  ;;  %v4472_v18 = vpop.f32.mrf.mxu0  ;;  %v811_v19 = vpop.f32.mrf.mxu1  ;;  %1543 = vmatpush.msrb.mxu0 %v1371_v8  ;;  %v1191_v41 = vadd.f32 %v4376_v36, %v872_v14 }
 0x164   : > { %v1184_v22 = vadd.f32 %v4368_v31, %v811_v19  ;;  %v3343_v54 = vrot.slane %v4472_v18, 4  ;;  %v1381_v19 = vsel %vm1253_vm3, %v1189_v43, %v1317_v4 }
 0x165   : > { %vm1252_vm13 = vcmp.ge.f32.partialorder %v1188_v17, 0.0  ;;  %v1316_v26 = vmul.f32 0.01, %v1188_v17  ;;  %1544 = vmatpush.msrb.mxu0 %v1370_v23  ;;  %v1319_v55 = vmul.f32 0.01, %v1191_v41 }
 0x166   : > { %vm1248_vm15 = vcmp.ge.f32.partialorder %v1184_v22, 0.0  ;;  %v1312_v28 = vmul.f32 0.01, %v1184_v22  ;;  %v3344_v0 = vsel %vm5996_vm14, %v3343_v54, %v3342_v50 }
 0x167   : > { %1545 = vmatpush.msrb.mxu0 %v1369_v10  ;;  %v1380_v32 = vsel %vm1252_vm13, %v1188_v17, %v1316_v26  ;;  %vm1255_vm13 = vcmp.ge.f32.partialorder %v1191_v41, 0.0 }
 0x168   : > { %1588 = vmatpush.msrb.mxu2 %v1380_v32  ;;  %3656 = vmatmul.msk.f32.vlgmr.msrb.gmra.mxu0 %vm1431_vm7, %v4416_v7  ;;  %v1376_v40 = vsel %vm1248_vm15, %v1184_v22, %v1312_v28  ;;  %vm1254_vm15 = vcmp.ge.f32.partialorder %v1190_v48, 0.0  ;;  %v1383_v9 = vsel %vm1255_vm13, %v1191_v41, %v1319_v55 }
 0x169   : > { %1565 = vmatpush.msrb.mxu1 %v1376_v40  ;;  %v1382_v16 = vsel %vm1254_vm15, %v1190_v48, %v1318_v62 }
 0x16a   : > { %v846_v45 = vpop.f32.mrf.mxu2  ;;  %v875_v46 = vpop.f32.mrf.mxu3  ;;  %1589 = vmatpush.msrb.mxu2 %v1379_v33 }
 0x16b   : > { %v1192_v49 = vadd.f32 %v4368_v31, %v875_v46  ;;  %v814_v51 = vpop.f32.mrf.mxu1  ;;  %v4491_v52 = vpop.f32.mrf.mxu0  ;;  %1566 = vmatpush.msrb.mxu1 %v1375_v47  ;;  %v3347_v3 = vrot.slane %v846_v45, 2 }
 0x16c   : > { %1590 = vmatpush.msrb.mxu2 %v1378_v53  ;;  %v3345_v60 = vrot.slane %v814_v51, 3  ;;  %v1193_v26 = vadd.f32 %v4387_v38, %v4491_v52 }
 0x16d   : > { %vm1256_vm8 = vcmp.ge.f32.partialorder %v1192_v49, 0.0  ;;  %v1320_v59 = vmul.f32 0.01, %v1192_v49  ;;  %1567 = vmatpush.msrb.mxu1 %v1374_v56 }
 0x16e   : > { %1591 = vmatpush.msrb.mxu2 %v1377_v57  ;;  %v3346_v8 = vsel %vm5995_vm9, %v3345_v60, %v3344_v0  ;;  %v1321_v37 = vmul.f32 0.01, %v1193_v26 }
 0x16f   : > { %3660 = vmatmul.msk.f32.vlgmr.msrb.gmra.mxu2 %vm1431_vm7, %v4416_v7  ;;  %1568 = vmatpush.msrb.mxu1 %v1373_v61  ;;  %v1384_v63 = vsel %vm1256_vm8, %v1192_v49, %v1320_v59  ;;  %v3348_v17 = vsel %vm5994_vm1, %v3347_v3, %v3346_v8  ;;  %vm1257_vm8 = vcmp.ge.f32.partialorder %v1193_v26, 0.0 }
 0x170   : > { %1611 = vmatpush.msrb.mxu3 %v1384_v63  ;;  %3657 = vmatmul.msk.f32.gmra.mxu0 %vm1431_vm7, %v4440_v34  ;;  %v1385_v51 = vsel %vm1257_vm8, %v1193_v26, %v1321_v37 }
 0x171   : > { %3658 = vmatmul.msk.f32.vlgmr.msrb.gmra.mxu1 %vm1431_vm7, %v4416_v7 }
 0x172   : > { %v878_v11 = vpop.f32.mrf.mxu3  ;;  %v962_v12 = vpop.f32.mrf.mxu2  ;;  %1612 = vmatpush.msrb.mxu3 %v1383_v9 }
 0x173   : > { %v3349_v13 = vrot.slane %v878_v11, 1  ;;  %v901_v14 = vpop.f32.mrf.mxu0  ;;  %v930_v15 = vpop.f32.mrf.mxu1  ;;  %v1201_v52 = vadd.f32 %v4387_v38, %v962_v12 }
 0x174   : > { %1613 = vmatpush.msrb.mxu3 %v1382_v16  ;;  %v1194_v29 = vadd.f32 %v4389_v39, %v901_v14  ;;  %v1197_v56 = vadd.f32 %v4387_v38, %v930_v15 }
 0x175   : > { %v3350_v18 = vsel %vm5993_vm2, %v3349_v13, %v3348_v17  ;;  %v1329_v62 = vmul.f32 0.01, %v1201_v52  ;;  %vm1265_vm0 = vcmp.ge.f32.partialorder %v1201_v52, 0.0 }
 0x176   : > { %3367 = vst.msk [vmem:[%s4517_s13] sm:$0xff] %vm5992_vm4, %v3350_v18  ;;  %1614 = vmatpush.msrb.mxu3 %v1381_v19  ;;  %v1322_v40 = vmul.f32 0.01, %v1194_v29  ;;  %vm1258_vm13 = vcmp.ge.f32.partialorder %v1194_v29, 0.0  ;;  %v1325_v8 = vmul.f32 0.01, %v1197_v56 }
 0x177   : > { %3661 = vmatmul.msk.f32.gmra.mxu2 %vm1431_vm7, %v4440_v34  ;;  %3662 = vmatmul.msk.f32.vlgmr.msrb.gmra.mxu3 %vm1431_vm7, %v4416_v7  ;;  %v1393_v19 = vsel %vm1265_vm0, %v1201_v52, %v1329_v62 }
 0x178   : > { %v1386_v54 = vsel %vm1258_vm13, %v1194_v29, %v1322_v40 }
 0x179   : > { %3659 = vmatmul.msk.f32.gmra.mxu1 %vm1431_vm7, %v4440_v34 }
 0x17a   : > { %v965_v10 = vpop.f32.mrf.mxu2  ;;  %v4527_v20 = vpop.f32.mrf.mxu3 }
 0x17b   : > { %v904_v21 = vpop.f32.mrf.mxu0  ;;  %v933_v22 = vpop.f32.mrf.mxu1  ;;  %v1202_v46 = vadd.f32 %v4389_v39, %v965_v10  ;;  %v1205_v10 = vadd.f32 %v4387_v38, %v4527_v20 }
 0x17c   : > { %v1195_v23 = vadd.f32 %v4376_v36, %v904_v21  ;;  %v1198_v53 = vadd.f32 %v4389_v39, %v933_v22 }
 0x17d   : > { %v1330_v61 = vmul.f32 0.01, %v1202_v46  ;;  %vm1266_vm8 = vcmp.ge.f32.partialorder %v1202_v46, 0.0  ;;  %v1333_v26 = vmul.f32 0.01, %v1205_v10 }
 0x17e   : > { %v1323_v30 = vmul.f32 0.01, %v1195_v23  ;;  %vm1259_vm5 = vcmp.ge.f32.partialorder %v1195_v23, 0.0  ;;  %v1326_v63 = vmul.f32 0.01, %v1198_v53  ;;  %vm1262_vm13 = vcmp.ge.f32.partialorder %v1198_v53, 0.0 }
 0x17f   : > { %3663 = vmatmul.msk.f32.gmra.mxu3 %vm1431_vm7, %v4440_v34  ;;  %v1394_v17 = vsel %vm1266_vm8, %v1202_v46, %v1330_v61 }
 0x180   : > { %v1387_v33 = vsel %vm1259_vm5, %v1195_v23, %v1323_v30  ;;  %v1390_v18 = vsel %vm1262_vm13, %v1198_v53, %v1326_v63 }
 0x182   : > { %v968_v24 = vpop.f32.mrf.mxu2  ;;  %v997_v25 = vpop.f32.mrf.mxu3 }
 0x183   : > { %v907_v27 = vpop.f32.mrf.mxu0  ;;  %v936_v28 = vpop.f32.mrf.mxu1  ;;  %v1203_v58 = vadd.f32 %v4376_v36, %v968_v24  ;;  %v1206_v13 = vadd.f32 %v4389_v39, %v997_v25 }
 0x184   : > { %v1196_v32 = vadd.f32 %v4368_v31, %v907_v27  ;;  %v1199_v42 = vadd.f32 %v4376_v36, %v936_v28 }
 0x185   : > { %v1331_v57 = vmul.f32 0.01, %v1203_v58  ;;  %vm1267_vm5 = vcmp.ge.f32.partialorder %v1203_v58, 0.0  ;;  %v1334_v24 = vmul.f32 0.01, %v1206_v13  ;;  %vm1270_vm0 = vcmp.ge.f32.partialorder %v1206_v13, 0.0 }
 0x186   : > { %vm1260_vm6 = vcmp.ge.f32.partialorder %v1196_v32, 0.0  ;;  %v1324_v35 = vmul.f32 0.01, %v1196_v32  ;;  %v1327_v59 = vmul.f32 0.01, %v1199_v42 }
 0x187   : > { %v1395_v4 = vsel %vm1267_vm5, %v1203_v58, %v1331_v57 }
 0x188   : > { %v1388_v41 = vsel %vm1260_vm6, %v1196_v32, %v1324_v35  ;;  %vm1263_vm6 = vcmp.ge.f32.partialorder %v1199_v42, 0.0  ;;  %v1398_v32 = vsel %vm1270_vm0, %v1206_v13, %v1334_v24 }
 0x189   : > { %1634 = vmatpush.msra.mxu0 %v1388_v41  ;;  %v1391_v12 = vsel %vm1263_vm6, %v1199_v42, %v1327_v59  ;;  %vm1269_vm6 = vcmp.ge.f32.partialorder %v1205_v10, 0.0 }
 0x18a   : > { %v971_v44 = vpop.f32.mrf.mxu2  ;;  %v1000_v45 = vpop.f32.mrf.mxu3  ;;  %v1397_v35 = vsel %vm1269_vm6, %v1205_v10, %v1333_v26 }
 0x18b   : > { %v1204_v47 = vadd.f32 %v4368_v31, %v971_v44  ;;  %v4540_v48 = vpop.f32.mrf.mxu0  ;;  %v939_v49 = vpop.f32.mrf.mxu1  ;;  %1635 = vmatpush.msra.mxu0 %v1387_v33  ;;  %v1207_v3 = vadd.f32 %v4376_v36, %v1000_v45 }
 0x18c   : > { %v1200_v43 = vadd.f32 %v4368_v31, %v939_v49 }
 0x18d   : > { %vm1268_vm15 = vcmp.ge.f32.partialorder %v1204_v47, 0.0  ;;  %v1332_v55 = vmul.f32 0.01, %v1204_v47  ;;  %1636 = vmatpush.msra.mxu0 %v1386_v54  ;;  %v1335_v21 = vmul.f32 0.01, %v1207_v3  ;;  %vm1271_vm5 = vcmp.ge.f32.partialorder %v1207_v3, 0.0 }
 0x18e   : > { %vm1264_vm3 = vcmp.ge.f32.partialorder %v1200_v43, 0.0  ;;  %v1328_v60 = vmul.f32 0.01, %v1200_v43 }
 0x18f   : > { %1637 = vmatpush.msra.mxu0 %v1385_v51  ;;  %v1396_v50 = vsel %vm1268_vm15, %v1204_v47, %v1332_v55  ;;  %vm1261_vm15 = vcmp.ge.f32.partialorder %v1197_v56, 0.0  ;;  %v1399_v20 = vsel %vm1271_vm5, %v1207_v3, %v1335_v21 }
 0x190   : > { %1680 = vmatpush.msra.mxu2 %v1396_v50  ;;  %3664 = vmatmul.msk.f32.vlgmr.msra.gmra.mxu0 %vm1431_vm7, %v4416_v7  ;;  %v1392_v0 = vsel %vm1264_vm3, %v1200_v43, %v1328_v60  ;;  %v1389_v23 = vsel %vm1261_vm15, %v1197_v56, %v1325_v8 }
 0x191   : > { %1657 = vmatpush.msra.mxu1 %v1392_v0 }
 0x192   : > { %v4549_v9 = vpop.f32.mrf.mxu2  ;;  %v1003_v11 = vpop.f32.mrf.mxu3  ;;  %1681 = vmatpush.msra.mxu2 %v1395_v4 }
 0x193   : > { %v1208_v14 = vadd.f32 %v4368_v31, %v1003_v11  ;;  %v4554_v15 = vpop.f32.mrf.mxu1  ;;  %v1026_v16 = vpop.f32.mrf.mxu0  ;;  %1658 = vmatpush.msra.mxu1 %v1391_v12  ;;  %v3353_v55 = vrot.slane %v4549_v9, 6 }
 0x194   : > { %1682 = vmatpush.msra.mxu2 %v1394_v17  ;;  %v1209_v45 = vadd.f32 %v4387_v38, %v1026_v16  ;;  %v3351_v62 = vrot.slane %v4554_v15, 7 }
 0x195   : > { %vm1272_vm3 = vcmp.ge.f32.partialorder %v1208_v14, 0.0  ;;  %v1336_v22 = vmul.f32 0.01, %v1208_v14  ;;  %1659 = vmatpush.msra.mxu1 %v1390_v18 }
 0x196   : > { %1683 = vmatpush.msra.mxu2 %v1393_v19  ;;  %v1337_v43 = vmul.f32 0.01, %v1209_v45  ;;  %vm1273_vm15 = vcmp.ge.f32.partialorder %v1209_v45, 0.0  ;;  %v3352_v19 = vsel %vm2521_vm10, %v3351_v62, %v4540_v48 }
 0x197   : > { %3668 = vmatmul.msk.f32.vlgmr.msra.gmra.mxu2 %vm1431_vm7, %v4416_v7  ;;  %1660 = vmatpush.msra.mxu1 %v1389_v23  ;;  %v1400_v25 = vsel %vm1272_vm3, %v1208_v14, %v1336_v22  ;;  %v3354_v48 = vsel %vm2524_vm11, %v3353_v55, %v3352_v19 }
 0x198   : > { %1703 = vmatpush.msra.mxu3 %v1400_v25  ;;  %3665 = vmatmul.msk.f32.gmra.mxu0 %vm1431_vm7, %v4440_v34  ;;  %v1401_v4 = vsel %vm1273_vm15, %v1209_v45, %v1337_v43 }
 0x199   : > { %3666 = vmatmul.msk.f32.vlgmr.msra.gmra.mxu1 %vm1431_vm7, %v4416_v7 }
 0x19a   : > { %v4565_v27 = vpop.f32.mrf.mxu3  ;;  %v1090_v28 = vpop.f32.mrf.mxu2  ;;  %1704 = vmatpush.msra.mxu3 %v1399_v20 }
 0x19b   : > { %v1029_v29 = vpop.f32.mrf.mxu0  ;;  %v1058_v30 = vpop.f32.mrf.mxu1  ;;  %v1217_v8 = vadd.f32 %v4387_v38, %v1090_v28  ;;  %v3355_v20 = vrot.slane %v4565_v27, 5 }
 0x19c   : > { %1705 = vmatpush.msra.mxu3 %v1398_v32  ;;  %v1210_v49 = vadd.f32 %v4389_v39, %v1029_v29  ;;  %v1213_v13 = vadd.f32 %v4387_v38, %v1058_v30 }
 0x19d   : > { %v1345_v22 = vmul.f32 0.01, %v1217_v8 }
 0x19e   : > { %1706 = vmatpush.msra.mxu3 %v1397_v35  ;;  %v1338_v54 = vmul.f32 0.01, %v1210_v49  ;;  %vm1274_vm3 = vcmp.ge.f32.partialorder %v1210_v49, 0.0  ;;  %v1341_v28 = vmul.f32 0.01, %v1213_v13 }
 0x19f   : > { %3669 = vmatmul.msk.f32.gmra.mxu2 %vm1431_vm7, %v4440_v34  ;;  %3670 = vmatmul.msk.f32.vlgmr.msra.gmra.mxu3 %vm1431_vm7, %v4416_v7 }
 0x1a0   : > { %v1402_v12 = vsel %vm1274_vm3, %v1210_v49, %v1338_v54  ;;  %vm1281_vm3 = vcmp.ge.f32.partialorder %v1217_v8, 0.0 }
 0x1a1   : > { %3667 = vmatmul.msk.f32.gmra.mxu1 %vm1431_vm7, %v4440_v34 }
 0x1a2   : > { %v1093_v37 = vpop.f32.mrf.mxu2  ;;  %v4573_v40 = vpop.f32.mrf.mxu3 }
 0x1a3   : > { %v1032_v41 = vpop.f32.mrf.mxu0  ;;  %v1061_v33 = vpop.f32.mrf.mxu1  ;;  %v1218_v63 = vadd.f32 %v4389_v39, %v1093_v37  ;;  %v1221_v27 = vadd.f32 %v4387_v38, %v4573_v40  ;;  %v3356_v38 = vsel %vm5997_vm12, %v3355_v20, %v3354_v48 }
 0x1a4   : > { %v1211_v58 = vadd.f32 %v4376_v36, %v1032_v41  ;;  %v1214_v11 = vadd.f32 %v4389_v39, %v1061_v33  ;;  %v4605_v41 = vpop.permute.xlu2 %1423 }
 0x1a5   : > { %v1346_v10 = vmul.f32 0.01, %v1218_v63  ;;  %v1349_v43 = vmul.f32 0.01, %v1221_v27 }
 0x1a6   : > { %v1339_v52 = vmul.f32 0.01, %v1211_v58  ;;  %vm1275_vm13 = vcmp.ge.f32.partialorder %v1211_v58, 0.0  ;;  %v1342_v23 = vmul.f32 0.01, %v1214_v11  ;;  %vm1278_vm15 = vcmp.ge.f32.partialorder %v1214_v11, 0.0 }
 0x1a7   : > { %3671 = vmatmul.msk.f32.gmra.mxu3 %vm1431_vm7, %v4440_v34 }
 0x1a8   : > { %v1403_v50 = vsel %vm1275_vm13, %v1211_v58, %v1339_v52  ;;  %vm1282_vm13 = vcmp.ge.f32.partialorder %v1218_v63, 0.0  ;;  %v1406_v58 = vsel %vm1278_vm15, %v1214_v11, %v1342_v23 }
 0x1aa   : > { %v1096_v42 = vpop.f32.mrf.mxu2  ;;  %v4578_v44 = vpop.f32.mrf.mxu3 }
 0x1ab   : > { %v1035_v46 = vpop.f32.mrf.mxu0  ;;  %v1064_v47 = vpop.f32.mrf.mxu1  ;;  %v1219_v57 = vadd.f32 %v4376_v36, %v1096_v42  ;;  %v1222_v32 = vadd.f32 %v4389_v39, %v4578_v44  ;;  %v1409_v42 = vsel %vm1281_vm3, %v1217_v8, %v1345_v22 }
 0x1ac   : > { %v1212_v51 = vadd.f32 %v4368_v31, %v1035_v46  ;;  %v1215_v59 = vadd.f32 %v4376_v36, %v1064_v47 }
 0x1ad   : > { %v1347_v14 = vmul.f32 0.01, %v1219_v57  ;;  %vm1283_vm6 = vcmp.ge.f32.partialorder %v1219_v57, 0.0  ;;  %v1350_v40 = vmul.f32 0.01, %v1222_v32 }
 0x1ae   : > { %vm1276_vm8 = vcmp.ge.f32.partialorder %v1212_v51, 0.0  ;;  %v1340_v53 = vmul.f32 0.01, %v1212_v51  ;;  %v1343_v17 = vmul.f32 0.01, %v1215_v59 }
 0x1af   : > { %v1411_v26 = vsel %vm1283_vm6, %v1219_v57, %v1347_v14  ;;  %v4639_v14 = vpop.permute.xlu0 %1911 }
 0x1b0   : > { %v1404_v56 = vsel %vm1276_vm8, %v1212_v51, %v1340_v53  ;;  %vm1279_vm8 = vcmp.ge.f32.partialorder %v1215_v59, 0.0 }
 0x1b1   : > { %1726 = vmatpush.msrb.mxu0 %v1404_v56  ;;  %v1407_v30 = vsel %vm1279_vm8, %v1215_v59, %v1343_v17  ;;  %vm1286_vm8 = vcmp.ge.f32.partialorder %v1222_v32, 0.0 }
 0x1b2   : > { %v1099_v60 = vpop.f32.mrf.mxu2  ;;  %v1128_v61 = vpop.f32.mrf.mxu3 }
 0x1b3   : > { %v1220_v0 = vadd.f32 %v4368_v31, %v1099_v60  ;;  %v1067_v3 = vpop.f32.mrf.mxu1  ;;  %1727 = vmatpush.msrb.mxu0 %v1403_v50  ;;  %v1038_v15 = vpop.f32.mrf.mxu0  ;;  %v1223_v25 = vadd.f32 %v4376_v36, %v1128_v61  ;;  %v1410_v36 = vsel %vm1282_vm13, %v1218_v63, %v1346_v10  ;;  %vm1285_vm13 = vcmp.ge.f32.partialorder %v1221_v27, 0.0 }
 0x1b4   : > { %v1216_v9 = vadd.f32 %v4368_v31, %v1067_v3  ;;  %v3357_v33 = vrot.slane %v1038_v15, 4  ;;  %v1414_v60 = vsel %vm1286_vm8, %v1222_v32, %v1350_v40  ;;  %v4623_v50 = vpop.permute.xlu1 %1428 }
 0x1b5   : > { %vm1284_vm5 = vcmp.ge.f32.partialorder %v1220_v0, 0.0  ;;  %v1348_v16 = vmul.f32 0.01, %v1220_v0  ;;  %1728 = vmatpush.msrb.mxu0 %v1402_v12  ;;  %v1351_v45 = vmul.f32 0.01, %v1223_v25  ;;  %vm1287_vm6 = vcmp.ge.f32.partialorder %v1223_v25, 0.0 }
 0x1b6   : > { %vm1280_vm0 = vcmp.ge.f32.partialorder %v1216_v9, 0.0  ;;  %v1344_v18 = vmul.f32 0.01, %v1216_v9  ;;  %v3358_v52 = vsel %vm5996_vm14, %v3357_v33, %v3356_v38 }
 0x1b7   : > { %1729 = vmatpush.msrb.mxu0 %v1401_v4  ;;  %v1412_v21 = vsel %vm1284_vm5, %v1220_v0, %v1348_v16  ;;  %vm1277_vm5 = vcmp.ge.f32.partialorder %v1213_v13, 0.0  ;;  %v1415_v56 = vsel %vm1287_vm6, %v1223_v25, %v1351_v45  ;;  %v1413_v0 = vsel %vm1285_vm13, %v1221_v27, %v1349_v43 }
 0x1b8   : > { %1772 = vmatpush.msrb.mxu2 %v1412_v21  ;;  %3672 = vmatmul.msk.f32.vlgmr.msrb.gmra.mxu0 %vm1431_vm7, %v4416_v7  ;;  %v1408_v24 = vsel %vm1280_vm0, %v1216_v9, %v1344_v18  ;;  %v1405_v49 = vsel %vm1277_vm5, %v1213_v13, %v1341_v28  ;;  %v4634_v9 = vpop.permute.xlu2 %1906 }
 0x1b9   : > { %1749 = vmatpush.msrb.mxu1 %v1408_v24 }
 0x1ba   : > { %v1131_v29 = vpop.f32.mrf.mxu3  ;;  %1773 = vmatpush.msrb.mxu2 %v1411_v26  ;;  %v1102_v44 = vpop.f32.mrf.mxu2 }
 0x1bb   : > { %v1224_v35 = vadd.f32 %v4368_v31, %v1131_v29  ;;  %v1070_v37 = vpop.f32.mrf.mxu1  ;;  %1750 = vmatpush.msrb.mxu1 %v1407_v30  ;;  %v3361_v53 = vrot.slane %v1102_v44, 2 }
 0x1bc   : > { %1774 = vmatpush.msrb.mxu2 %v1410_v36  ;;  %v3359_v31 = vrot.slane %v1070_v37, 3 }
 0x1bd   : > { %vm1288_vm0 = vcmp.ge.f32.partialorder %v1224_v35, 0.0  ;;  %v1352_v39 = vmul.f32 0.01, %v1224_v35  ;;  %v1455_v46 = vpop.f32.mrf.mxu0  ;;  %1751 = vmatpush.msrb.mxu1 %v1406_v58 }
 0x1be   : > { %v1456_v47 = vadd.f32 %v1455_v46, %v4605_v41  ;;  %1775 = vmatpush.msrb.mxu2 %v1409_v42  ;;  %v3360_v54 = vsel %vm5995_vm9, %v3359_v31, %v3358_v52 }
 0x1bf   : > { %3676 = vmatmul.msk.f32.vlgmr.msrb.gmra.mxu2 %vm1431_vm7, %v4416_v7  ;;  %1752 = vmatpush.msrb.mxu1 %v1405_v49  ;;  %v1416_v51 = vsel %vm1288_vm0, %v1224_v35, %v1352_v39  ;;  %v3362_v61 = vsel %vm5994_vm1, %v3361_v53, %v3360_v54 }
 0x1c0   : > { %1795 = vmatpush.msrb.mxu3 %v1416_v51  ;;  %3673 = vmatmul.msk.f32.gmra.mxu0 %vm1431_vm7, %v4440_v34  ;;  %v1838_v57 = vmul.f32 0.01, %v1456_v47  ;;  %vm1806_vm15 = vcmp.ge.f32.partialorder %v1456_v47, 0.0 }
 0x1c1   : > { %3674 = vmatmul.msk.f32.vlgmr.msrb.gmra.mxu1 %vm1431_vm7, %v4416_v7 }
 0x1c2   : > { %v1134_v55 = vpop.f32.mrf.mxu3  ;;  %1796 = vmatpush.msrb.mxu3 %v1415_v56  ;;  %v1870_v3 = vsel %vm1806_vm15, %v1456_v47, %v1838_v57 }
 0x1c3   : > { %v3363_v59 = vrot.slane %v1134_v55, 1  ;;  %v1914_v13 = vmul.f32 %v4634_v9, %v1870_v3  ;;  %v4659_v55 = vstv %s2091_s14  ;;  %s3407_s14 = scalar_lea.hbm %s5991_s10, %s5998_s29 }
 0x1c4   : > { %1797 = vmatpush.msrb.mxu3 %v1414_v60  ;;  %s3410_s8 = sshll.u32 %s3407_s14, 4  ;;  %s3928_s14 = scalar_lea.hbm %s5991_s10, 32  ;;  %s3411_s8 = int_to_ptr.hbm [resolvable:$true] %s3410_s8 }
 0x1c5   : > { %v3364_v62 = vsel %vm5993_vm2, %v3363_v59, %v3362_v61  ;;  %v1458_v63 = vpop.f32.mrf.mxu0  ;;  %s3922_s21 = sshra.s32 %s3411_s8, 4  ;;  %s3923_s21 = int_to_ptr.hbm [resolvable:$true] %s3922_s21 }
 0x1c6   : > { %3368 = vst.msk [vmem:[%s4517_s13 + $0x8] sm:$0xff] %vm5992_vm4, %v3364_v62  ;;  %v1459_v4 = vadd.f32 %v1458_v63, %v4623_v50  ;;  %v1478_v8 = vpop.f32.mrf.mxu1  ;;  %1798 = vmatpush.msrb.mxu3 %v1413_v0  ;;  %s3375_s13 = scalar_lea.sflag [#allocation6], %s4500_s11  ;;  %p3929_p1 = scmp.lt.s32.totalorder %s3923_s21, %s5991_s10 }
 0x1c7   : > { %v1479_v11 = vadd.f32 %v1478_v8, %v4605_v41  ;;  %3677 = vmatmul.msk.f32.gmra.mxu2 %vm1431_vm7, %v4440_v34  ;;  %3678 = vmatmul.msk.f32.vlgmr.msrb.gmra.mxu3 %vm1431_vm7, %v4416_v7  ;;  %v1947_v7 = vsel %vm5992_vm4, %v1914_v13, 0.0 }
 0x1c8   : > { %vm1807_vm3 = vcmp.ge.f32.partialorder %v1459_v4, 0.0  ;;  %v1839_v12 = vmul.f32 0.01, %v1459_v4 }
 0x1c9   : > { %3675 = vmatmul.msk.f32.gmra.mxu1 %vm1431_vm7, %v4440_v34  ;;  %v1840_v15 = vmul.f32 0.01, %v1479_v11  ;;  %vm1808_vm5 = vcmp.ge.f32.partialorder %v1479_v11, 0.0 }
 0x1ca   : > { %v1871_v16 = vsel %vm1807_vm3, %v1459_v4, %v1839_v12  ;;  %v1501_v17 = vpop.f32.mrf.mxu2 }
 0x1cb   : > { %v1915_v18 = vmul.f32 %v4639_v14, %v1871_v16  ;;  %v1502_v19 = vadd.f32 %v1501_v17, %v4605_v41  ;;  %v1872_v22 = vsel %vm1808_vm5, %v1479_v11, %v1840_v15 }
 0x1cc   : > { %v1916_v48 = vmul.f32 %v4634_v9, %v1872_v22 }
 0x1cd   : > { %v1948_v10 = vsel %vm5992_vm4, %v1915_v18, 0.0  ;;  %v1842_v24 = vmul.f32 0.01, %v1502_v19  ;;  %vm1810_vm0 = vcmp.ge.f32.partialorder %v1502_v19, 0.0 }
 0x1ce   : > { %v1949_v21 = vadd.f32 %v1948_v10, %v1947_v7  ;;  %v1481_v23 = vpop.f32.mrf.mxu1 }
 0x1cf   : > { %v1482_v25 = vadd.f32 %v1481_v23, %v4623_v50  ;;  %3679 = vmatmul.msk.f32.gmra.mxu3 %vm1431_vm7, %v4440_v34  ;;  %v1874_v32 = vsel %vm1810_vm0, %v1502_v19, %v1842_v24  ;;  %v1956_v34 = vsel %vm5992_vm4, %v1916_v48, 0.0 }
 0x1d0   : > { %v1950_v26 = vrot.slane %v1949_v21, 4  ;;  %v1918_v45 = vmul.f32 %v4634_v9, %v1874_v32 }
 0x1d1   : > { %vm1809_vm6 = vcmp.ge.f32.partialorder %v1482_v25, 0.0  ;;  %v1841_v20 = vmul.f32 0.01, %v1482_v25 }
 0x1d2   : > { %v1951_v28 = vadd.f32 %v1950_v26, %v1949_v21  ;;  %v1504_v29 = vpop.f32.mrf.mxu2  ;;  %v1524_v30 = vpop.f32.mrf.mxu3  ;;  %v1965_v40 = vsel %vm5992_vm4, %v1918_v45, 0.0 }
 0x1d3   : > { %v1873_v35 = vsel %vm1809_vm6, %v1482_v25, %v1841_v20  ;;  %v1505_v37 = vadd.f32 %v1504_v29, %v4623_v50  ;;  %v1525_v36 = vadd.f32 %v1524_v30, %v4605_v41  ;;  %vm6006_vm6 = vcmp.eq.s32.totalorder %v4138_v1, %v4140_v2 }
 0x1d4   : > { %v1952_v27 = vrot.slane %v1951_v28, 2  ;;  %v1917_v33 = vmul.f32 %v4639_v14, %v1873_v35 }
 0x1d5   : > { %vm1811_vm7 = vcmp.ge.f32.partialorder %v1505_v37, 0.0  ;;  %v1843_v58 = vmul.f32 0.01, %v1505_v37  ;;  %v1844_v31 = vmul.f32 0.01, %v1525_v36  ;;  %vm1812_vm8 = vcmp.ge.f32.partialorder %v1525_v36, 0.0 }
 0x1d6   : > { %v1953_v42 = vadd.f32 %v1952_v27, %v1951_v28  ;;  %v1957_v39 = vsel %vm5992_vm4, %v1917_v33, 0.0 }
 0x1d7   : > { %v1958_v44 = vadd.f32 %v1957_v39, %v1956_v34  ;;  %v1875_v46 = vsel %vm1811_vm7, %v1505_v37, %v1843_v58  ;;  %v1876_v52 = vsel %vm1812_vm8, %v1525_v36, %v1844_v31 }
 0x1d8   : > { %v1954_v47 = vrot.slane %v1953_v42, 1  ;;  %v1919_v49 = vmul.f32 %v4639_v14, %v1875_v46  ;;  %v1920_v62 = vmul.f32 %v4634_v9, %v1876_v52 }
 0x1d9   : > { %v1959_v38 = vrot.slane %v1958_v44, 4 }
 0x1da   : > { %v1966_v51 = vsel %vm5992_vm4, %v1919_v49, 0.0  ;;  %v1527_v53 = vpop.f32.mrf.mxu3  ;;  %v1955_v43 = vadd.f32 %v1954_v47, %v1953_v42  ;;  %v1974_v13 = vsel %vm5992_vm4, %v1920_v62, 0.0 }
 0x1db   : > { %v1960_v54 = vadd.f32 %v1959_v38, %v1958_v44  ;;  %v1967_v56 = vadd.f32 %v1966_v51, %v1965_v40  ;;  %v1528_v57 = vadd.f32 %v1527_v53, %v4623_v50 }
 0x1dc   : > { %v2093_v63 = vadd.f32 %v4659_v55, %v1955_v43 }
 0x1dd   : > { %v1961_v59 = vrot.slane %v1960_v54, 2  ;;  %v1968_v60 = vrot.slane %v1967_v56, 4  ;;  %vm1813_vm13 = vcmp.ge.f32.partialorder %v1528_v57, 0.0  ;;  %v1845_v61 = vmul.f32 0.01, %v1528_v57 }
 0x1de   : > { %v3680_v15 = vmul.f32 -1.442695, %v2093_v63 }
 0x1df   : > { %v1962_v0 = vadd.f32 %v1961_v59, %v1960_v54  ;;  %v1969_v3 = vadd.f32 %v1968_v60, %v1967_v56  ;;  %v1877_v4 = vsel %vm1813_vm13, %v1528_v57, %v1845_v61 }
 0x1e0   : > { %v1921_v8 = vmul.f32 %v4639_v14, %v1877_v4  ;;  %3780 = vpow2.f32 %v3680_v15 }
 0x1e1   : > { %v1963_v11 = vrot.slane %v1962_v0, 1  ;;  %v1970_v12 = vrot.slane %v1969_v3, 2 }
 0x1e2   : > { %v1975_v16 = vsel %vm5992_vm4, %v1921_v8, 0.0 }
 0x1e3   : > { %v1964_v17 = vadd.f32 %v1963_v11, %v1962_v0  ;;  %v1971_v18 = vadd.f32 %v1970_v12, %v1969_v3  ;;  %v1976_v19 = vadd.f32 %v1975_v16, %v1974_v13  ;;  %v4690_v0 = vsel %vm6006_vm6, 1.0, %v4020_v5 }
 0x1e5   : > { %v2094_v7 = vadd.f32 %v4659_v55, %v1964_v17  ;;  %v1972_v10 = vrot.slane %v1971_v18, 1  ;;  %v1977_v21 = vrot.slane %v1976_v19, 4  ;;  %v1547_v22 = vpop.f32.mrf.mxu0  ;;  %v2428_v17 = vsub.f32 1.0, %v4690_v0 }
 0x1e6   : > { %v1548_v23 = vadd.f32 %v1547_v22, %v4605_v41  ;;  %v3781_v32 = vpop.eup %3780  ;;  %v2430_v22 = vld [vmem:[%s4701_s23] sm:$0xff] }
 0x1e7   : > { %v3681_v24 = vmul.f32 -1.442695, %v2094_v7  ;;  %v1973_v25 = vadd.f32 %v1972_v10, %v1971_v18  ;;  %v1978_v26 = vadd.f32 %v1977_v21, %v1976_v19  ;;  %v4671_v42 = vadd.f32 1.0, %v3781_v32 }
 0x1e8   : > { %v1846_v28 = vmul.f32 0.01, %v1548_v23  ;;  %vm1814_vm15 = vcmp.ge.f32.partialorder %v1548_v23, 0.0 }
 0x1e9   : > { %v2095_v48 = vadd.f32 %v4659_v55, %v1973_v25  ;;  %v1979_v20 = vrot.slane %v1978_v26, 2  ;;  %3782 = vpow2.f32 %v3681_v24 }
 0x1ea   : > { %v1878_v36 = vsel %vm1814_vm15, %v1548_v23, %v1846_v28 }
 0x1eb   : > { %v3682_v29 = vmul.f32 -1.442695, %v2095_v48  ;;  %v1980_v30 = vadd.f32 %v1979_v20, %v1978_v26  ;;  %v1922_v44 = vmul.f32 %v4634_v9, %v1878_v36 }
 0x1ed   : > { %3784 = vpow2.f32 %v3682_v29  ;;  %v1981_v35 = vrot.slane %v1980_v30, 1  ;;  %v1550_v37 = vpop.f32.mrf.mxu0  ;;  %v1983_v43 = vsel %vm5992_vm4, %v1922_v44, 0.0 }
 0x1ee   : > { %v1551_v27 = vadd.f32 %v1550_v37, %v4623_v50  ;;  %v1570_v33 = vpop.f32.mrf.mxu1  ;;  %3786 = vrcp.f32 %v4671_v42  ;;  %v4720_v37 = vmul.f32 %v2430_v22, %v2428_v17 }
 0x1ef   : > { %v1982_v34 = vadd.f32 %v1981_v35, %v1980_v30  ;;  %v1571_v58 = vadd.f32 %v1570_v33, %v4605_v41  ;;  %v3783_v39 = vpop.eup %3782 }
 0x1f0   : > { %vm1815_vm3 = vcmp.ge.f32.partialorder %v1551_v27, 0.0  ;;  %v1847_v45 = vmul.f32 0.01, %v1551_v27  ;;  %v4677_v52 = vadd.f32 1.0, %v3783_v39 }
 0x1f1   : > { %v2096_v31 = vadd.f32 %v4659_v55, %v1982_v34  ;;  %v1848_v51 = vmul.f32 0.01, %v1571_v58  ;;  %vm1816_vm5 = vcmp.ge.f32.partialorder %v1571_v58, 0.0 }
 0x1f2   : > { %v1879_v46 = vsel %vm1815_vm3, %v1551_v27, %v1847_v45  ;;  %v1593_v47 = vpop.f32.mrf.mxu2  ;;  %v2182_v27 = vand.u32 2147483647, %v4671_v42  ;;  %vm2178_vm3 = vweird.f32 %v4671_v42  ;;  %vm2193_vm6 = vweird.f32 %v4677_v52 }
 0x1f3   : > { %v3785_v49 = vpop.eup %3784  ;;  %v3683_v38 = vmul.f32 -1.442695, %v2096_v31  ;;  %v1923_v40 = vmul.f32 %v4639_v14, %v1879_v46  ;;  %v1594_v53 = vadd.f32 %v1593_v47, %v4605_v41  ;;  %v1880_v60 = vsel %vm1816_vm5, %v1571_v58, %v1848_v51 }
 0x1f4   : > { %v4682_v56 = vadd.f32 1.0, %v3785_v49  ;;  %v4692_v4 = vpop.eup %3786  ;;  %v1924_v11 = vmul.f32 %v4634_v9, %v1880_v60 }
 0x1f5   : > { %3788 = vpow2.f32 %v3683_v38  ;;  %v1984_v54 = vsel %vm5992_vm4, %v1923_v40, 0.0  ;;  %v1850_v61 = vmul.f32 0.01, %v1594_v53  ;;  %vm1818_vm0 = vcmp.ge.f32.partialorder %v1594_v53, 0.0 }
 0x1f6   : > { %v1985_v57 = vadd.f32 %v1984_v54, %v1983_v43  ;;  %v1573_v59 = vpop.f32.mrf.mxu1  ;;  %3790 = vrcp.f32 %v4677_v52  ;;  %v2174_v23 = vmul.f32 %v4692_v4, %v4671_v42  ;;  %v1992_v26 = vsel %vm5992_vm4, %v1924_v11, 0.0 }
 0x1f7   : > { %v1574_v62 = vadd.f32 %v1573_v59, %v4623_v50  ;;  %3792 = vrcp.f32 %v4682_v56  ;;  %v1882_v1 = vsel %vm1818_vm0, %v1594_v53, %v1850_v61  ;;  %v2184_v40 = vand.u32 2147483648, %v4671_v42 }
 0x1f8   : > { %v1986_v63 = vrot.slane %v1985_v57, 4  ;;  %v1926_v25 = vmul.f32 %v4634_v9, %v1882_v1  ;;  %v2175_v31 = vsub.f32 1.0, %v2174_v23  ;;  %vm2179_vm5 = vweird.f32 %v4692_v4 }
 0x1f9   : > { %vm1817_vm7 = vcmp.ge.f32.partialorder %v1574_v62, 0.0  ;;  %v1849_v3 = vmul.f32 0.01, %v1574_v62  ;;  %vm4741_vm0 = vcmp.eq.f32.partialorder %v2182_v27, 8.507059e+37 }
 0x1fa   : > { %v1987_v8 = vadd.f32 %v1986_v63, %v1985_v57  ;;  %v1596_v12 = vpop.f32.mrf.mxu2  ;;  %v1616_v13 = vpop.f32.mrf.mxu3  ;;  %v2001_v34 = vsel %vm5992_vm4, %v1926_v25, 0.0 }
 0x1fb   : > { %v3789_v16 = vpop.eup %3788  ;;  %v1881_v2 = vsel %vm1817_vm7, %v1574_v62, %v1849_v3  ;;  %v1597_v5 = vadd.f32 %v1596_v12, %v4623_v50  ;;  %v1617_v15 = vadd.f32 %v1616_v13, %v4605_v41  ;;  %v2176_v3 = vmul.f32 %v4692_v4, %v2175_v31 }
 0x1fc   : > { %v1988_v18 = vrot.slane %v1987_v8, 2  ;;  %v4706_v19 = vadd.f32 1.0, %v3789_v16  ;;  %v1925_v7 = vmul.f32 %v4639_v14, %v1881_v2  ;;  %v4709_v21 = vpop.eup %3790  ;;  %v2185_v2 = vor.u32 1.1754944e-38, %v2184_v40 }
 0x1fd   : > { %vm1819_vm8 = vcmp.ge.f32.partialorder %v1597_v5, 0.0  ;;  %v1851_v10 = vmul.f32 0.01, %v1597_v5  ;;  %v1852_v28 = vmul.f32 0.01, %v1617_v15  ;;  %v4717_v29 = vpop.eup %3792  ;;  %vm1820_vm13 = vcmp.ge.f32.partialorder %v1617_v15, 0.0 }
 0x1fe   : > { %v1989_v24 = vadd.f32 %v1988_v18, %v1987_v8  ;;  %v1993_v48 = vsel %vm5992_vm4, %v1925_v7, 0.0  ;;  %v2189_v36 = vmul.f32 %v4709_v21, %v4677_v52  ;;  %3794 = vrcp.f32 %v4706_v19 }
 0x1ff   : > { %v1883_v20 = vsel %vm1819_vm8, %v1597_v5, %v1851_v10  ;;  %v1994_v32 = vadd.f32 %v1993_v48, %v1992_v26  ;;  %v1884_v46 = vsel %vm1820_vm13, %v1617_v15, %v1852_v28  ;;  %v2204_v51 = vmul.f32 %v4717_v29, %v4682_v56  ;;  %vm4765_vm13 = vmor %vm2178_vm3, %vm2179_vm5 }
 0x200   : > { %v1990_v30 = vrot.slane %v1989_v24, 1  ;;  %v1927_v35 = vmul.f32 %v4639_v14, %v1883_v20  ;;  %v2190_v53 = vsub.f32 1.0, %v2189_v36  ;;  %v1928_v60 = vmul.f32 %v4634_v9, %v1884_v46 }
 0x201   : > { %v1995_v58 = vrot.slane %v1994_v32, 4  ;;  %v2197_v8 = vand.u32 2147483647, %v4677_v52  ;;  %v2205_v13 = vsub.f32 1.0, %v2204_v51  ;;  %v2177_v23 = vadd.f32 %v4692_v4, %v2176_v3 }
 0x202   : > { %v1991_v33 = vadd.f32 %v1990_v30, %v1989_v24  ;;  %v2002_v45 = vsel %vm5992_vm4, %v1927_v35, 0.0  ;;  %v1619_v39 = vpop.f32.mrf.mxu3  ;;  %v2191_v5 = vmul.f32 %v4709_v21, %v2190_v53  ;;  %v2010_v17 = vsel %vm5992_vm4, %v1928_v60, 0.0 }
 0x203   : > { %v2003_v44 = vadd.f32 %v2002_v45, %v2001_v34  ;;  %v1620_v47 = vadd.f32 %v1619_v39, %v4623_v50  ;;  %v1996_v38 = vadd.f32 %v1995_v58, %v1994_v32  ;;  %v2442_v24 = vrot.slane %v4720_v37, 1 }
 0x204   : > { %v2097_v49 = vadd.f32 %v4659_v55, %v1991_v33  ;;  %v4735_v61 = vpop.eup %3794  ;;  %vm4753_vm7 = vcmp.eq.f32.partialorder %v2197_v8, 8.507059e+37  ;;  %v2206_v48 = vmul.f32 %v4717_v29, %v2205_v13  ;;  %v2192_v32 = vadd.f32 %v4709_v21, %v2191_v5 }
 0x205   : > { %v2004_v43 = vrot.slane %v2003_v44, 4  ;;  %vm1821_vm15 = vcmp.ge.f32.partialorder %v1620_v47, 0.0  ;;  %v1853_v54 = vmul.f32 0.01, %v1620_v47  ;;  %v1997_v59 = vrot.slane %v1996_v38, 2 }
 0x206   : > { %v3684_v57 = vmul.f32 -1.442695, %v2097_v49  ;;  %v2219_v7 = vmul.f32 %v4735_v61, %v4706_v19  ;;  %vm2194_vm8 = vweird.f32 %v4709_v21  ;;  %v2199_v33 = vand.u32 2147483648, %v4677_v52 }
 0x207   : > { %v2005_v62 = vadd.f32 %v2004_v43, %v2003_v44  ;;  %v1885_v63 = vsel %vm1821_vm15, %v1620_v47, %v1853_v54  ;;  %v1998_v11 = vadd.f32 %v1997_v59, %v1996_v38  ;;  %v2212_v34 = vand.u32 2147483647, %v4682_v56  ;;  %vm4778_vm15 = vmor %vm2193_vm6, %vm2194_vm8 }
 0x208   : > { %3796 = vpow2.f32 %v3684_v57  ;;  %v1929_v12 = vmul.f32 %v4639_v14, %v1885_v63  ;;  %v2220_v58 = vsub.f32 1.0, %v2219_v7  ;;  %v2181_v44 = vsel %vm4765_vm13, %v4692_v4, %v2177_v23 }
 0x209   : > { %v2006_v16 = vrot.slane %v2005_v62, 2  ;;  %v1999_v15 = vrot.slane %v1998_v11, 1  ;;  %v2207_v47 = vadd.f32 %v4717_v29, %v2206_v48  ;;  %vm2209_vm3 = vweird.f32 %v4717_v29 }
 0x20a   : > { %v2011_v18 = vsel %vm5992_vm4, %v1929_v12, 0.0  ;;  %v2214_v49 = vand.u32 2147483648, %v4682_v56  ;;  %v2196_v4 = vsel %vm4778_vm15, %v4709_v21, %v2192_v32  ;;  %vm2208_vm5 = vweird.f32 %v4682_v56 }
 0x20b   : > { %v2007_v10 = vadd.f32 %v2006_v16, %v2005_v62  ;;  %v2012_v22 = vadd.f32 %v2011_v18, %v2010_v17  ;;  %v2000_v25 = vadd.f32 %v1999_v15, %v1998_v11  ;;  %v2186_v52 = vsel %vm4741_vm0, %v2185_v2, %v2181_v44  ;;  %vm4795_vm6 = vmor %vm2208_vm5, %vm2209_vm3 }
 0x20c   : > { %v2200_v51 = vor.u32 1.1754944e-38, %v2199_v33  ;;  %v2221_v53 = vmul.f32 %v4735_v61, %v2220_v58  ;;  %v2211_v21 = vsel %vm4795_vm6, %v4717_v29, %v2207_v47  ;;  %vm2213_vm0 = vcmp.eq.f32.partialorder %v2212_v34, 8.507059e+37 }
 0x20d   : > { %v2008_v20 = vrot.slane %v2007_v10, 1  ;;  %v2013_v28 = vrot.slane %v2012_v22, 4  ;;  %v1639_v30 = vpop.f32.mrf.mxu0  ;;  %v2098_v36 = vadd.f32 %v4659_v55, %v2000_v25  ;;  %v2215_v60 = vor.u32 1.1754944e-38, %v2214_v49 }
 0x20e   : > { %v3797_v35 = vpop.eup %3796  ;;  %v1640_v57 = vadd.f32 %v1639_v30, %v4605_v41  ;;  %v2201_v56 = vsel %vm4753_vm7, %v2200_v51, %v2196_v4  ;;  %v2227_v3 = vand.u32 2147483647, %v4706_v19  ;;  %v2229_v8 = vand.u32 2147483648, %v4706_v19 }
 0x20f   : > { %v4771_v45 = vadd.f32 1.0, %v3797_v35  ;;  %v2009_v39 = vadd.f32 %v2008_v20, %v2007_v10  ;;  %v2014_v31 = vadd.f32 %v2013_v28, %v2012_v22  ;;  %v3685_v46 = vmul.f32 -1.442695, %v2098_v36 }
 0x210   : > { %v2222_v13 = vadd.f32 %v4735_v61, %v2221_v53  ;;  %vm2223_vm7 = vweird.f32 %v4706_v19  ;;  %vm2224_vm8 = vweird.f32 %v4735_v61  ;;  %v1854_v29 = vmul.f32 0.01, %v1640_v57 }
 0x211   : > { %v2099_v38 = vadd.f32 %v4659_v55, %v2009_v39  ;;  %v2015_v40 = vrot.slane %v2014_v31, 2  ;;  %3798 = vpow2.f32 %v3685_v46  ;;  %v2216_v2 = vsel %vm2213_vm0, %v2215_v60, %v2211_v21  ;;  %vm4817_vm3 = vmor %vm2223_vm7, %vm2224_vm8 }
 0x212   : > { %3800 = vrcp.f32 %v4771_v45  ;;  %vm1822_vm13 = vcmp.ge.f32.partialorder %v1640_v57, 0.0  ;;  %v2443_v17 = vrot.slane %v4720_v37, 2  ;;  %vm4821_vm5 = vcmp.eq.f32.partialorder %v2227_v3, 8.507059e+37 }
 0x213   : > { %v3686_v43 = vmul.f32 -1.442695, %v2099_v38  ;;  %v2016_v54 = vadd.f32 %v2015_v40, %v2014_v31  ;;  %v2230_v23 = vor.u32 1.1754944e-38, %v2229_v8  ;;  %v2226_v20 = vsel %vm4817_vm3, %v4735_v61, %v2222_v13 }
 0x214   : > { %v2444_v28 = vrot.slane %v4720_v37, 3  ;;  %v1886_v35 = vsel %vm1822_vm13, %v1640_v57, %v1854_v29  ;;  %v2244_v34 = vand.u32 2147483648, %v4771_v45  ;;  %v4839_v58 = vmul.f32 %v4720_v37, %v2186_v52 }
 0x215   : > { %3802 = vpow2.f32 %v3686_v43  ;;  %v2017_v62 = vrot.slane %v2016_v54, 1  ;;  %v1642_v63 = vpop.f32.mrf.mxu0  ;;  %v4843_v39 = vmul.f32 %v2442_v24, %v2201_v56  ;;  %v1930_v31 = vmul.f32 %v4634_v9, %v1886_v35 }
 0x216   : > { %v1643_v11 = vadd.f32 %v1642_v63, %v4623_v50  ;;  %v1662_v12 = vpop.f32.mrf.mxu1  ;;  %v2231_v42 = vsel %vm4821_vm5, %v2230_v23, %v2226_v20  ;;  %v4848_v47 = vmul.f32 %v2443_v17, %v2216_v2  ;;  %v2242_v40 = vand.u32 2147483647, %v4771_v45 }
 0x217   : > { %v2018_v16 = vadd.f32 %v2017_v62, %v2016_v54  ;;  %v1663_v1 = vadd.f32 %v1662_v12, %v4605_v41  ;;  %v3799_v5 = vpop.eup %3798  ;;  %v4853_v24 = vor.u32 1.1754944e-38, %v2244_v34  ;;  %v2445_v52 = vrot.slane %v4720_v37, 4 }
 0x218   : > { %vm1823_vm15 = vcmp.ge.f32.partialorder %v1643_v11, 0.0  ;;  %v1855_v15 = vmul.f32 0.01, %v1643_v11  ;;  %v4812_v18 = vpop.eup %3800  ;;  %v4814_v7 = vadd.f32 1.0, %v3799_v5  ;;  %v2019_v57 = vsel %vm5992_vm4, %v1930_v31, 0.0 }
 0x219   : > { %v2100_v10 = vadd.f32 %v4659_v55, %v2018_v16  ;;  %v1856_v26 = vmul.f32 0.01, %v1663_v1  ;;  %vm1824_vm6 = vcmp.ge.f32.partialorder %v1663_v1, 0.0  ;;  %v2234_v33 = vmul.f32 %v4812_v18, %v4771_v45 }
 0x21a   : > { %v1887_v25 = vsel %vm1823_vm15, %v1643_v11, %v1855_v15  ;;  %v1685_v48 = vpop.f32.mrf.mxu2  ;;  %3804 = vrcp.f32 %v4814_v7  ;;  %vm2238_vm8 = vweird.f32 %v4771_v45  ;;  %v4864_v62 = vmul.f32 %v2444_v28, %v2231_v42 }
 0x21b   : > { %v3803_v30 = vpop.eup %3802  ;;  %v3687_v32 = vmul.f32 -1.442695, %v2100_v10  ;;  %v1686_v27 = vadd.f32 %v1685_v48, %v4605_v41  ;;  %v1931_v61 = vmul.f32 %v4639_v14, %v1887_v25  ;;  %v1888_v44 = vsel %vm1824_vm6, %v1663_v1, %v1856_v26 }
 0x21c   : > { %v4831_v36 = vadd.f32 1.0, %v3803_v30  ;;  %v2235_v4 = vsub.f32 1.0, %v2234_v33  ;;  %v1932_v43 = vmul.f32 %v4634_v9, %v1888_v44  ;;  %v2489_v12 = vand.u32 2147483647, %v4843_v39 }
 0x21d   : > { %3806 = vpow2.f32 %v3687_v32  ;;  %vm1826_vm0 = vcmp.ge.f32.partialorder %v1686_v27, 0.0  ;;  %v1858_v49 = vmul.f32 0.01, %v1686_v27  ;;  %v2020_v53 = vsel %vm5992_vm4, %v1931_v61, 0.0 }
 0x21e   : > { %v1665_v46 = vpop.f32.mrf.mxu1  ;;  %3808 = vrcp.f32 %v4831_v36  ;;  %v2021_v16 = vadd.f32 %v2020_v53, %v2019_v57  ;;  %v2236_v1 = vmul.f32 %v4812_v18, %v2235_v4  ;;  %v2028_v2 = vsel %vm5992_vm4, %v1932_v43, 0.0 }
 0x21f   : > { %v1666_v38 = vadd.f32 %v1665_v46, %v4623_v50  ;;  %v1890_v59 = vsel %vm1826_vm0, %v1686_v27, %v1858_v49  ;;  %vm4879_vm3 = vcmp.eq.f32.partialorder %v2242_v40, 8.507059e+37  ;;  %v2490_v48 = vand.u32 2147483647, %v4848_v47 }
 0x220   : > { %v4856_v51 = vpop.eup %3804  ;;  %v1934_v5 = vmul.f32 %v4634_v9, %v1890_v59  ;;  %v2237_v28 = vadd.f32 %v4812_v18, %v2236_v1  ;;  %vm2239_vm5 = vweird.f32 %v4812_v18  ;;  %v4887_v30 = vrot.slane %v2489_v12, 7 }
 0x221   : > { %vm1825_vm7 = vcmp.ge.f32.partialorder %v1666_v38, 0.0  ;;  %v1857_v54 = vmul.f32 0.01, %v1666_v38  ;;  %v2249_v60 = vmul.f32 %v4856_v51, %v4814_v7  ;;  %v2022_v32 = vrot.slane %v2021_v16, 4  ;;  %vm4899_vm6 = vmor %vm2238_vm8, %vm2239_vm5 }
 0x222   : > { %v1688_v56 = vpop.f32.mrf.mxu2  ;;  %v1708_v21 = vpop.f32.mrf.mxu3  ;;  %v2257_v35 = vand.u32 2147483647, %v4814_v7  ;;  %v2446_v33 = vrot.slane %v4720_v37, 5  ;;  %v2037_v34 = vsel %vm5992_vm4, %v1934_v5, 0.0  ;;  %v2241_v43 = vsel %vm4899_vm6, %v4812_v18, %v2237_v28 }
 0x223   : > { %v3807_v63 = vpop.eup %3806  ;;  %v1889_v3 = vsel %vm1825_vm7, %v1666_v38, %v1857_v54  ;;  %v1689_v8 = vadd.f32 %v1688_v56, %v4623_v50  ;;  %v1709_v11 = vadd.f32 %v1708_v21, %v4605_v41  ;;  %v2250_v22 = vsub.f32 1.0, %v2249_v60 }
 0x224   : > { %v4869_v13 = vadd.f32 1.0, %v3807_v63  ;;  %v1933_v29 = vmul.f32 %v4639_v14, %v1889_v3  ;;  %v4875_v17 = vpop.eup %3808  ;;  %vm2253_vm0 = vweird.f32 %v4814_v7  ;;  %v2259_v54 = vand.u32 2147483648, %v4814_v7 }
 0x225   : > { %vm1827_vm13 = vcmp.ge.f32.partialorder %v1689_v8, 0.0  ;;  %v1859_v15 = vmul.f32 0.01, %v1689_v8  ;;  %v1860_v19 = vmul.f32 0.01, %v1709_v11  ;;  %vm1828_vm15 = vcmp.ge.f32.partialorder %v1709_v11, 0.0 }
 0x226   : > { %3810 = vrcp.f32 %v4869_v13  ;;  %v2029_v10 = vsel %vm5992_vm4, %v1933_v29, 0.0  ;;  %v2264_v27 = vmul.f32 %v4875_v17, %v4831_v36  ;;  %v2251_v46 = vmul.f32 %v4856_v51, %v2250_v22 }
 0x227   : > { %v2030_v23 = vadd.f32 %v2029_v10, %v2028_v2  ;;  %v1891_v25 = vsel %vm1827_vm13, %v1689_v8, %v1859_v15  ;;  %v1892_v31 = vsel %vm1828_vm15, %v1709_v11, %v1860_v19  ;;  %vm2268_vm7 = vweird.f32 %v4831_v36 }
 0x228   : > { %v1935_v20 = vmul.f32 %v4639_v14, %v1891_v25  ;;  %v2265_v4 = vsub.f32 1.0, %v2264_v27  ;;  %v2023_v57 = vadd.f32 %v2022_v32, %v2021_v16  ;;  %vm4911_vm8 = vcmp.eq.f32.partialorder %v2257_v35, 8.507059e+37 }
 0x229   : > { %v2031_v42 = vrot.slane %v2030_v23, 4  ;;  %v1936_v21 = vmul.f32 %v4634_v9, %v1892_v31  ;;  %vm2254_vm15 = vweird.f32 %v4856_v51  ;;  %v2272_v60 = vand.u32 2147483647, %v4831_v36 }
 0x22a   : > { %v2038_v61 = vsel %vm5992_vm4, %v1935_v20, 0.0  ;;  %v1711_v44 = vpop.f32.mrf.mxu3  ;;  %v2266_v18 = vmul.f32 %v4875_v17, %v2265_v4  ;;  %v2252_v8 = vadd.f32 %v4856_v51, %v2251_v46  ;;  %v2246_v16 = vsel %vm4879_vm3, %v4853_v24, %v2241_v43  ;;  %vm4935_vm6 = vmor %vm2253_vm0, %vm2254_vm15 }
 0x22b   : > { %v2039_v49 = vadd.f32 %v2038_v61, %v2037_v34  ;;  %v1712_v38 = vadd.f32 %v1711_v44, %v4623_v50  ;;  %v2032_v63 = vadd.f32 %v2031_v42, %v2030_v23  ;;  %vm2269_vm5 = vweird.f32 %v4875_v17 }
 0x22c   : > { %v4903_v53 = vpop.eup %3810  ;;  %v2267_v29 = vadd.f32 %v4875_v17, %v2266_v18  ;;  %v2024_v1 = vrot.slane %v2023_v57, 2  ;;  %v2274_v5 = vand.u32 2147483648, %v4831_v36  ;;  %v2046_v10 = vsel %vm5992_vm4, %v1936_v21, 0.0 }
 0x22d   : > { %v2040_v59 = vrot.slane %v2039_v49, 4  ;;  %vm1829_vm13 = vcmp.ge.f32.partialorder %v1712_v38, 0.0  ;;  %v1861_v45 = vmul.f32 0.01, %v1712_v38  ;;  %v2279_v11 = vmul.f32 %v4903_v53, %v4869_v13 }
 0x22e   : > { %v2260_v24 = vor.u32 1.1754944e-38, %v2259_v54  ;;  %vm4939_vm3 = vcmp.eq.f32.partialorder %v2272_v60, 8.507059e+37  ;;  %v2033_v25 = vrot.slane %v2032_v63, 2  ;;  %v2256_v20 = vsel %vm4935_vm6, %v4856_v51, %v2252_v8 }
 0x22f   : > { %v1893_v3 = vsel %vm1829_vm13, %v1712_v38, %v1861_v45  ;;  %v2041_v2 = vadd.f32 %v2040_v59, %v2039_v49  ;;  %v2280_v15 = vsub.f32 1.0, %v2279_v11  ;;  %vm4948_vm13 = vmor %vm2268_vm7, %vm2269_vm5  ;;  %v2289_v7 = vand.u32 2147483648, %v4869_v13 }
 0x230   : > { %v1937_v12 = vmul.f32 %v4639_v14, %v1893_v3  ;;  %v2271_v32 = vsel %vm4948_vm13, %v4875_v17, %v2267_v29  ;;  %vm2284_vm0 = vweird.f32 %v4903_v53  ;;  %v2287_v27 = vand.u32 2147483647, %v4869_v13 }
 0x231   : > { %v2281_v35 = vmul.f32 %v4903_v53, %v2280_v15  ;;  %v2042_v34 = vrot.slane %v2041_v2, 2  ;;  %v2275_v36 = vor.u32 1.1754944e-38, %v2274_v5  ;;  %vm2283_vm7 = vweird.f32 %v4869_v13 }
 0x232   : > { %v2047_v19 = vsel %vm5992_vm4, %v1937_v12, 0.0  ;;  %v2261_v44 = vsel %vm4911_vm8, %v2260_v24, %v2256_v20  ;;  %v2447_v17 = vrot.slane %v4720_v37, 6  ;;  %v2034_v42 = vadd.f32 %v2033_v25, %v2032_v63  ;;  %vm2285_vm15 = vmor %vm2283_vm7, %vm2284_vm0 }
 0x233   : > { %v2048_v26 = vadd.f32 %v2047_v19, %v2046_v10  ;;  %v2282_v46 = vadd.f32 %v4903_v53, %v2281_v35  ;;  %v2276_v49 = vsel %vm4939_vm3, %v2275_v36, %v2271_v32  ;;  %v2290_v38 = vor.u32 1.1754944e-38, %v2289_v7 }
 0x234   : > { %v4969_v40 = vmul.f32 %v2445_v52, %v2246_v16  ;;  %vm2288_vm5 = vcmp.eq.f32.partialorder %v2287_v27, 8.507059e+37  ;;  %v2448_v43 = vrot.slane %v4720_v37, 7  ;;  %v2043_v54 = vadd.f32 %v2042_v34, %v2041_v2 }
 0x235   : > { %v2049_v51 = vrot.slane %v2048_v26, 4  ;;  %v1731_v61 = vpop.f32.mrf.mxu0  ;;  %v2286_v4 = vsel %vm2285_vm15, %v4903_v53, %v2282_v46  ;;  %v4975_v56 = vmul.f32 %v2446_v33, %v2261_v44  ;;  %v4977_v21 = vmul.f32 %v2447_v17, %v2276_v49 }
 0x236   : > { %v1732_v31 = vadd.f32 %v1731_v61, %v4605_v41  ;;  %v2291_v45 = vsel %vm2288_vm5, %v2290_v38, %v2286_v4  ;;  %v2491_v18 = vand.u32 2147483647, %v4864_v62  ;;  %v2025_v52 = vadd.f32 %v2024_v1, %v2023_v57 }
 0x237   : > { %v2050_v59 = vadd.f32 %v2049_v51, %v2048_v26  ;;  %v2035_v60 = vrot.slane %v2034_v42, 1  ;;  %v2488_v63 = vand.u32 2147483647, %v4839_v58  ;;  %v2492_v53 = vand.u32 2147483647, %v4969_v40 }
 0x238   : > { %v1862_v13 = vmul.f32 0.01, %v1732_v31  ;;  %vm1830_vm8 = vcmp.ge.f32.partialorder %v1732_v31, 0.0  ;;  %v4982_v8 = vmul.f32 %v2448_v43, %v2291_v45  ;;  %v2044_v11 = vrot.slane %v2043_v54, 1 }
 0x239   : > { %v2051_v12 = vrot.slane %v2050_v59, 2  ;;  %v2522_v33 = vsel %vm2521_vm10, %v4887_v30, %v2488_v63  ;;  %v2523_v29 = vrot.slane %v2490_v48, 6  ;;  %v2493_v1 = vand.u32 2147483647, %v4975_v56 }
 0x23a   : > { %v1894_v3 = vsel %vm1830_vm8, %v1732_v31, %v1862_v13  ;;  %v2494_v5 = vand.u32 2147483647, %v4977_v21  ;;  %v2526_v15 = vrot.slane %v2491_v18, 5  ;;  %v2026_v10 = vrot.slane %v2025_v52, 1 }
 0x23b   : > { %v2036_v19 = vadd.f32 %v2035_v60, %v2034_v42  ;;  %v1938_v22 = vmul.f32 %v4634_v9, %v1894_v3  ;;  %v2529_v24 = vrot.slane %v2492_v53, 4  ;;  %v2495_v25 = vand.u32 2147483647, %v4982_v8 }
 0x23c   : > { %v2045_v48 = vadd.f32 %v2044_v11, %v2043_v54  ;;  %v2052_v26 = vadd.f32 %v2051_v12, %v2050_v59  ;;  %v2525_v20 = vsel %vm2524_vm11, %v2523_v29, %v2522_v33  ;;  %v2532_v32 = vrot.slane %v2493_v1, 3 }
 0x23d   : > { %v1734_v16 = vpop.f32.mrf.mxu0  ;;  %v2528_v7 = vsel %vm5997_vm12, %v2526_v15, %v2525_v20  ;;  %v2535_v35 = vrot.slane %v2494_v5, 2  ;;  %v2027_v34 = vadd.f32 %v2026_v10, %v2025_v52  ;;  %v2102_v51 = vadd.f32 %v4659_v55, %v2036_v19 }
 0x23e   : > { %v1735_v2 = vadd.f32 %v1734_v16, %v4623_v50  ;;  %v1754_v57 = vpop.f32.mrf.mxu1  ;;  %v2531_v36 = vsel %vm5996_vm14, %v2529_v24, %v2528_v7  ;;  %v2055_v31 = vsel %vm5992_vm4, %v1938_v22, 0.0  ;;  %v2538_v17 = vrot.slane %v2495_v25, 1 }
 0x23f   : > { %v1755_v30 = vadd.f32 %v1754_v57, %v4605_v41  ;;  %v2534_v46 = vsel %vm5995_vm9, %v2532_v32, %v2531_v36  ;;  %v2103_v13 = vadd.f32 %v4659_v55, %v2045_v48  ;;  %v2053_v4 = vrot.slane %v2052_v26, 1 }
 0x240   : > { %vm1831_vm6 = vcmp.ge.f32.partialorder %v1735_v2, 0.0  ;;  %v1863_v23 = vmul.f32 0.01, %v1735_v2  ;;  %v2537_v49 = vsel %vm5994_vm1, %v2535_v35, %v2534_v46  ;;  %v2101_v52 = vadd.f32 %v4659_v55, %v2027_v34 }
 0x241   : > { %v1864_v44 = vmul.f32 0.01, %v1755_v30  ;;  %vm1832_vm3 = vcmp.ge.f32.partialorder %v1755_v30, 0.0  ;;  %v2540_v54 = vsel %vm5993_vm2, %v2538_v17, %v2537_v49  ;;  %v3689_v60 = vmul.f32 -1.442695, %v2102_v51 }
 0x242   : > { %v1895_v28 = vsel %vm1831_vm6, %v1735_v2, %v1863_v23  ;;  %v1777_v27 = vpop.f32.mrf.mxu2  ;;  %v2557_v45 = vsel %vm5992_vm4, %v2540_v54, 0.0  ;;  %v3690_v12 = vmul.f32 -1.442695, %v2103_v13  ;;  %v2054_v16 = vadd.f32 %v2053_v4, %v2052_v26 }
 0x243   : > { %v1939_v61 = vmul.f32 %v4639_v14, %v1895_v28  ;;  %v1778_v38 = vadd.f32 %v1777_v27, %v4605_v41  ;;  %v1896_v53 = vsel %vm1832_vm3, %v1755_v30, %v1864_v44  ;;  %2558 = vadd.xlane.f32.xlu1 %v2557_v45  ;;  %v3688_v1 = vmul.f32 -1.442695, %v2101_v52 }
 0x244   : > { %v1940_v29 = vmul.f32 %v4634_v9, %v1896_v53  ;;  %3812 = vpow2.f32 %v3689_v60  ;;  %v2104_v22 = vadd.f32 %v4659_v55, %v2054_v16 }
 0x245   : > { %v2056_v42 = vsel %vm5992_vm4, %v1939_v61, 0.0  ;;  %v1866_v3 = vmul.f32 0.01, %v1778_v38  ;;  %vm1834_vm0 = vcmp.ge.f32.partialorder %v1778_v38, 0.0  ;;  %3814 = vpow2.f32 %v3690_v12 }
 0x246   : > { %v2057_v43 = vadd.f32 %v2056_v42, %v2055_v31  ;;  %v1757_v59 = vpop.f32.mrf.mxu1  ;;  %v2064_v23 = vsel %vm5992_vm4, %v1940_v29, 0.0  ;;  %3816 = vpow2.f32 %v3688_v1  ;;  %v3691_v35 = vmul.f32 -1.442695, %v2104_v22 }
 0x247   : > { %v1758_v18 = vadd.f32 %v1757_v59, %v4623_v50  ;;  %v1898_v15 = vsel %vm1834_vm0, %v1778_v38, %v1866_v3  ;;  %v2434_v29 = vsel %vm5992_vm4, %v4720_v37, 0.0 }
 0x248   : > { %v2058_v63 = vrot.slane %v2057_v43, 4  ;;  %v1942_v26 = vmul.f32 %v4634_v9, %v1898_v15  ;;  %3818 = vpow2.f32 %v3691_v35  ;;  %2435 = vadd.xlane.f32.xlu0 %v2434_v29 }
 0x249   : > { %vm1833_vm13 = vcmp.ge.f32.partialorder %v1758_v18, 0.0  ;;  %v1865_v11 = vmul.f32 0.01, %v1758_v18 }
 0x24a   : > { %v2059_v33 = vadd.f32 %v2058_v63, %v2057_v43  ;;  %v1780_v57 = vpop.f32.mrf.mxu2  ;;  %v1800_v28 = vpop.f32.mrf.mxu3  ;;  %v2073_v44 = vsel %vm5992_vm4, %v1942_v26, 0.0 }
 0x24b   : > { %v1897_v2 = vsel %vm1833_vm13, %v1758_v18, %v1865_v11  ;;  %v1781_v19 = vadd.f32 %v1780_v57, %v4623_v50  ;;  %v1801_v32 = vadd.f32 %v1800_v28, %v4605_v41  ;;  %v3813_v61 = vpop.eup %3812 }
 0x24c   : > { %v2060_v5 = vrot.slane %v2059_v33, 2  ;;  %v1941_v10 = vmul.f32 %v4639_v14, %v1897_v2  ;;  %v3815_v36 = vpop.eup %3814  ;;  %v5021_v4 = vadd.f32 1.0, %v3813_v61 }
 0x24d   : > { %vm1835_vm7 = vcmp.ge.f32.partialorder %v1781_v19, 0.0  ;;  %v1867_v25 = vmul.f32 0.01, %v1781_v19  ;;  %v1868_v49 = vmul.f32 0.01, %v1801_v32  ;;  %v3817_v38 = vpop.eup %3816  ;;  %vm1836_vm15 = vcmp.ge.f32.partialorder %v1801_v32, 0.0 }
 0x24e   : > { %v2061_v24 = vadd.f32 %v2060_v5, %v2059_v33  ;;  %v2065_v30 = vsel %vm5992_vm4, %v1941_v10, 0.0  ;;  %v5023_v54 = vadd.f32 1.0, %v3815_v36  ;;  %v5025_v18 = vadd.f32 1.0, %v3817_v38  ;;  %v3819_v12 = vpop.eup %3818 }
 0x24f   : > { %v2066_v20 = vadd.f32 %v2065_v30, %v2064_v23  ;;  %v1899_v7 = vsel %vm1835_vm7, %v1781_v19, %v1867_v25  ;;  %v1900_v60 = vsel %vm1836_vm15, %v1801_v32, %v1868_v49  ;;  %v5036_v15 = vadd.f32 1.0, %v3819_v12 }
 0x250   : > { %v2062_v48 = vrot.slane %v2061_v24, 1  ;;  %v1943_v51 = vmul.f32 %v4639_v14, %v1899_v7  ;;  %v1944_v33 = vmul.f32 %v4634_v9, %v1900_v60  ;;  %vm2298_vm8 = vweird.f32 %v5025_v18 }
 0x251   : > { %v2067_v34 = vrot.slane %v2066_v20, 4  ;;  %v2304_v60 = vand.u32 2147483648, %v5025_v18  ;;  %vm2313_vm3 = vweird.f32 %v5021_v4 }
 0x252   : > { %v2063_v27 = vadd.f32 %v2062_v48, %v2061_v24  ;;  %v2074_v17 = vsel %vm5992_vm4, %v1943_v51, 0.0  ;;  %v1803_v45 = vpop.f32.mrf.mxu3  ;;  %v2082_v22 = vsel %vm5992_vm4, %v1944_v33, 0.0  ;;  %v2429_v51 = vsub.f32 1.0, %v4159_v6 }
 0x253   : > { %v2068_v46 = vadd.f32 %v2067_v34, %v2066_v20  ;;  %v2075_v42 = vadd.f32 %v2074_v17, %v2073_v44  ;;  %v1804_v63 = vadd.f32 %v1803_v45, %v4623_v50  ;;  %v2319_v33 = vand.u32 2147483648, %v5021_v4 }
 0x254   : > { %v2105_v31 = vadd.f32 %v4659_v55, %v2063_v27 }
 0x255   : > { %v2069_v41 = vrot.slane %v2068_v46, 2  ;;  %v2076_v43 = vrot.slane %v2075_v42, 4  ;;  %vm1837_vm5 = vcmp.ge.f32.partialorder %v1804_v63, 0.0  ;;  %v1869_v11 = vmul.f32 0.01, %v1804_v63 }
 0x256   : > { %v3692_v13 = vmul.f32 -1.442695, %v2105_v31  ;;  %v2431_v31 = vld [vmem:[%s4701_s23 + $0x8] sm:$0xff]  ;;  %s3924_s23 = scalar_lea.hbm %s3923_s21, 16 }
 0x257   : > { %v2070_v59 = vadd.f32 %v2069_v41, %v2068_v46  ;;  %v2077_v52 = vadd.f32 %v2076_v43, %v2075_v42  ;;  %v1901_v57 = vsel %vm1837_vm5, %v1804_v63, %v1869_v11  ;;  %vm2328_vm5 = vweird.f32 %v5023_v54  ;;  %p3925_p12 = scmp.ne.s32.totalorder %s3923_s21, %s3924_s23  ;;  %p3930_p2 = scmp.lt.s32.totalorder %s3928_s14, %s3924_s23 }
 0x258   : > { %3820 = vpow2.f32 %v3692_v13  ;;  %v1945_v5 = vmul.f32 %v4639_v14, %v1901_v57  ;;  %v5066_v13 = vmul.f32 %v2431_v31, %v2429_v51 }
 0x259   : > { %v2071_v53 = vrot.slane %v2070_v59, 1  ;;  %3822 = vrcp.f32 %v5021_v4  ;;  %v2078_v3 = vrot.slane %v2077_v52, 2  ;;  %p3926_p13 = pnand %p3925_p12, %p4122_p4  ;;  %p3931_p3 = por %p3930_p2, %p3929_p1 }
 0x25a   : > { %3824 = vrcp.f32 %v5023_v54  ;;  %v2083_v9 = vsel %vm5992_vm4, %v1945_v5, 0.0 }
 0x25b   : > { %v2072_v16 = vadd.f32 %v2071_v53, %v2070_v59  ;;  %3826 = vrcp.f32 %v5025_v18  ;;  %v2079_v2 = vadd.f32 %v2078_v3, %v2077_v52  ;;  %v2084_v30 = vadd.f32 %v2083_v9, %v2082_v22  ;;  %p3927_p0 = pneg %p3926_p13 }
 0x25c   : > { %v2302_v52 = vand.u32 2147483647, %v5025_v18  ;;  %v5099_v9 = vor.u32 1.1754944e-38, %v2304_v60 }
 0x25d   : > { %v2106_v1 = vadd.f32 %v4659_v55, %v2072_v16  ;;  %v2080_v10 = vrot.slane %v2079_v2, 1  ;;  %v2085_v26 = vrot.slane %v2084_v30, 4  ;;  %v2317_v16 = vand.u32 2147483647, %v5021_v4  ;;  %p3932_p5 = pnand %p3931_p3, %p3927_p0 }
 0x25e   : > { %v3821_v50 = vpop.eup %3820 }
 0x25f   : > { %v3693_v19 = vmul.f32 -1.442695, %v2106_v1  ;;  %v5040_v24 = vpop.eup %3822  ;;  %v5042_v37 = vadd.f32 1.0, %v3821_v50  ;;  %v2081_v23 = vadd.f32 %v2080_v10, %v2079_v2  ;;  %v2086_v7 = vadd.f32 %v2085_v26, %v2084_v30 }
 0x260   : > { %v5044_v25 = vpop.eup %3824  ;;  %v2309_v20 = vmul.f32 %v5040_v24, %v5021_v4  ;;  %vm2314_vm13 = vweird.f32 %v5040_v24  ;;  %v2334_v10 = vand.u32 2147483648, %v5023_v54  ;;  %vm5107_vm15 = vcmp.eq.f32.partialorder %v2317_v16, 8.507059e+37 }
 0x261   : > { %3828 = vpow2.f32 %v3693_v19  ;;  %v5046_v48 = vpop.eup %3826  ;;  %v2107_v14 = vadd.f32 %v4659_v55, %v2081_v23  ;;  %v2324_v32 = vmul.f32 %v5044_v25, %v5023_v54  ;;  %v2087_v27 = vrot.slane %v2086_v7, 2  ;;  %vm5103_vm7 = vmor %vm2313_vm3, %vm2314_vm13 }
 0x262   : > { %3830 = vrcp.f32 %v5036_v15  ;;  %v2294_v35 = vmul.f32 %v5046_v48, %v5025_v18  ;;  %v2310_v61 = vsub.f32 1.0, %v2309_v20  ;;  %vm2299_vm6 = vweird.f32 %v5046_v48 }
 0x263   : > { %3832 = vrcp.f32 %v5042_v37  ;;  %v3694_v28 = vmul.f32 -1.442695, %v2107_v14  ;;  %v2088_v46 = vadd.f32 %v2087_v27, %v2086_v7  ;;  %v2325_v17 = vsub.f32 1.0, %v2324_v32  ;;  %vm5124_vm3 = vmor %vm2298_vm8, %vm2299_vm6 }
 0x264   : > { %v2295_v42 = vsub.f32 1.0, %v2294_v35  ;;  %v2311_v41 = vmul.f32 %v5040_v24, %v2310_v61  ;;  %vm2329_vm0 = vweird.f32 %v5044_v25  ;;  %v2320_v26 = vor.u32 1.1754944e-38, %v2319_v33 }
 0x265   : > { %3834 = vpow2.f32 %v3694_v28  ;;  %v2089_v38 = vrot.slane %v2088_v46, 1  ;;  %v2326_v63 = vmul.f32 %v5044_v25, %v2325_v17  ;;  %vm5115_vm4 = vmor %vm2328_vm5, %vm2329_vm0  ;;  %v2349_v32 = vand.u32 2147483648, %v5036_v15 }
 0x266   : > { %v2296_v3 = vmul.f32 %v5046_v48, %v2295_v42  ;;  %v2312_v29 = vadd.f32 %v5040_v24, %v2311_v41  ;;  %v2362_v35 = vand.u32 2147483647, %v5042_v37  ;;  %vm2358_vm13 = vweird.f32 %v5042_v37 }
 0x267   : > { %v3829_v34 = vpop.eup %3828  ;;  %v2090_v45 = vadd.f32 %v2089_v38, %v2088_v46  ;;  %v2327_v1 = vadd.f32 %v5044_v25, %v2326_v63  ;;  %v2350_v38 = vor.u32 1.1754944e-38, %v2349_v32  ;;  %v2364_v63 = vand.u32 2147483648, %v5042_v37 }
 0x268   : > { %v5058_v36 = vpop.eup %3830  ;;  %v5061_v44 = vadd.f32 1.0, %v3829_v34  ;;  %v5094_v5 = vadd.f32 %v5046_v48, %v2296_v3  ;;  %v2316_v14 = vsel %vm5103_vm7, %v5040_v24, %v2312_v29  ;;  %v2347_v24 = vand.u32 2147483647, %v5036_v15 }
 0x269   : > { %v5063_v49 = vpop.eup %3832  ;;  %v2339_v43 = vmul.f32 %v5058_v36, %v5036_v15  ;;  %v2108_v12 = vadd.f32 %v4659_v55, %v2090_v45  ;;  %v2332_v55 = vand.u32 2147483647, %v5023_v54  ;;  %v2331_v54 = vsel %vm5115_vm4, %v5044_v25, %v2327_v1 }
 0x26a   : > { %3836 = vrcp.f32 %v5061_v44  ;;  %v2354_v11 = vmul.f32 %v5063_v49, %v5042_v37  ;;  %v2301_v18 = vsel %vm5124_vm3, %v5046_v48, %v5094_v5  ;;  %v2335_v34 = vor.u32 1.1754944e-38, %v2334_v10 }
 0x26b   : > { %v3835_v59 = vpop.eup %3834  ;;  %v2340_v2 = vsub.f32 1.0, %v2339_v43  ;;  %v3695_v50 = vmul.f32 -1.442695, %v2108_v12  ;;  %vm2333_vm8 = vcmp.eq.f32.partialorder %v2332_v55, 8.507059e+37  ;;  %v2321_v25 = vsel %vm5107_vm15, %v2320_v26, %v2316_v14 }
 0x26c   : > { %v5075_v53 = vadd.f32 1.0, %v3835_v59  ;;  %v2355_v19 = vsub.f32 1.0, %v2354_v11  ;;  %vm2343_vm4 = vweird.f32 %v5036_v15  ;;  %v2336_v46 = vsel %vm2333_vm8, %v2335_v34, %v2331_v54 }
 0x26d   : > { %v2341_v4 = vmul.f32 %v5058_v36, %v2340_v2  ;;  %vm2344_vm6 = vweird.f32 %v5058_v36  ;;  %vm5150_vm0 = vcmp.eq.f32.partialorder %v2347_v24, 8.507059e+37  ;;  %vm5154_vm7 = vcmp.eq.f32.partialorder %v2362_v35, 8.507059e+37 }
 0x26e   : > { %3838 = vrcp.f32 %v5075_v53  ;;  %v2356_v51 = vmul.f32 %v5063_v49, %v2355_v19  ;;  %vm5160_vm15 = vcmp.eq.f32.partialorder %v2302_v52, 8.507059e+37  ;;  %vm2359_vm5 = vweird.f32 %v5063_v49  ;;  %vm5169_vm3 = vmor %vm2343_vm4, %vm2344_vm6 }
 0x26f   : > { %3840 = vpow2.f32 %v3695_v50  ;;  %v2342_v17 = vadd.f32 %v5058_v36, %v2341_v4  ;;  %v2449_v12 = vrot.slane %v5066_v13, 1  ;;  %v2379_v15 = vand.u32 2147483648, %v5061_v44  ;;  %vm5185_vm6 = vmor %vm2358_vm13, %vm2359_vm5 }
 0x270   : > { %v5088_v57 = vpop.eup %3836  ;;  %v2357_v60 = vadd.f32 %v5063_v49, %v2356_v51  ;;  %vm2373_vm2 = vweird.f32 %v5061_v44  ;;  %v2377_v29 = vand.u32 2147483647, %v5061_v44  ;;  %v2394_v50 = vand.u32 2147483648, %v5075_v53 }
 0x271   : > { %v2369_v22 = vmul.f32 %v5088_v57, %v5061_v44  ;;  %vm2374_vm8 = vweird.f32 %v5088_v57  ;;  %v2346_v16 = vsel %vm5169_vm3, %v5058_v36, %v2342_v17  ;;  %vm2388_vm13 = vweird.f32 %v5075_v53 }
 0x272   : > { %v2361_v36 = vsel %vm5185_vm6, %v5063_v49, %v2357_v60  ;;  %vm5196_vm3 = vmor %vm2373_vm2, %vm2374_vm8  ;;  %v2392_v37 = vand.u32 2147483647, %v5075_v53  ;;  %v2450_v55 = vrot.slane %v5066_v13, 2  ;;  %v2351_v44 = vsel %vm5150_vm0, %v2350_v38, %v2346_v16 }
 0x273   : > { %v2370_v28 = vsub.f32 1.0, %v2369_v22  ;;  %v2365_v5 = vor.u32 1.1754944e-38, %v2364_v63  ;;  %v2451_v19 = vrot.slane %v5066_v13, 3  ;;  %v2380_v22 = vor.u32 1.1754944e-38, %v2379_v15 }
 0x274   : > { %v5134_v27 = vpop.eup %3838  ;;  %v2452_v23 = vrot.slane %v5066_v13, 4  ;;  %v5217_v30 = vmul.f32 %v2449_v12, %v2321_v25  ;;  %vm2378_vm2 = vcmp.eq.f32.partialorder %v2377_v29, 8.507059e+37  ;;  %v2453_v26 = vrot.slane %v5066_v13, 5 }
 0x275   : > { %v2371_v61 = vmul.f32 %v5088_v57, %v2370_v28  ;;  %v2384_v31 = vmul.f32 %v5134_v27, %v5075_v53  ;;  %v3841_v48 = vpop.eup %3840  ;;  %vm2389_vm4 = vweird.f32 %v5134_v27  ;;  %v2366_v14 = vsel %vm5154_vm7, %v2365_v5, %v2361_v36 }
 0x276   : > { %v5158_v59 = vadd.f32 1.0, %v3841_v48  ;;  %vm5208_vm5 = vmor %vm2388_vm13, %vm2389_vm4  ;;  %vm2393_vm0 = vcmp.eq.f32.partialorder %v2392_v37, 8.507059e+37  ;;  %v2454_v28 = vrot.slane %v5066_v13, 6  ;;  %v5223_v7 = vmul.f32 %v2450_v55, %v2336_v46 }
 0x277   : > { %v2385_v43 = vsub.f32 1.0, %v2384_v31  ;;  %v2372_v11 = vadd.f32 %v5088_v57, %v2371_v61  ;;  %v2306_v54 = vsel %vm5160_vm15, %v5099_v9, %v2301_v18  ;;  %v5229_v35 = vmul.f32 %v2451_v19, %v2351_v44 }
 0x278   : > { %3842 = vrcp.f32 %v5158_v59  ;;  %v2497_v25 = vand.u32 2147483647, %v5217_v30  ;;  %v2409_v61 = vand.u32 2147483648, %v5158_v59  ;;  %v5238_v31 = vmul.f32 %v5066_v13, %v2306_v54 }
 0x279   : > { %v2386_v52 = vmul.f32 %v5134_v27, %v2385_v43  ;;  %v2376_v10 = vsel %vm5196_vm3, %v5088_v57, %v2372_v11  ;;  %v2395_v57 = vor.u32 1.1754944e-38, %v2394_v50  ;;  %v2498_v9 = vand.u32 2147483647, %v5223_v7 }
 0x27a   : > { %v2381_v4 = vsel %vm2378_vm2, %v2380_v22, %v2376_v10  ;;  %v2407_v17 = vand.u32 2147483647, %v5158_v59  ;;  %v2499_v48 = vand.u32 2147483647, %v5229_v35  ;;  %v2455_v42 = vrot.slane %v5066_v13, 7 }
 0x27b   : > { %v2387_v2 = vadd.f32 %v5134_v27, %v2386_v52  ;;  %v5233_v51 = vmul.f32 %v2453_v26, %v2381_v4  ;;  %vm2403_vm15 = vweird.f32 %v5158_v59  ;;  %v2541_v45 = vrot.slane %v2497_v25, 7 }
 0x27c   : > { %v2410_v60 = vor.u32 1.1754944e-38, %v2409_v61  ;;  %v2543_v3 = vrot.slane %v2498_v9, 6  ;;  %vm2408_vm4 = vcmp.eq.f32.partialorder %v2407_v17, 8.507059e+37  ;;  %v2496_v52 = vand.u32 2147483647, %v5238_v31 }
 0x27d   : > { %v2391_v53 = vsel %vm5208_vm5, %v5134_v27, %v2387_v2  ;;  %v5231_v27 = vmul.f32 %v2452_v23, %v2366_v14  ;;  %v2501_v43 = vand.u32 2147483647, %v5233_v51  ;;  %v2545_v12 = vrot.slane %v2499_v48, 5 }
 0x27e   : > { %v3843_v20 = vpop.eup %3842  ;;  %v2396_v24 = vsel %vm2393_vm0, %v2395_v57, %v2391_v53  ;;  %v2542_v29 = vsel %vm2521_vm10, %v2541_v45, %v2496_v52  ;;  %vm6055_vm6 = vcmask 1047559   ;;  %vm6056_vm3 = vcmask 130048  }
 0x27f   : > { %v2399_v32 = vmul.f32 %v3843_v20, %v5158_v59  ;;  %v5240_v46 = vmul.f32 %v2454_v28, %v2396_v24  ;;  %vm2404_vm7 = vweird.f32 %v3843_v20  ;;  %v2500_v38 = vand.u32 2147483647, %v5231_v27  ;;  %vm6057_vm13 = vmmov %vm6056_vm3 }
 0x280   : > { %vm2405_vm8 = vmor %vm2403_vm15, %vm2404_vm7  ;;  %v2549_v59 = vrot.slane %v2501_v43, 3  ;;  %v2544_v2 = vsel %vm2524_vm11, %v2543_v3, %v2542_v29  ;;  %v2437_v19 = vsel %vm6057_vm13, %v5066_v13, 0.0  ;;  %v2887_v24 = vrot.slane %v4690_v0, 1 }
 0x281   : > { %v2400_v34 = vsub.f32 1.0, %v2399_v32  ;;  %v2502_v63 = vand.u32 2147483647, %v5240_v46  ;;  %v2547_v15 = vrot.slane %v2500_v38, 4  ;;  %v2546_v1 = vsel %vm5997_vm12, %v2545_v12, %v2544_v2 }
 0x282   : > { %v2888_v32 = vrot.slane %v4690_v0, 2 }
 0x283   : > { %v2401_v18 = vmul.f32 %v3843_v20, %v2400_v34  ;;  %v2551_v50 = vrot.slane %v2502_v63, 2  ;;  %v2548_v37 = vsel %vm5996_vm14, %v2547_v15, %v2546_v1 }
 0x284   : > { %v2550_v55 = vsel %vm5995_vm9, %v2549_v59, %v2548_v37 }
 0x285   : > { %v2402_v41 = vadd.f32 %v3843_v20, %v2401_v18  ;;  %v2552_v5 = vsel %vm5994_vm1, %v2551_v50, %v2550_v55 }
 0x287   : > { %v2406_v11 = vsel %vm2405_vm8, %v3843_v20, %v2402_v41 }
 0x288   : > { %v2411_v16 = vsel %vm2408_vm4, %v2410_v60, %v2406_v11 }
 0x289   : > { %v5251_v33 = vmul.f32 %v2455_v42, %v2411_v16 }
 0x28b   : > { %v2503_v36 = vand.u32 2147483647, %v5251_v33 }
 0x28d   : > { %v2553_v44 = vrot.slane %v2503_v36, 1 }
 0x28f   : > { %v2554_v10 = vsel %vm6055_vm6, %v2553_v44, %v2552_v5 }
 0x290   : > { %v2560_v49 = vsel %vm6056_vm3, %v2554_v10, 0.0 }
 0x291   : > { %2561 = vadd.xlane.f32.xlu2 %v2560_v49 }
 0x299   : > { %2438 = vadd.xlane.f32.xlu2 %v2437_v19 }
 0x2b6   : > { %v2559_v22 = vpop.xlane.xlu1 %2558 }
 0x2b7   : > { %v2563_v53 = vmax.f32 %v2559_v22, 1e-12 }
 0x2b9   : > { %v5264_v23 = vrot.slane %v2563_v53, 1  ;;  %v5266_v14 = vrot.slane %v2563_v53, 2  ;;  %3844 = vrcp.f32 %v2563_v53  ;;  %v5268_v57 = vrot.slane %v2563_v53, 3 }
 0x2ba   : > { %v2606_v26 = vand.u32 2147483647, %v2563_v53  ;;  %v2608_v20 = vand.u32 2147483648, %v2563_v53  ;;  %v5272_v4 = vrot.slane %v2563_v53, 4  ;;  %v5280_v25 = vrot.slane %v2563_v53, 5 }
 0x2bb   : > { %3846 = vrcp.f32 %v5264_v23  ;;  %v2621_v13 = vand.u32 2147483647, %v5264_v23  ;;  %v2623_v28 = vand.u32 2147483648, %v5264_v23  ;;  %v2636_v34 = vand.u32 2147483647, %v5266_v14 }
 0x2bc   : > { %3848 = vrcp.f32 %v5266_v14  ;;  %vm2602_vm5 = vweird.f32 %v2563_v53  ;;  %vm2617_vm2 = vweird.f32 %v5264_v23  ;;  %v2638_v9 = vand.u32 2147483648, %v5266_v14 }
 0x2bd   : > { %3850 = vrcp.f32 %v5268_v57  ;;  %vm5284_vm0 = vcmp.eq.f32.partialorder %v2606_v26, 8.507059e+37  ;;  %v2609_v48 = vor.u32 1.1754944e-38, %v2608_v20  ;;  %vm2632_vm7 = vweird.f32 %v5266_v14 }
 0x2be   : > { %v2653_v42 = vand.u32 2147483648, %v5268_v57  ;;  %3852 = vrcp.f32 %v5272_v4  ;;  %vm5292_vm15 = vcmp.eq.f32.partialorder %v2621_v13, 8.507059e+37  ;;  %v2624_v60 = vor.u32 1.1754944e-38, %v2623_v28 }
 0x2bf   : > { %v3845_v54 = vpop.eup %3844  ;;  %v2651_v63 = vand.u32 2147483647, %v5268_v57  ;;  %vm5298_vm8 = vcmp.eq.f32.partialorder %v2636_v34, 8.507059e+37  ;;  %vm2647_vm4 = vweird.f32 %v5268_v57  ;;  %v5303_v52 = vrot.slane %v2563_v53, 6 }
 0x2c0   : > { %v2598_v61 = vmul.f32 %v3845_v54, %v2563_v53  ;;  %3854 = vrcp.f32 %v5280_v25  ;;  %vm2603_vm6 = vweird.f32 %v3845_v54  ;;  %v2639_v29 = vor.u32 1.1754944e-38, %v2638_v9 }
 0x2c1   : > { %v3847_v18 = vpop.eup %3846  ;;  %v2654_v50 = vor.u32 1.1754944e-38, %v2653_v42  ;;  %v2666_v36 = vand.u32 2147483647, %v5272_v4  ;;  %vm5308_vm13 = vcmp.eq.f32.partialorder %v2651_v63, 8.507059e+37  ;;  %v2668_v44 = vand.u32 2147483648, %v5272_v4  ;;  %vm5316_vm1 = vmor %vm2602_vm5, %vm2603_vm6 }
 0x2c2   : > { %v3849_v38 = vpop.eup %3848  ;;  %v2599_v41 = vsub.f32 1.0, %v2598_v61  ;;  %v2613_v43 = vmul.f32 %v3847_v18, %v5264_v23  ;;  %vm2618_vm3 = vweird.f32 %v3847_v18  ;;  %3856 = vrcp.f32 %v5303_v52 }
 0x2c3   : > { %v2628_v3 = vmul.f32 %v3849_v38, %v5266_v14  ;;  %v3851_v12 = vpop.eup %3850  ;;  %vm2633_vm9 = vweird.f32 %v3849_v38  ;;  %v5323_v20 = vrot.slane %v2563_v53, 7  ;;  %vm2619_vm5 = vmor %vm2617_vm2, %vm2618_vm3  ;;  %vm2662_vm14 = vweird.f32 %v5272_v4 }
 0x2c4   : > { %v2600_v16 = vmul.f32 %v3845_v54, %v2599_v41  ;;  %v2614_v15 = vsub.f32 1.0, %v2613_v43  ;;  %v2643_v2 = vmul.f32 %v3851_v12, %v5268_v57  ;;  %v5313_v5 = vpop.eup %3852  ;;  %vm2648_vm6 = vweird.f32 %v3851_v12  ;;  %v5338_v43 = vpop.xlane.xlu0 %2435 }
 0x2c5   : > { %v2629_v59 = vsub.f32 1.0, %v2628_v3  ;;  %v2658_v13 = vmul.f32 %v5313_v5, %v5272_v4  ;;  %v2681_v9 = vand.u32 2147483647, %v5280_v25  ;;  %v2669_v41 = vor.u32 1.1754944e-38, %v2668_v44 }
 0x2c6   : > { %v2601_v1 = vadd.f32 %v3845_v54, %v2600_v16  ;;  %v2615_v37 = vmul.f32 %v3847_v18, %v2614_v15  ;;  %v2644_v19 = vsub.f32 1.0, %v2643_v2  ;;  %v5327_v28 = vpop.eup %3854  ;;  %vm5342_vm2 = vcmp.eq.f32.partialorder %v2666_v36, 8.507059e+37 }
 0x2c7   : > { %v2630_v49 = vmul.f32 %v3849_v38, %v2629_v59  ;;  %v2659_v42 = vsub.f32 1.0, %v2658_v13  ;;  %v2840_v11 = vrot.slane %v5338_v43, 2  ;;  %v2698_v13 = vand.u32 2147483648, %v5303_v52 }
 0x2c8   : > { %v2605_v22 = vsel %vm5316_vm1, %v3845_v54, %v2601_v1  ;;  %v2616_v26 = vadd.f32 %v3847_v18, %v2615_v37  ;;  %v2645_v61 = vmul.f32 %v3851_v12, %v2644_v19  ;;  %vm2634_vm1 = vmor %vm2632_vm7, %vm2633_vm9  ;;  %v3857_v45 = vpop.eup %3856  ;;  %vm5358_vm7 = vcmp.eq.f32.partialorder %v2681_v9, 8.507059e+37 }
 0x2c9   : > { %v2631_v34 = vadd.f32 %v3849_v38, %v2630_v49  ;;  %v2610_v54 = vsel %vm5284_vm0, %v2609_v48, %v2605_v22  ;;  %vm2649_vm9 = vmor %vm2647_vm4, %vm2648_vm6  ;;  %v2839_v48 = vrot.slane %v5338_v43, 1  ;;  %vm2677_vm0 = vweird.f32 %v5280_v25 }
 0x2ca   : > { %v2620_v53 = vsel %vm2619_vm5, %v3847_v18, %v2616_v26  ;;  %v2646_v3 = vadd.f32 %v3851_v12, %v2645_v61  ;;  %v2673_v18 = vmul.f32 %v5327_v28, %v5280_v25  ;;  %v2660_v2 = vmul.f32 %v5313_v5, %v2659_v42 }
 0x2cb   : > { %v2625_v23 = vsel %vm5292_vm15, %v2624_v60, %v2620_v53  ;;  %v2635_v63 = vsel %vm2634_vm1, %v3849_v38, %v2631_v34  ;;  %v2683_v38 = vand.u32 2147483648, %v5280_v25  ;;  %v2611_v60 = vmul.f32 %v2610_v54, %v4839_v58 }
 0x2cc   : > { %v2626_v17 = vmul.f32 %v2625_v23, %v4843_v39  ;;  %v2640_v14 = vsel %vm5298_vm8, %v2639_v29, %v2635_v63  ;;  %v2650_v15 = vsel %vm2649_vm9, %v3851_v12, %v2646_v3  ;;  %vm2692_vm15 = vweird.f32 %v5303_v52 }
 0x2cd   : > { %v2641_v39 = vmul.f32 %v2640_v14, %v4848_v47  ;;  %v2655_v29 = vsel %vm5308_vm13, %v2654_v50, %v2650_v15  ;;  %vm2663_vm8 = vweird.f32 %v5313_v5  ;;  %v2674_v58 = vsub.f32 1.0, %v2673_v18 }
 0x2ce   : > { %v2870_v57 = vmul.f32 %v2839_v48, %v2626_v17  ;;  %v2841_v12 = vrot.slane %v5338_v43, 3  ;;  %vm2678_vm4 = vweird.f32 %v5327_v28  ;;  %v2684_v36 = vor.u32 1.1754944e-38, %v2683_v38  ;;  %vm2664_vm3 = vmor %vm2662_vm14, %vm2663_vm8 }
 0x2cf   : > { %v2688_v47 = vmul.f32 %v3857_v45, %v5303_v52  ;;  %v2842_v1 = vrot.slane %v5338_v43, 4  ;;  %v2869_v37 = vmul.f32 %v2611_v60, %v5338_v43  ;;  %v2661_v44 = vadd.f32 %v5313_v5, %v2660_v2  ;;  %vm2679_vm13 = vmor %vm2677_vm0, %vm2678_vm4 }
 0x2d0   : > { %v2675_v50 = vmul.f32 %v5327_v28, %v2674_v58  ;;  %v2656_v55 = vmul.f32 %v2655_v29, %v4864_v62  ;;  %v2871_v10 = vmul.f32 %v2840_v11, %v2641_v39  ;;  %v2918_v49 = vadd.f32 %v2887_v24, %v2870_v57 }
 0x2d1   : > { %v2689_v19 = vsub.f32 1.0, %v2688_v47  ;;  %v2665_v22 = vsel %vm2664_vm3, %v5313_v5, %v2661_v44  ;;  %3858 = vrcp.f32 %v5323_v20  ;;  %vm2693_vm5 = vweird.f32 %v3857_v45 }
 0x2d2   : > { %v2676_v26 = vadd.f32 %v5327_v28, %v2675_v50  ;;  %v2670_v34 = vsel %vm5342_vm2, %v2669_v41, %v2665_v22  ;;  %v2696_v4 = vand.u32 2147483647, %v5303_v52  ;;  %v2843_v24 = vrot.slane %v5338_v43, 5  ;;  %vm2694_vm14 = vmor %vm2692_vm15, %vm2693_vm5 }
 0x2d3   : > { %v2690_v62 = vmul.f32 %v3857_v45, %v2689_v19  ;;  %v2917_v5 = vadd.f32 %v4690_v0, %v2869_v37  ;;  %v2671_v61 = vmul.f32 %v2670_v34, %v4969_v40  ;;  %v2872_v54 = vmul.f32 %v2841_v12, %v2656_v55 }
 0x2d4   : > { %v2680_v9 = vsel %vm2679_vm13, %v5327_v28, %v2676_v26  ;;  %v2919_v53 = vadd.f32 %v2888_v32, %v2871_v10  ;;  %v5400_v41 = vadd.f32 1e-06, %v2918_v49  ;;  %v2699_v63 = vor.u32 1.1754944e-38, %v2698_v13 }
 0x2d5   : > { %v2685_v25 = vsel %vm5358_vm7, %v2684_v36, %v2680_v9  ;;  %v2691_v42 = vadd.f32 %v3857_v45, %v2690_v62  ;;  %v2873_v3 = vmul.f32 %v2842_v1, %v2671_v61  ;;  %vm2697_vm6 = vcmp.eq.f32.partialorder %v2696_v4, 8.507059e+37 }
 0x2d6   : > { %v2686_v23 = vmul.f32 %v2685_v25, %v4975_v56  ;;  %v2889_v28 = vrot.slane %v4690_v0, 3  ;;  %v2890_v16 = vrot.slane %v4690_v0, 4  ;;  %v2844_v17 = vrot.slane %v5338_v43, 6 }
 0x2d7   : > { %v2695_v40 = vsel %vm2694_vm14, %v3857_v45, %v2691_v42  ;;  %v3859_v32 = vpop.eup %3858  ;;  %v2891_v52 = vrot.slane %v4690_v0, 5  ;;  %v5411_v38 = vadd.f32 1e-06, %v2917_v5  ;;  %v5413_v15 = vadd.f32 1e-06, %v2919_v53 }
 0x2d8   : > { %v2700_v18 = vsel %vm2697_vm6, %v2699_v63, %v2695_v40  ;;  %v2703_v48 = vmul.f32 %v3859_v32, %v5323_v20  ;;  %v2874_v56 = vmul.f32 %v2843_v24, %v2686_v23  ;;  %v2920_v60 = vadd.f32 %v2889_v28, %v2872_v54 }
 0x2d9   : > { %v2701_v14 = vmul.f32 %v2700_v18, %v4977_v21  ;;  %v2921_v45 = vadd.f32 %v2890_v16, %v2873_v3  ;;  %v2711_v39 = vand.u32 2147483647, %v5323_v20  ;;  %v2713_v11 = vand.u32 2147483648, %v5323_v20 }
 0x2da   : > { %v2704_v59 = vsub.f32 1.0, %v2703_v48  ;;  %v2965_v57 = vrot.slane %v5400_v41, 7  ;;  %vm2708_vm1 = vweird.f32 %v3859_v32  ;;  %v2892_v29 = vrot.slane %v4690_v0, 6 }
 0x2db   : > { %v2875_v21 = vmul.f32 %v2844_v17, %v2701_v14  ;;  %v5419_v2 = vadd.f32 1e-06, %v2920_v60  ;;  %v2922_v12 = vadd.f32 %v2891_v52, %v2874_v56  ;;  %v2967_v47 = vrot.slane %v5413_v15, 6 }
 0x2dc   : > { %v2705_v58 = vmul.f32 %v3859_v32, %v2704_v59  ;;  %v2966_v36 = vsel %vm2521_vm10, %v2965_v57, %v5411_v38  ;;  %v5424_v1 = vadd.f32 1e-06, %v2921_v45  ;;  %vm2707_vm2 = vweird.f32 %v5323_v20 }
 0x2dd   : > { %v2968_v44 = vsel %vm2524_vm11, %v2967_v47, %v2966_v36  ;;  %v2969_v50 = vrot.slane %v5419_v2, 5  ;;  %vm2709_vm9 = vmor %vm2707_vm2, %vm2708_vm1  ;;  %vm2712_vm0 = vcmp.eq.f32.partialorder %v2711_v39, 8.507059e+37  ;;  %v2714_v55 = vor.u32 1.1754944e-38, %v2713_v11 }
 0x2de   : > { %v2706_v37 = vadd.f32 %v3859_v32, %v2705_v58  ;;  %v2923_v10 = vadd.f32 %v2892_v29, %v2875_v21  ;;  %v2845_v19 = vrot.slane %v5338_v43, 7  ;;  %v5430_v22 = vadd.f32 1e-06, %v2922_v12 }
 0x2df   : > { %v2970_v26 = vsel %vm5997_vm12, %v2969_v50, %v2968_v44  ;;  %v2971_v34 = vrot.slane %v5424_v1, 4  ;;  %v2893_v62 = vrot.slane %v4690_v0, 7  ;;  %vm6072_vm7 = vcmask 1044484  }
 0x2e0   : > { %v2710_v49 = vsel %vm2709_vm9, %v3859_v32, %v2706_v37  ;;  %v5436_v4 = vadd.f32 1e-06, %v2923_v10  ;;  %v2973_v61 = vrot.slane %v5430_v22, 3  ;;  %vm6073_vm15 = vcmask 1045509  }
 0x2e1   : > { %v2715_v13 = vsel %vm2712_vm0, %v2714_v55, %v2710_v49  ;;  %v2972_v24 = vsel %vm6072_vm7, %v2971_v34, %v2970_v26  ;;  %vm6074_vm8 = vcmask 1046534   ;;  %vm6075_vm4 = vcmask 1047559  }
 0x2e2   : > { %v2716_v20 = vmul.f32 %v2715_v13, %v4982_v8  ;;  %v2974_v43 = vsel %vm6073_vm15, %v2973_v61, %v2972_v24  ;;  %v2975_v54 = vrot.slane %v5436_v4, 2  ;;  %vm6076_vm3 = vcmask 130048  }
 0x2e4   : > { %v2876_v5 = vmul.f32 %v2845_v19, %v2716_v20  ;;  %v2976_v25 = vsel %vm6074_vm8, %v2975_v54, %v2974_v43 }
 0x2e6   : > { %v2924_v9 = vadd.f32 %v2893_v62, %v2876_v5 }
 0x2e8   : > { %v5442_v53 = vadd.f32 1e-06, %v2924_v9 }
 0x2ea   : > { %v2977_v8 = vrot.slane %v5442_v53, 1 }
 0x2ec   : > { %v2978_v0 = vsel %vm6075_vm4, %v2977_v8, %v2976_v25 }
 0x2ed   : > { %v2995_v42 = vsel %vm6076_vm3, %v2978_v0, 0.0 }
 0x2ee   : > { %2996 = vadd.xlane.f32.xlu1 %v2995_v42 }
 0x304   : > { %v2562_v23 = vpop.xlane.xlu2 %2561 }
 0x305   : > { %v2564_v63 = vmax.f32 %v2562_v23, 1e-12 }
 0x307   : > { %v5448_v3 = vrot.slane %v2564_v63, 1  ;;  %3860 = vrcp.f32 %v2564_v63  ;;  %v5450_v40 = vrot.slane %v2564_v63, 2  ;;  %v5452_v28 = vrot.slane %v2564_v63, 3 }
 0x308   : > { %v2728_v16 = vand.u32 2147483648, %v2564_v63  ;;  %v2726_v32 = vand.u32 2147483647, %v2564_v63  ;;  %v5456_v17 = vrot.slane %v2564_v63, 4  ;;  %vm2722_vm13 = vweird.f32 %v2564_v63 }
 0x309   : > { %3862 = vrcp.f32 %v5448_v3  ;;  %v2743_v18 = vand.u32 2147483648, %v5448_v3  ;;  %v2741_v14 = vand.u32 2147483647, %v5448_v3  ;;  %v5463_v60 = vrot.slane %v2564_v63, 5 }
 0x30a   : > { %3864 = vrcp.f32 %v5450_v40  ;;  %v2729_v52 = vor.u32 1.1754944e-38, %v2728_v16  ;;  %vm5465_vm5 = vcmp.eq.f32.partialorder %v2726_v32, 8.507059e+37  ;;  %vm2737_vm14 = vweird.f32 %v5448_v3 }
 0x30b   : > { %3866 = vrcp.f32 %v5452_v28  ;;  %v2744_v39 = vor.u32 1.1754944e-38, %v2743_v18  ;;  %v5470_v11 = vrot.slane %v2564_v63, 6  ;;  %v5472_v57 = vrot.slane %v2564_v63, 7 }
 0x30c   : > { %v5460_v48 = vpop.xlane.xlu2 %2438  ;;  %v2756_v58 = vand.u32 2147483647, %v5450_v40  ;;  %v2758_v12 = vand.u32 2147483648, %v5450_v40  ;;  %3868 = vrcp.f32 %v5456_v17  ;;  %vm5479_vm6 = vcmp.eq.f32.partialorder %v2741_v14, 8.507059e+37 }
 0x30d   : > { %v3861_v56 = vpop.eup %3860  ;;  %v2846_v29 = vrot.slane %v5460_v48, 1  ;;  %vm2752_vm1 = vweird.f32 %v5450_v40  ;;  %v2771_v44 = vand.u32 2147483647, %v5452_v28  ;;  %v2773_v50 = vand.u32 2147483648, %v5452_v28 }
 0x30e   : > { %v2718_v45 = vmul.f32 %v3861_v56, %v2564_v63  ;;  %v2847_v10 = vrot.slane %v5460_v48, 2  ;;  %v2848_v49 = vrot.slane %v5460_v48, 3  ;;  %vm2767_vm2 = vweird.f32 %v5452_v28 }
 0x30f   : > { %v3863_v21 = vpop.eup %3862  ;;  %3870 = vrcp.f32 %v5463_v60  ;;  %vm2723_vm9 = vweird.f32 %v3861_v56  ;;  %v2759_v20 = vor.u32 1.1754944e-38, %v2758_v12  ;;  %v2786_v24 = vand.u32 2147483647, %v5456_v17 }
 0x310   : > { %v2719_v36 = vsub.f32 1.0, %v2718_v45  ;;  %v2733_v47 = vmul.f32 %v3863_v21, %v5448_v3  ;;  %v3865_v55 = vpop.eup %3864  ;;  %vm2738_vm0 = vweird.f32 %v3863_v21  ;;  %vm5493_vm7 = vcmp.eq.f32.partialorder %v2756_v58, 8.507059e+37  ;;  %vm2724_vm4 = vmor %vm2722_vm13, %vm2723_vm9 }
 0x311   : > { %v3867_v19 = vpop.eup %3866  ;;  %v2748_v34 = vmul.f32 %v3865_v55, %v5450_v40  ;;  %vm5497_vm15 = vcmp.eq.f32.partialorder %v2771_v44, 8.507059e+37  ;;  %v2774_v25 = vor.u32 1.1754944e-38, %v2773_v50  ;;  %vm2782_vm8 = vweird.f32 %v5456_v17  ;;  %vm2739_vm12 = vmor %vm2737_vm14, %vm2738_vm0 }
 0x312   : > { %v2720_v26 = vmul.f32 %v3861_v56, %v2719_v36  ;;  %v2734_v13 = vsub.f32 1.0, %v2733_v47  ;;  %v2763_v62 = vmul.f32 %v3867_v19, %v5452_v28  ;;  %v3869_v8 = vpop.eup %3868  ;;  %vm2753_vm3 = vweird.f32 %v3865_v55 }
 0x313   : > { %v2749_v9 = vsub.f32 1.0, %v2748_v34  ;;  %v2788_v42 = vand.u32 2147483648, %v5456_v17  ;;  %3872 = vrcp.f32 %v5470_v11  ;;  %v2778_v18 = vmul.f32 %v3869_v8, %v5456_v17 }
 0x314   : > { %v2721_v5 = vadd.f32 %v3861_v56, %v2720_v26  ;;  %v2735_v61 = vmul.f32 %v3863_v21, %v2734_v13  ;;  %v2764_v0 = vsub.f32 1.0, %v2763_v62  ;;  %vm2768_vm13 = vweird.f32 %v3867_v19 }
 0x315   : > { %v2750_v32 = vmul.f32 %v3865_v55, %v2749_v9  ;;  %v3871_v14 = vpop.eup %3870  ;;  %vm5512_vm9 = vcmp.eq.f32.partialorder %v2786_v24, 8.507059e+37  ;;  %v2779_v36 = vsub.f32 1.0, %v2778_v18  ;;  %v2801_v47 = vand.u32 2147483647, %v5463_v60 }
 0x316   : > { %v2725_v23 = vsel %vm2724_vm4, %v3861_v56, %v2721_v5  ;;  %v2736_v16 = vadd.f32 %v3863_v21, %v2735_v61  ;;  %v2765_v63 = vmul.f32 %v3867_v19, %v2764_v0  ;;  %v2789_v59 = vor.u32 1.1754944e-38, %v2788_v42 }
 0x317   : > { %v2730_v45 = vsel %vm5465_vm5, %v2729_v52, %v2725_v23  ;;  %v2751_v56 = vadd.f32 %v3865_v55, %v2750_v32  ;;  %vm5522_vm5 = vmor %vm2752_vm1, %vm2753_vm3  ;;  %v2793_v50 = vmul.f32 %v3871_v14, %v5463_v60  ;;  %vm2783_vm14 = vweird.f32 %v3869_v8 }
 0x318   : > { %v2740_v12 = vsel %vm2739_vm12, %v3863_v21, %v2736_v16  ;;  %v2766_v52 = vadd.f32 %v3867_v19, %v2765_v63  ;;  %v2731_v21 = vmul.f32 %v2730_v45, %v5238_v31  ;;  %vm2769_vm12 = vmor %vm2767_vm2, %vm2768_vm13  ;;  %v2803_v34 = vand.u32 2147483648, %v5463_v60 }
 0x319   : > { %v2745_v44 = vsel %vm5479_vm6, %v2744_v39, %v2740_v12  ;;  %v2755_v26 = vsel %vm5522_vm5, %v3865_v55, %v2751_v56  ;;  %v2780_v39 = vmul.f32 %v3869_v8, %v2779_v36  ;;  %v3873_v37 = vpop.eup %3872  ;;  %v2794_v13 = vsub.f32 1.0, %v2793_v50  ;;  %vm2784_vm2 = vmor %vm2782_vm8, %vm2783_vm14 }
 0x31a   : > { %v2770_v40 = vsel %vm2769_vm12, %v3867_v19, %v2766_v52  ;;  %vm2797_vm6 = vweird.f32 %v5463_v60  ;;  %v2746_v62 = vmul.f32 %v2745_v44, %v5217_v30  ;;  %vm2798_vm1 = vweird.f32 %v3871_v14 }
 0x31b   : > { %v2781_v24 = vadd.f32 %v3869_v8, %v2780_v39  ;;  %vm5535_vm0 = vcmp.eq.f32.partialorder %v2801_v47, 8.507059e+37  ;;  %v2760_v28 = vsel %vm5493_vm7, %v2759_v20, %v2755_v26  ;;  %v2775_v55 = vsel %vm5497_vm15, %v2774_v25, %v2770_v40  ;;  %vm2799_vm7 = vmor %vm2797_vm6, %vm2798_vm1 }
 0x31c   : > { %v2795_v19 = vmul.f32 %v3871_v14, %v2794_v13  ;;  %v2808_v5 = vmul.f32 %v3873_v37, %v5470_v11  ;;  %v2877_v30 = vmul.f32 %v2731_v21, %v5460_v48  ;;  %v2816_v9 = vand.u32 2147483647, %v5470_v11 }
 0x31d   : > { %v2785_v61 = vsel %vm2784_vm2, %v3869_v8, %v2781_v24  ;;  %v2818_v0 = vand.u32 2147483648, %v5470_v11  ;;  %3874 = vrcp.f32 %v5472_v57  ;;  %v2878_v17 = vmul.f32 %v2846_v29, %v2746_v62 }
 0x31e   : > { %v2790_v43 = vsel %vm5512_vm9, %v2789_v59, %v2785_v61  ;;  %v2796_v20 = vadd.f32 %v3871_v14, %v2795_v19  ;;  %v2809_v42 = vsub.f32 1.0, %v2808_v5  ;;  %v2761_v54 = vmul.f32 %v2760_v28, %v5223_v7 }
 0x31f   : > { %v2776_v25 = vmul.f32 %v2775_v55, %v5229_v35  ;;  %v2804_v8 = vor.u32 1.1754944e-38, %v2803_v34  ;;  %v2791_v23 = vmul.f32 %v2790_v43, %v5231_v27  ;;  %vm2813_vm15 = vweird.f32 %v3873_v37 }
 0x320   : > { %v2800_v16 = vsel %vm2799_vm7, %v3871_v14, %v2796_v20  ;;  %v2810_v32 = vmul.f32 %v3873_v37, %v2809_v42  ;;  %vm2812_vm8 = vweird.f32 %v5470_v11  ;;  %v2849_v29 = vrot.slane %v5460_v48, 4 }
 0x321   : > { %v2805_v18 = vsel %vm5535_vm0, %v2804_v8, %v2800_v16  ;;  %v2850_v7 = vrot.slane %v5460_v48, 5  ;;  %vm2817_vm4 = vcmp.eq.f32.partialorder %v2816_v9, 8.507059e+37  ;;  %v2819_v60 = vor.u32 1.1754944e-38, %v2818_v0  ;;  %vm2814_vm3 = vmor %vm2812_vm8, %vm2813_vm15 }
 0x322   : > { %v2806_v35 = vmul.f32 %v2805_v18, %v5233_v51  ;;  %v2811_v45 = vadd.f32 %v3873_v37, %v2810_v32  ;;  %v2831_v27 = vand.u32 2147483647, %v5472_v57  ;;  %v2851_v14 = vrot.slane %v5460_v48, 6 }
 0x323   : > { %v2879_v63 = vmul.f32 %v2847_v10, %v2761_v54  ;;  %v2880_v11 = vmul.f32 %v2848_v49, %v2776_v25  ;;  %v3875_v58 = vpop.eup %3874  ;;  %v2881_v56 = vmul.f32 %v2849_v29, %v2791_v23  ;;  %v2894_v36 = vrot.slane %v4159_v6, 1 }
 0x324   : > { %v2815_v12 = vsel %vm2814_vm3, %v3873_v37, %v2811_v45  ;;  %v2895_v51 = vrot.slane %v4159_v6, 2  ;;  %v2823_v44 = vmul.f32 %v3875_v58, %v5472_v57  ;;  %v2882_v3 = vmul.f32 %v2850_v7, %v2806_v35 }
 0x325   : > { %v2820_v47 = vsel %vm2817_vm4, %v2819_v60, %v2815_v12  ;;  %v2896_v52 = vrot.slane %v4159_v6, 3  ;;  %v2833_v10 = vand.u32 2147483648, %v5472_v57  ;;  %v2897_v50 = vrot.slane %v4159_v6, 4 }
 0x326   : > { %v2821_v59 = vmul.f32 %v2820_v47, %v5240_v46  ;;  %v2898_v49 = vrot.slane %v4159_v6, 5  ;;  %v2824_v21 = vsub.f32 1.0, %v2823_v44  ;;  %v2899_v26 = vrot.slane %v4159_v6, 6 }
 0x327   : > { %v2925_v39 = vadd.f32 %v4159_v6, %v2877_v30  ;;  %v2926_v37 = vadd.f32 %v2894_v36, %v2878_v17  ;;  %v2927_v13 = vadd.f32 %v2895_v51, %v2879_v63  ;;  %v2928_v34 = vadd.f32 %v2896_v52, %v2880_v11 }
 0x328   : > { %v2883_v40 = vmul.f32 %v2851_v14, %v2821_v59  ;;  %v2929_v62 = vadd.f32 %v2897_v50, %v2881_v56  ;;  %v2825_v24 = vmul.f32 %v3875_v58, %v2824_v21  ;;  %vm2828_vm13 = vweird.f32 %v3875_v58 }
 0x329   : > { %v2930_v31 = vadd.f32 %v2898_v49, %v2882_v3  ;;  %v5582_v46 = vadd.f32 1e-06, %v2926_v37  ;;  %vm2827_vm9 = vweird.f32 %v5472_v57  ;;  %v5585_v28 = vadd.f32 1e-06, %v2927_v13 }
 0x32a   : > { %v5587_v55 = vadd.f32 1e-06, %v2928_v34  ;;  %v5589_v19 = vadd.f32 1e-06, %v2929_v62  ;;  %v2826_v5 = vadd.f32 %v3875_v58, %v2825_v24  ;;  %vm2832_vm5 = vcmp.eq.f32.partialorder %v2831_v27, 8.507059e+37  ;;  %vm2829_vm12 = vmor %vm2827_vm9, %vm2828_vm13 }
 0x32b   : > { %v5591_v30 = vadd.f32 1e-06, %v2925_v39  ;;  %v2979_v61 = vrot.slane %v5582_v46, 7  ;;  %v2834_v9 = vor.u32 1.1754944e-38, %v2833_v10  ;;  %v2852_v0 = vrot.slane %v5460_v48, 7 }
 0x32c   : > { %v2931_v43 = vadd.f32 %v2899_v26, %v2883_v40  ;;  %v2981_v20 = vrot.slane %v5585_v28, 6  ;;  %v2830_v57 = vsel %vm2829_vm12, %v3875_v58, %v2826_v5  ;;  %v5596_v42 = vadd.f32 1e-06, %v2930_v31 }
 0x32d   : > { %v2980_v17 = vsel %vm2521_vm10, %v2979_v61, %v5591_v30  ;;  %v2983_v54 = vrot.slane %v5587_v55, 5  ;;  %v2835_v25 = vsel %vm2832_vm5, %v2834_v9, %v2830_v57  ;;  %v2985_v23 = vrot.slane %v5589_v19, 4 }
 0x32e   : > { %v2982_v8 = vsel %vm2524_vm11, %v2981_v20, %v2980_v17  ;;  %v2836_v16 = vmul.f32 %v2835_v25, %v5251_v33  ;;  %v2900_v48 = vrot.slane %v4159_v6, 7  ;;  %vm6091_vm14 = vcmask 1043459  }
 0x32f   : > { %v2984_v32 = vsel %vm6091_vm14, %v2983_v54, %v2982_v8  ;;  %v5606_v18 = vadd.f32 1e-06, %v2931_v43  ;;  %vm6092_vm6 = vcmask 1044484   ;;  %v2987_v35 = vrot.slane %v5596_v42, 3 }
 0x330   : > { %v2986_v29 = vsel %vm6092_vm6, %v2985_v23, %v2984_v32  ;;  %v2884_v7 = vmul.f32 %v2852_v0, %v2836_v16  ;;  %vm6093_vm1 = vcmask 1045509   ;;  %vm6094_vm0 = vcmask 1046534  }
 0x331   : > { %v2988_v60 = vsel %vm6093_vm1, %v2987_v35, %v2986_v29  ;;  %v2989_v27 = vrot.slane %v5606_v18, 2  ;;  %vm6095_vm2 = vcmask 1047559   ;;  %vm6096_vm7 = vcmask 130048  }
 0x332   : > { %v2932_v45 = vadd.f32 %v2900_v48, %v2884_v7 }
 0x333   : > { %v2990_v6 = vsel %vm6094_vm0, %v2989_v27, %v2988_v60 }
 0x334   : > { %v5612_v33 = vadd.f32 1e-06, %v2932_v45 }
 0x336   : > { %v2991_v14 = vrot.slane %v5612_v33, 1 }
 0x338   : > { %v2992_v63 = vsel %vm6095_vm2, %v2991_v14, %v2990_v6 }
 0x339   : > { %v2998_v11 = vsel %vm6096_vm7, %v2992_v63, 0.0 }
 0x33a   : > { %2999 = vadd.xlane.f32.xlu2 %v2998_v11 }
 0x361   : > { %v5625_v58 = vpop.xlane.xlu1 %2996 }
 0x362   : > { %v5628_v12 = vrot.slane %v5625_v58, 1  ;;  %v5631_v56 = vrot.slane %v5625_v58, 2  ;;  %v5634_v36 = vrot.slane %v5625_v58, 3 }
 0x363   : > { %3935 = shalt.err (!%p3932_p5)
}
 0x364   : > { %s4022_s0 = smov 128   ;;  %s4023_s1 = smov 8   ;;  %v5651_v51 = vrot.slane %v5625_v58, 4  ;;  %3876 = vrcp.f32 %v5625_v58  ;;  %v5655_v47 = vrot.slane %v5625_v58, 5  ;;  %v3044_v44 = vand.u32 2147483648, %v5625_v58 }
 0x365   : > { %3711 = dma.vmem_to_hbm [thread:$0]  (%p4122_p4), %s3409_s28, 256, %s3411_s8, %s3375_s13, %s4022_s0, %s4022_s0, %s4023_s1   ;;  %3878 = vrcp.f32 %v5628_v12  ;;  %v3057_v3 = vand.u32 2147483647, %v5628_v12  ;;  %v3059_v52 = vand.u32 2147483648, %v5628_v12  ;;  %v5668_v10 = vrot.slane %v5625_v58, 6 }
 0x366   : > { %3880 = vrcp.f32 %v5631_v56  ;;  %vm3038_vm15 = vweird.f32 %v5625_v58  ;;  %v3042_v50 = vand.u32 2147483647, %v5625_v58  ;;  %v5673_v49 = vrot.slane %v5625_v58, 7  ;;  %s6112_s12 = sshll.u32 %s4500_s11, 4  ;;  %s6126_s29 = sshll.u32 %s4010_s18, 4 }
 0x367   : > { %3882 = vrcp.f32 %v5634_v36  ;;  %v3045_v39 = vor.u32 1.1754944e-38, %v3044_v44  ;;  %vm3053_vm8 = vweird.f32 %v5628_v12  ;;  %vm3068_vm4 = vweird.f32 %v5631_v56  ;;  %s5791_s28 = scalar_lea.vmem [#allocation3], %s6112_s12  ;;  %s3388_s21 = scalar_lea.hbm %s5990_s9, %s6126_s29 }
 0x368   : > { %3884 = vrcp.f32 %v5651_v51  ;;  %vm5680_vm3 = vcmp.eq.f32.partialorder %v3057_v3, 8.507059e+37  ;;  %v3060_v34 = vor.u32 1.1754944e-38, %v3059_v52  ;;  %v3072_v62 = vand.u32 2147483647, %v5631_v56  ;;  %s3389_s23 = sshll.u32 %s5791_s28, 4  ;;  %s3391_s25 = sshll.u32 %s3388_s21, 4  ;;  %s3390_s23 = int_to_ptr.vmem [resolvable:$true] %s3389_s23  ;;  %s3392_s25 = int_to_ptr.hbm [resolvable:$true] %s3391_s25 }
 0x369   : > { %3886 = vrcp.f32 %v5655_v47  ;;  %v3074_v61 = vand.u32 2147483648, %v5631_v56  ;;  %vm3083_vm13 = vweird.f32 %v5634_v36  ;;  %v3087_v20 = vand.u32 2147483647, %v5634_v36  ;;  %s3370_s18 = scalar_lea.sflag [#allocation4], %s4500_s11  ;;  %s3950_s30 = sshra.s32 %s3392_s25, 4  ;;  %s3951_s30 = int_to_ptr.hbm [resolvable:$true] %s3950_s30 }
 0x36a   : > { %v5665_v59 = vpop.eup %3876  ;;  %3888 = vrcp.f32 %v5668_v10  ;;  %v3089_v14 = vand.u32 2147483648, %v5634_v36  ;;  %s3952_s14 = scalar_lea.hbm %s3951_s30, 16  ;;  %s3956_s8 = scalar_lea.hbm %s5990_s9, 32 }
 0x36b   : > { %v3879_v21 = vpop.eup %3878  ;;  %v3034_v26 = vmul.f32 %v5665_v59, %v5625_v58  ;;  %vm3039_vm9 = vweird.f32 %v5665_v59  ;;  %v3075_v6 = vor.u32 1.1754944e-38, %v3074_v61  ;;  %v3119_v61 = vand.u32 2147483648, %v5655_v47  ;;  %p3953_p6 = scmp.ne.s32.totalorder %s3951_s30, %s3952_s14  ;;  %p3957_p10 = scmp.lt.s32.totalorder %s3951_s30, %s5990_s9 }
 0x36c   : > { %v3881_v37 = vpop.eup %3880  ;;  %v3049_v40 = vmul.f32 %v3879_v21, %v5628_v12  ;;  %vm3054_vm5 = vweird.f32 %v3879_v21  ;;  %vm5704_vm14 = vmor %vm3038_vm15, %vm3039_vm9  ;;  %vm3043_vm15 = vcmp.eq.f32.partialorder %v3042_v50, 8.507059e+37  ;;  %3890 = vrcp.f32 %v5673_v49  ;;  %p3958_p11 = scmp.lt.s32.totalorder %s3956_s8, %s3952_s14 }
 0x36d   : > { %v3883_v24 = vpop.eup %3882  ;;  %v3035_v31 = vsub.f32 1.0, %v3034_v26  ;;  %v3064_v5 = vmul.f32 %v3881_v37, %v5631_v56  ;;  %vm3069_vm12 = vweird.f32 %v3881_v37  ;;  %vm3055_vm1 = vmor %vm3053_vm8, %vm3054_vm5  ;;  %vm3073_vm8 = vcmp.eq.f32.partialorder %v3072_v62, 8.507059e+37  ;;  %p3954_p7 = pnand %p3953_p6, %p4122_p4 }
 0x36e   : > { %v5688_v9 = vpop.eup %3884  ;;  %v3050_v0 = vsub.f32 1.0, %v3049_v40  ;;  %v3079_v43 = vmul.f32 %v3883_v24, %v5634_v36  ;;  %vm3084_vm6 = vweird.f32 %v3883_v24  ;;  %vm3070_vm0 = vmor %vm3068_vm4, %vm3069_vm12  ;;  %v3104_v40 = vand.u32 2147483648, %v5651_v51  ;;  %p3959_p12 = por %p3958_p11, %p3957_p10 }
 0x36f   : > { %v5693_v57 = vpop.eup %3886  ;;  %v3036_v17 = vmul.f32 %v5665_v59, %v3035_v31  ;;  %v3065_v54 = vsub.f32 1.0, %v3064_v5  ;;  %v3094_v25 = vmul.f32 %v5688_v9, %v5651_v51  ;;  %vm3099_vm2 = vweird.f32 %v5688_v9  ;;  %vm5726_vm7 = vmor %vm3083_vm13, %vm3084_vm6  ;;  %p3955_p9 = pneg %p3954_p7 }
 0x370   : > { %v3051_v8 = vmul.f32 %v3879_v21, %v3050_v0  ;;  %v3080_v23 = vsub.f32 1.0, %v3079_v43  ;;  %v3109_v16 = vmul.f32 %v5693_v57, %v5655_v47  ;;  %v5712_v11 = vpop.eup %3888  ;;  %vm3098_vm4 = vweird.f32 %v5651_v51 }
 0x371   : > { %v3037_v48 = vadd.f32 %v5665_v59, %v3036_v17  ;;  %v3066_v32 = vmul.f32 %v3881_v37, %v3065_v54  ;;  %v3095_v29 = vsub.f32 1.0, %v3094_v25  ;;  %v3102_v36 = vand.u32 2147483647, %v5651_v51  ;;  %vm5740_vm13 = vmor %vm3098_vm4, %vm3099_vm2  ;;  %p3960_p13 = pnand %p3959_p12, %p3955_p9 }
 0x372   : > { %v3052_v35 = vadd.f32 %v3879_v21, %v3051_v8  ;;  %v3081_v45 = vmul.f32 %v3883_v24, %v3080_v23  ;;  %v3110_v60 = vsub.f32 1.0, %v3109_v16  ;;  %vm3114_vm9 = vweird.f32 %v5693_v57 }
 0x373   : > { %v3067_v27 = vadd.f32 %v3881_v37, %v3066_v32  ;;  %v3096_v63 = vmul.f32 %v5688_v9, %v3095_v29  ;;  %v3041_v58 = vsel %vm5704_vm14, %v5665_v59, %v3037_v48  ;;  %v3124_v51 = vmul.f32 %v5712_v11, %v5668_v10  ;;  %v3891_v32 = vpop.eup %3890 }
 0x374   : > { %v3056_v44 = vsel %vm3055_vm1, %v3879_v21, %v3052_v35  ;;  %v3082_v3 = vadd.f32 %v3883_v24, %v3081_v45  ;;  %v3111_v21 = vmul.f32 %v5693_v57, %v3110_v60  ;;  %vm3103_vm5 = vcmp.eq.f32.partialorder %v3102_v36, 8.507059e+37 }
 0x375   : > { %v3061_v12 = vsel %vm5680_vm3, %v3060_v34, %v3056_v44  ;;  %v3071_v52 = vsel %vm3070_vm0, %v3881_v37, %v3067_v27  ;;  %v3097_v59 = vadd.f32 %v5688_v9, %v3096_v63  ;;  %v3090_v37 = vor.u32 1.1754944e-38, %v3089_v14 }
 0x376   : > { %v3086_v56 = vsel %vm5726_vm7, %v3883_v24, %v3082_v3  ;;  %v3076_v13 = vsel %vm3073_vm8, %v3075_v6, %v3071_v52  ;;  %v3046_v34 = vsel %vm3043_vm15, %v3045_v39, %v3041_v58  ;;  %v3062_v31 = vmul.f32 %v3061_v12, %v5400_v41 }
 0x377   : > { %vm3088_vm3 = vcmp.eq.f32.partialorder %v3087_v20, 8.507059e+37  ;;  %v3101_v24 = vsel %vm5740_vm13, %v5688_v9, %v3097_v59  ;;  %v3112_v5 = vadd.f32 %v5693_v57, %v3111_v21  ;;  %v3077_v41 = vmul.f32 %v3076_v13, %v5413_v15 }
 0x378   : > { %v3091_v62 = vsel %vm3088_vm3, %v3090_v37, %v3086_v56  ;;  %v3105_v39 = vor.u32 1.1754944e-38, %v3104_v40  ;;  %vm3113_vm12 = vweird.f32 %v5655_v47  ;;  %v3117_v0 = vand.u32 2147483647, %v5655_v47 }
 0x379   : > { %v3125_v43 = vsub.f32 1.0, %v3124_v51  ;;  %v3047_v9 = vmul.f32 %v3046_v34, %v5411_v38  ;;  %v3092_v20 = vmul.f32 %v3091_v62, %v5419_v2  ;;  %vm5760_vm14 = vmor %vm3113_vm12, %vm3114_vm9  ;;  %v3289_v54 = vrot.slane %v3062_v31, 7 }
 0x37a   : > { %v3106_v17 = vsel %vm3103_vm5, %v3105_v39, %v3101_v24  ;;  %v3116_v25 = vsel %vm5760_vm14, %v5693_v57, %v3112_v5  ;;  %vm3129_vm6 = vweird.f32 %v5712_v11  ;;  %v3134_v38 = vand.u32 2147483648, %v5668_v10 }
 0x37b   : > { %v3126_v8 = vmul.f32 %v5712_v11, %v3125_v43  ;;  %v3120_v47 = vor.u32 1.1754944e-38, %v3119_v61  ;;  %v3132_v2 = vand.u32 2147483647, %v5668_v10  ;;  %v3290_v23 = vsel %vm2521_vm10, %v3289_v54, %v3047_v9 }
 0x37c   : > { %v3291_v16 = vrot.slane %v3077_v41, 6  ;;  %vm3118_vm1 = vcmp.eq.f32.partialorder %v3117_v0, 8.507059e+37  ;;  %vm3128_vm0 = vweird.f32 %v5668_v10  ;;  %v3107_v57 = vmul.f32 %v3106_v17, %v5424_v1 }
 0x37d   : > { %v3127_v48 = vadd.f32 %v5712_v11, %v3126_v8  ;;  %v3121_v29 = vsel %vm3118_vm1, %v3120_v47, %v3116_v25  ;;  %vm3130_vm2 = vmor %vm3128_vm0, %vm3129_vm6  ;;  %v3135_v45 = vor.u32 1.1754944e-38, %v3134_v38  ;;  %v3139_v60 = vmul.f32 %v3891_v32, %v5673_v49 }
 0x37e   : > { %v3292_v7 = vsel %vm2524_vm11, %v3291_v16, %v3290_v23  ;;  %v3293_v27 = vrot.slane %v3092_v20, 5  ;;  %vm3133_vm7 = vcmp.eq.f32.partialorder %v3132_v2, 8.507059e+37  ;;  %v3122_v6 = vmul.f32 %v3121_v29, %v5430_v22 }
 0x37f   : > { %v3131_v35 = vsel %vm3130_vm2, %v5712_v11, %v3127_v48  ;;  %v3140_v63 = vsub.f32 1.0, %v3139_v60  ;;  %vm6107_vm15 = vcmask 1043459   ;;  %v3149_v58 = vand.u32 2147483648, %v5673_v49 }
 0x380   : > { %v3136_v14 = vsel %vm3133_vm7, %v3135_v45, %v3131_v35  ;;  %v3294_v10 = vsel %vm6107_vm15, %v3293_v27, %v3292_v7  ;;  %v3295_v1 = vrot.slane %v3107_v57, 4  ;;  %vm3144_vm8 = vweird.f32 %v3891_v32 }
 0x381   : > { %v3141_v44 = vmul.f32 %v3891_v32, %v3140_v63  ;;  %v3147_v3 = vand.u32 2147483647, %v5673_v49  ;;  %v3137_v11 = vmul.f32 %v3136_v14, %v5436_v4  ;;  %vm6108_vm4 = vcmask 1044484  }
 0x382   : > { %v3296_v12 = vsel %vm6108_vm4, %v3295_v1, %v3294_v10  ;;  %vm3143_vm3 = vweird.f32 %v5673_v49  ;;  %v3297_v22 = vrot.slane %v3122_v6, 3  ;;  %v3150_v26 = vor.u32 1.1754944e-38, %v3149_v58 }
 0x383   : > { %v3142_v52 = vadd.f32 %v3891_v32, %v3141_v44  ;;  %vm3145_vm13 = vmor %vm3143_vm3, %vm3144_vm8  ;;  %vm3148_vm9 = vcmp.eq.f32.partialorder %v3147_v3, 8.507059e+37  ;;  %vm6109_vm5 = vcmask 1045509   ;;  %v3299_v40 = vrot.slane %v3137_v11, 2 }
 0x384   : > { %v3298_v21 = vsel %vm6109_vm5, %v3297_v22, %v3296_v12  ;;  %vm6110_vm12 = vcmask 1046534   ;;  %vm6111_vm14 = vcmask 1047559   ;;  %vm6113_vm6 = vcmask 130048  }
 0x385   : > { %v3146_v59 = vsel %vm3145_vm13, %v3891_v32, %v3142_v52  ;;  %v3300_v37 = vsel %vm6110_vm12, %v3299_v40, %v3298_v21 }
 0x386   : > { %v3151_v56 = vsel %vm3148_vm9, %v3150_v26, %v3146_v59 }
 0x387   : > { %v3152_v13 = vmul.f32 %v3151_v56, %v5442_v53 }
 0x389   : > { %v3301_v4 = vrot.slane %v3152_v13, 1 }
 0x38b   : > { %v3302_v36 = vsel %vm6111_vm14, %v3301_v4, %v3300_v37 }
 0x38c   : > { %3319 = vst.msk [vmem:[%s5791_s28] sm:$0xff] %vm6113_vm6, %v3302_v36 }
 0x3ad   : > { %v5795_v49 = vpop.xlane.xlu2 %2999 }
 0x3ae   : > { %v3010_v34 = vrot.slane %v5795_v49, 1  ;;  %v5799_v31 = vrot.slane %v5795_v49, 2  ;;  %v5802_v53 = vrot.slane %v5795_v49, 3  ;;  %v5805_v50 = vrot.slane %v5795_v49, 4 }
 0x3af   : > { %3892 = vrcp.f32 %v5795_v49  ;;  %v5809_v62 = vrot.slane %v5795_v49, 5  ;;  %v3164_v24 = vand.u32 2147483648, %v5795_v49  ;;  %v5819_v39 = vrot.slane %v5795_v49, 6 }
 0x3b0   : > { %3894 = vrcp.f32 %v3010_v34  ;;  %v3177_v5 = vand.u32 2147483647, %v3010_v34  ;;  %v3179_v51 = vand.u32 2147483648, %v3010_v34  ;;  %vm3158_vm1 = vweird.f32 %v5795_v49 }
 0x3b1   : > { %3896 = vrcp.f32 %v5799_v31  ;;  %v3162_v61 = vand.u32 2147483647, %v5795_v49  ;;  %v5824_v0 = vrot.slane %v5795_v49, 7  ;;  %v3165_v20 = vor.u32 1.1754944e-38, %v3164_v24 }
 0x3b2   : > { %3898 = vrcp.f32 %v5802_v53  ;;  %vm3173_vm0 = vweird.f32 %v3010_v34  ;;  %vm3188_vm2 = vweird.f32 %v5799_v31  ;;  %vm5829_vm7 = vcmp.eq.f32.partialorder %v3177_v5, 8.507059e+37 }
 0x3b3   : > { %3900 = vrcp.f32 %v5805_v50  ;;  %v3180_v25 = vor.u32 1.1754944e-38, %v3179_v51  ;;  %v3192_v8 = vand.u32 2147483647, %v5799_v31  ;;  %v3194_v23 = vand.u32 2147483648, %v5799_v31 }
 0x3b4   : > { %3902 = vrcp.f32 %v5809_v62  ;;  %vm3203_vm15 = vweird.f32 %v5802_v53  ;;  %v3207_v57 = vand.u32 2147483647, %v5802_v53  ;;  %v3209_v52 = vand.u32 2147483648, %v5802_v53 }
 0x3b5   : > { %v5816_v41 = vpop.eup %3892  ;;  %3904 = vrcp.f32 %v5819_v39  ;;  %v3195_v12 = vor.u32 1.1754944e-38, %v3194_v23 }
 0x3b6   : > { %v3895_v43 = vpop.eup %3894  ;;  %v3154_v9 = vmul.f32 %v5816_v41, %v5795_v49  ;;  %vm3159_vm8 = vweird.f32 %v5816_v41  ;;  %v3210_v24 = vor.u32 1.1754944e-38, %v3209_v52  ;;  %3906 = vrcp.f32 %v5824_v0 }
 0x3b7   : > { %v3897_v17 = vpop.eup %3896  ;;  %v3169_v15 = vmul.f32 %v3895_v43, %v3010_v34  ;;  %vm3174_vm4 = vweird.f32 %v3895_v43  ;;  %vm5853_vm13 = vmor %vm3158_vm1, %vm3159_vm8  ;;  %vm3163_vm1 = vcmp.eq.f32.partialorder %v3162_v61, 8.507059e+37  ;;  %v3224_v34 = vand.u32 2147483648, %v5805_v50 }
 0x3b8   : > { %v3899_v38 = vpop.eup %3898  ;;  %v3155_v47 = vsub.f32 1.0, %v3154_v9  ;;  %v3184_v2 = vmul.f32 %v3897_v17, %v5799_v31  ;;  %vm3189_vm3 = vweird.f32 %v3897_v17  ;;  %vm3175_vm5 = vmor %vm3173_vm0, %vm3174_vm4  ;;  %vm3193_vm0 = vcmp.eq.f32.partialorder %v3192_v8, 8.507059e+37 }
 0x3b9   : > { %v5837_v16 = vpop.eup %3900  ;;  %v3170_v48 = vsub.f32 1.0, %v3169_v15  ;;  %v3199_v32 = vmul.f32 %v3899_v38, %v5802_v53  ;;  %vm3204_vm9 = vweird.f32 %v3899_v38  ;;  %vm3190_vm12 = vmor %vm3188_vm2, %vm3189_vm3  ;;  %vm3218_vm2 = vweird.f32 %v5805_v50 }
 0x3ba   : > { %v5842_v29 = vpop.eup %3902  ;;  %v3156_v7 = vmul.f32 %v5816_v41, %v3155_v47  ;;  %v3185_v35 = vsub.f32 1.0, %v3184_v2  ;;  %v3214_v45 = vmul.f32 %v5837_v16, %v5805_v50  ;;  %vm3219_vm14 = vweird.f32 %v5837_v16  ;;  %vm5874_vm6 = vmor %vm3203_vm15, %vm3204_vm9 }
 0x3bb   : > { %v3171_v60 = vmul.f32 %v3895_v43, %v3170_v48  ;;  %v3200_v27 = vsub.f32 1.0, %v3199_v32  ;;  %v3229_v6 = vmul.f32 %v5842_v29, %v5809_v62  ;;  %v5860_v26 = vpop.eup %3904  ;;  %v3222_v53 = vand.u32 2147483647, %v5805_v50  ;;  %vm5888_vm15 = vmor %vm3218_vm2, %vm3219_vm14 }
 0x3bc   : > { %v3157_v14 = vadd.f32 %v5816_v41, %v3156_v7  ;;  %v3186_v63 = vmul.f32 %v3897_v17, %v3185_v35  ;;  %v3215_v10 = vsub.f32 1.0, %v3214_v45  ;;  %vm3234_vm8 = vweird.f32 %v5842_v29 }
 0x3bd   : > { %v3172_v1 = vadd.f32 %v3895_v43, %v3171_v60  ;;  %v3201_v44 = vmul.f32 %v3899_v38, %v3200_v27  ;;  %v3230_v3 = vsub.f32 1.0, %v3229_v6  ;;  %v3244_v50 = vmul.f32 %v5860_v26, %v5819_v39 }
 0x3be   : > { %v3187_v11 = vadd.f32 %v3897_v17, %v3186_v63  ;;  %v3216_v22 = vmul.f32 %v5837_v16, %v3215_v10  ;;  %v3161_v59 = vsel %vm5853_vm13, %v5816_v41, %v3157_v14  ;;  %vm3223_vm4 = vcmp.eq.f32.partialorder %v3222_v53, 8.507059e+37 }
 0x3bf   : > { %v3176_v21 = vsel %vm3175_vm5, %v3895_v43, %v3172_v1  ;;  %v3202_v56 = vadd.f32 %v3899_v38, %v3201_v44  ;;  %v3231_v36 = vmul.f32 %v5842_v29, %v3230_v3  ;;  %v3166_v5 = vsel %vm3163_vm1, %v3165_v20, %v3161_v59 }
 0x3c0   : > { %v3181_v40 = vsel %vm5829_vm7, %v3180_v25, %v3176_v21  ;;  %v3191_v13 = vsel %vm3190_vm12, %v3897_v17, %v3187_v11  ;;  %v3217_v4 = vadd.f32 %v5837_v16, %v3216_v22  ;;  %vm3208_vm7 = vcmp.eq.f32.partialorder %v3207_v57, 8.507059e+37  ;;  %v3907_v57 = vpop.eup %3906 }
 0x3c1   : > { %v3206_v49 = vsel %vm5874_vm6, %v3899_v38, %v3202_v56  ;;  %v3196_v31 = vsel %vm3193_vm0, %v3195_v12, %v3191_v13  ;;  %v3182_v51 = vmul.f32 %v3181_v40, %v5582_v46  ;;  %v3232_v9 = vadd.f32 %v5842_v29, %v3231_v36 }
 0x3c2   : > { %v3211_v61 = vsel %vm3208_vm7, %v3210_v24, %v3206_v49  ;;  %v3221_v43 = vsel %vm5888_vm15, %v5837_v16, %v3217_v4  ;;  %v3197_v46 = vmul.f32 %v3196_v31, %v5585_v28  ;;  %v3225_v20 = vor.u32 1.1754944e-38, %v3224_v34 }
 0x3c3   : > { %v3239_v17 = vand.u32 2147483648, %v5809_v62  ;;  %vm3233_vm3 = vweird.f32 %v5809_v62  ;;  %v3237_v15 = vand.u32 2147483647, %v5809_v62  ;;  %v3245_v54 = vsub.f32 1.0, %v3244_v50 }
 0x3c4   : > { %v3167_v25 = vmul.f32 %v3166_v5, %v5591_v30  ;;  %v3212_v8 = vmul.f32 %v3211_v61, %v5587_v55  ;;  %v3226_v38 = vsel %vm3223_vm4, %v3225_v20, %v3221_v43  ;;  %vm5908_vm13 = vmor %vm3233_vm3, %vm3234_vm8  ;;  %v3303_v47 = vrot.slane %v3182_v51, 7 }
 0x3c5   : > { %v3236_v2 = vsel %vm5908_vm13, %v5842_v29, %v3232_v9  ;;  %v3246_v23 = vmul.f32 %v5860_v26, %v3245_v54  ;;  %vm3249_vm9 = vweird.f32 %v5860_v26  ;;  %v3254_v30 = vand.u32 2147483648, %v5819_v39 }
 0x3c6   : > { %v3240_v62 = vor.u32 1.1754944e-38, %v3239_v17  ;;  %v3252_v55 = vand.u32 2147483647, %v5819_v39  ;;  %v3304_v16 = vsel %vm2521_vm10, %v3303_v47, %v3167_v25  ;;  %v3305_v48 = vrot.slane %v3197_v46, 6 }
 0x3c7   : > { %vm3238_vm5 = vcmp.eq.f32.partialorder %v3237_v15, 8.507059e+37  ;;  %v3247_v32 = vadd.f32 %v5860_v26, %v3246_v23  ;;  %vm3248_vm12 = vweird.f32 %v5819_v39  ;;  %v3227_v29 = vmul.f32 %v3226_v38, %v5589_v19 }
 0x3c8   : > { %v3241_v7 = vsel %vm3238_vm5, %v3240_v62, %v3236_v2  ;;  %vm3250_vm14 = vmor %vm3248_vm12, %vm3249_vm9  ;;  %v3306_v35 = vsel %vm2524_vm11, %v3305_v48, %v3304_v16  ;;  %v3255_v60 = vor.u32 1.1754944e-38, %v3254_v30  ;;  %v3259_v27 = vmul.f32 %v3907_v57, %v5824_v0 }
 0x3c9   : > { %v3251_v45 = vsel %vm3250_vm14, %v5860_v26, %v3247_v32  ;;  %v3307_v6 = vrot.slane %v3212_v8, 5  ;;  %vm3253_vm10 = vcmp.eq.f32.partialorder %v3252_v55, 8.507059e+37  ;;  %v3242_v14 = vmul.f32 %v3241_v7, %v5596_v42 }
 0x3ca   : > { %v3256_v63 = vsel %vm3253_vm10, %v3255_v60, %v3251_v45  ;;  %v3260_v10 = vsub.f32 1.0, %v3259_v27  ;;  %vm6124_vm6 = vcmask 1043459   ;;  %v3269_v19 = vand.u32 2147483648, %v5824_v0 }
 0x3cb   : > { %v3308_v39 = vsel %vm6124_vm6, %v3307_v6, %v3306_v35  ;;  %v3309_v58 = vrot.slane %v3227_v29, 4  ;;  %vm3264_vm1 = vweird.f32 %v3907_v57  ;;  %v3267_v44 = vand.u32 2147483647, %v5824_v0 }
 0x3cc   : > { %v3261_v1 = vmul.f32 %v3907_v57, %v3260_v10  ;;  %v3257_v3 = vmul.f32 %v3256_v63, %v5606_v18  ;;  %vm6125_vm11 = vcmask 1044484   ;;  %vm3263_vm0 = vweird.f32 %v5824_v0 }
 0x3cd   : > { %v3310_v11 = vsel %vm6125_vm11, %v3309_v58, %v3308_v39  ;;  %v3311_v42 = vrot.slane %v3242_v14, 3  ;;  %vm3265_vm2 = vmor %vm3263_vm0, %vm3264_vm1  ;;  %v3270_v52 = vor.u32 1.1754944e-38, %v3269_v19  ;;  %vm3268_vm7 = vcmp.eq.f32.partialorder %v3267_v44, 8.507059e+37 }
 0x3ce   : > { %v3262_v12 = vadd.f32 %v3907_v57, %v3261_v1  ;;  %vm6127_vm15 = vcmask 1045509   ;;  %v3313_v59 = vrot.slane %v3257_v3, 2  ;;  %vm6128_vm8 = vcmask 1046534  }
 0x3cf   : > { %v3312_v26 = vsel %vm6127_vm15, %v3311_v42, %v3310_v11  ;;  %vm6129_vm4 = vcmask 1047559   ;;  %vm6130_vm3 = vcmask 130048  }
 0x3d0   : > { %v3266_v22 = vsel %vm3265_vm2, %v3907_v57, %v3262_v12  ;;  %v3314_v0 = vsel %vm6128_vm8, %v3313_v59, %v3312_v26 }
 0x3d1   : > { %v3271_v18 = vsel %vm3268_vm7, %v3270_v52, %v3266_v22 }
 0x3d2   : > { %v3272_v21 = vmul.f32 %v3271_v18, %v5612_v33 }
 0x3d4   : > { %v3315_v56 = vrot.slane %v3272_v21, 1 }
 0x3d6   : > { %v3316_v40 = vsel %vm6129_vm4, %v3315_v56, %v3314_v0 }
 0x3d7   : > { %3320 = vst.msk [vmem:[%s5791_s28 + $0x8] sm:$0xff] %vm6130_vm3, %v3316_v40 }
 0x3d8   : > { %3963 = shalt.err (!%p3960_p13)
}
 0x3d9   : > { %3710 = dma.vmem_to_hbm [thread:$0]  (%p4122_p4), %s3390_s23, 256, %s3392_s25, %s3370_s18, %s4022_s0, %s4022_s0, %s4023_s1  }
 0x3da PF: > { %p3721_p0 = scmp.ge.s32.totalorder %s4018_s20, 2  ;;  %s3425_s11 = sand.u32 1, %s3998_s15  }
 0x3db   : > { %s3426_s28 = scalar_lea.sflag [#allocation4], %s3425_s11 }
 0x3dc   : > { %p3715_p1 = pnand %p3721_p0, %p4129_p8 }
 0x3de   : > { %p3716_p2 = pneg %p3715_p1 }
 0x3e0   : > { %3989 = dma.done.wait (%p3716_p2), %s3426_s28, 256  }
 0x3e1   : > { %3991 = vsyncadd (%p3716_p2), %s3426_s28, 4294967040  ;;  %s3436_s30 = scalar_lea.sflag [#allocation6], %s3425_s11 }
 0x3e2   : > { %3993 = dma.done.wait (%p3716_p2), %s3436_s30, 256  }
 0x3e3   : > { %3995 = vsyncadd (%p3716_p2), %s3436_s30, 4294967040  ;;  %s28_s20 = sadd.s32 1, %s4018_s20   ;;  %s6131_s15 = smov %s4002_s16 }
 0x3e4   : > { %p25_p3 = scmp.ge.s32.totalorder %s28_s20, 4   ;;  %s6132_s16 = smov %s4006_s17 }
 0x3e5   : > { %s6133_s17 = smov %s4135_s27  ;;  %s6134_s18 = smov %s4014_s19 }
 0x3e6   : > { %s6135_s19 = smov %s6137_s22  ;;  %27 = sbr.rel (!%p25_p3) target bundleno = 10 (0xa), region = 114 }
 0x3eb   :  { %3442 = vsyncpa [#allocation4], 1 }
 0x3ec   :  { %3444 = vsyncpa [#allocation4 + $0x1], 1 }
 0x3ed   :  { %3445 = vsyncpa [#allocation6], 1 }
 0x3ee   :  { %3447 = vsyncpa [#allocation6 + $0x1], 1 }

</bundles_post_ra>
